<compile_context>
chip_gen: v7x
topology: tpu7x:2x2x1
jax: 0.10.0
libtpu: 0.0.40
codegen_flags: <defaults>
</compile_context>

<pallas_src>
from functools import partial

import jax
import jax.numpy as jnp
from jax.experimental import pallas as pl
from jax.experimental.pallas import tpu as pltpu


def _round_up(x, m):
    return ((x + m - 1) // m) * m


def _tile_m(M):
    """Pick TM so the 'parallel' M axis has >=2 tiles (keeps both v7x
    TensorCores busy) while tiles stay big (single-TC v5e/v6e roofline)."""
    if M <= 8:
        TM = _round_up(max(M, 1), 8)
        return TM, TM
    M_pad = _round_up(M, 16)
    half = M_pad // 2
    if half <= 512:
        return half, M_pad
    M_pad = _round_up(M, 512)
    return 512, M_pad


# ----------------------------------------------------------------------------
# Tiled matmul + bias (+ fused input/output ReLU); bf16 in, f32 accumulate
# ----------------------------------------------------------------------------

def _make_mm_kernel(relu_in, relu_out):
    def kernel(a_ref, w_ref, b_ref, o_ref, acc_ref):
        kk = pl.program_id(1)

        @pl.when(kk == 0)
        def _():
            acc_ref[...] = jnp.zeros_like(acc_ref)

        a = a_ref[...]
        if relu_in:
            a = jnp.maximum(a, 0)
        acc_ref[...] += jnp.dot(a, w_ref[...],
                                preferred_element_type=jnp.float32)

        @pl.when(kk == pl.num_programs(1) - 1)
        def _():
            out = acc_ref[...] + b_ref[...]
            if relu_out:
                out = jnp.maximum(out, 0.0)
            o_ref[...] = out.astype(o_ref.dtype)

    return kernel


def pallas_matmul_bias(a, w_bf16, b, relu_in=False, relu_out=False,
                       out_dtype=jnp.bfloat16):
    """out[:M,:N] = [relu_out](relu_in(a) @ w + b); tiled over (M, K)."""
    M, K = a.shape
    N = w_bf16.shape[1]

    N_pad = _round_up(N, 128)
    K_pad = _round_up(K, 128)
    if K_pad <= 1024:
        TK = K_pad
    else:
        TK = 512
        K_pad = _round_up(K_pad, TK)
    TM, M_pad = _tile_m(M)

    a_p = jnp.pad(a.astype(jnp.bfloat16), ((0, M_pad - M), (0, K_pad - K)))
    w_p = jnp.pad(w_bf16, ((0, K_pad - K), (0, N_pad - N)))
    b_p = jnp.pad(b.reshape(1, N).astype(jnp.float32),
                  ((0, 0), (0, N_pad - N)))

    n_m, n_k = M_pad // TM, K_pad // TK
    out_bytes = int(jnp.dtype(out_dtype).itemsize)
    cost = pl.CostEstimate(
        flops=2 * M_pad * K_pad * N_pad,
        transcendentals=0,
        bytes_accessed=(2 * M_pad * K_pad            # bf16 A, read once
                        + 2 * n_m * K_pad * N_pad    # bf16 W, re-read per M tile
                        + 4 * N_pad                  # bias
                        + out_bytes * M_pad * N_pad),
    )

    out = pl.pallas_call(
        _make_mm_kernel(relu_in, relu_out),
        grid=(n_m, n_k),
        in_specs=[pl.BlockSpec((TM, TK), lambda m, k: (m, k)),
                  pl.BlockSpec((TK, N_pad), lambda m, k: (k, 0)),
                  pl.BlockSpec((1, N_pad), lambda m, k: (0, 0))],
        out_specs=pl.BlockSpec((TM, N_pad), lambda m, k: (m, 0)),
        out_shape=jax.ShapeDtypeStruct((M_pad, N_pad), out_dtype),
        scratch_shapes=[pltpu.VMEM((TM, N_pad), jnp.float32)],
        compiler_params=pltpu.CompilerParams(
            dimension_semantics=("parallel", "arbitrary"),
            vmem_limit_bytes=48 * 1024 * 1024,
        ),
        cost_estimate=cost,
    )(a_p, w_p, b_p)
    return out[:M, :N]


# ----------------------------------------------------------------------------
# Fused 3x3 stride-1 conv / ResBlock kernel ("G layout": flat padded raster)
# ----------------------------------------------------------------------------

def _g_geom(H, W):
    Hp, Wp = H + 2, W + 2
    G = Hp * Wp                 # rows in the 1-padded raster
    EXT = Wp + 1                # zero-row extension at each end (for tap shifts)
    return Hp, Wp, G, EXT


def to_g(x_nhwc):
    """(B,H,W,C) -> (B, G+2*EXT, C) bf16 flat raster with zero pad ring+ext."""
    B, H, W, C = x_nhwc.shape
    _, _, G, EXT = _g_geom(H, W)
    xp = jnp.pad(x_nhwc, ((0, 0), (1, 1), (1, 1), (0, 0))).reshape(B, G, C)
    return jnp.pad(xp, ((0, 0), (EXT, EXT), (0, 0))).astype(jnp.bfloat16)


def from_g(xg, H, W):
    """(B, G+2*EXT, C) -> (B,H,W,C) (drop extension rows and pad ring)."""
    B, _, C = xg.shape
    Hp, Wp, G, EXT = _g_geom(H, W)
    return xg[:, EXT:EXT + G, :].reshape(B, Hp, Wp, C)[:, 1:1 + H, 1:1 + W, :]


def _interior_mask(H, W):
    Hp, Wp, G, _ = _g_geom(H, W)
    rows = jnp.arange(G) // Wp
    cols = jnp.arange(G) % Wp
    m = (rows >= 1) & (rows <= H) & (cols >= 1) & (cols <= W)
    return m.astype(jnp.float32).reshape(G, 1)


def _make_g3x3_kernel(H, W, relu_in, relu_out, fuse_1x1):
    Hp, Wp, G, EXT = _g_geom(H, W)

    def kernel(x_ref, w1_ref, b1_ref, *rest):
        if fuse_1x1:
            w2_ref, b2_ref, mask_ref, o_ref = rest
        else:
            mask_ref, o_ref = rest

        cmid = w1_ref.shape[2]
        acc = jnp.zeros((G, cmid), jnp.float32)
        t = 0
        for a in (-1, 0, 1):          # 9 taps = contiguous row-shifted slices
            for bb in (-1, 0, 1):
                start = EXT + a * Wp + bb
                p = x_ref[0, pl.ds(start, G), :]
                if relu_in:
                    p = jnp.maximum(p, 0)
                acc = acc + jnp.dot(p, w1_ref[t],
                                    preferred_element_type=jnp.float32)
                t += 1
        h = acc + b1_ref[...]

        if fuse_1x1:
            # ResBlock tail: ReLU -> 1x1 conv -> mask pad ring -> + residual.
            h = jnp.maximum(h, 0.0).astype(jnp.bfloat16)
            out = jnp.dot(h, w2_ref[...],
                          preferred_element_type=jnp.float32) + b2_ref[...]
            out = out * mask_ref[...]
            out = out + x_ref[0, pl.ds(EXT, G), :].astype(jnp.float32)
        else:
            out = h * mask_ref[...]
            if relu_out:
                out = jnp.maximum(out, 0.0)

        o_ref[0] = jnp.zeros((o_ref.shape[1], o_ref.shape[2]), o_ref.dtype)
        o_ref[0, pl.ds(EXT, G), :] = out.astype(o_ref.dtype)

    return kernel


def pallas_g3x3(xg, w_taps, b1, H, W, *, relu_in=False, relu_out=False,
                w2=None, b2=None):
    """Fused 3x3/s1 conv (optionally + ReLU + 1x1 conv + residual = ResBlock)
    over the flat padded raster layout.  Grid is one image per step."""
    B, R_ext, Cin = xg.shape
    Hp, Wp, G, EXT = _g_geom(H, W)
    assert R_ext == G + 2 * EXT

    fuse = w2 is not None
    Cmid = w_taps.shape[2]
    Cout = w2.shape[1] if fuse else Cmid
    mask = _interior_mask(H, W)
    b1_2d = b1.reshape(1, Cmid).astype(jnp.float32)

    inputs = [xg, w_taps, b1_2d]
    in_specs = [
        pl.BlockSpec((1, R_ext, Cin), lambda b: (b, 0, 0)),
        pl.BlockSpec((9, Cin, Cmid), lambda b: (0, 0, 0)),
        pl.BlockSpec((1, Cmid), lambda b: (0, 0)),
    ]
    if fuse:
        b2_2d = b2.reshape(1, Cout).astype(jnp.float32)
        inputs += [w2, b2_2d]
        in_specs += [pl.BlockSpec((Cmid, Cout), lambda b: (0, 0)),
                     pl.BlockSpec((1, Cout), lambda b: (0, 0))]
    inputs.append(mask)
    in_specs.append(pl.BlockSpec((G, 1), lambda b: (0, 0)))

    return pl.pallas_call(
        _make_g3x3_kernel(H, W, relu_in, relu_out, fuse),
        grid=(B,),
        in_specs=in_specs,
        out_specs=pl.BlockSpec((1, R_ext, Cout), lambda b: (b, 0, 0)),
        out_shape=jax.ShapeDtypeStruct((B, R_ext, Cout), jnp.bfloat16),
        compiler_params=pltpu.CompilerParams(
            dimension_semantics=("parallel",),
            vmem_limit_bytes=48 * 1024 * 1024,
        ),
    )(*inputs)


# ----------------------------------------------------------------------------
# Vector quantization (nearest-neighbour codebook), tiled over rows
# ----------------------------------------------------------------------------

def _vq_kernel(x_ref, cb_ref, e2_ref, q_ref):
    x = x_ref[...]                          # (TM, D_pad) bf16
    cb = cb_ref[...]                        # (E_pad, D_pad) f32, resident
    x32 = x.astype(jnp.float32)
    x2 = jnp.sum(x32 * x32, axis=-1, keepdims=True)
    dots = jax.lax.dot_general(x, cb.astype(jnp.bfloat16),
                               (((1,), (1,)), ((), ())),
                               preferred_element_type=jnp.float32)
    dists = x2 - 2.0 * dots + e2_ref[...]   # padded entries get +1e30

    TM, E_pad = dists.shape
    iota = jax.lax.broadcasted_iota(jnp.int32, (TM, E_pad), 1)
    mind = jnp.min(dists, axis=-1, keepdims=True)
    idx = jnp.min(jnp.where(dists <= mind, iota, jnp.int32(E_pad)),
                  axis=-1, keepdims=True)
    onehot = (iota == idx).astype(jnp.float32)
    q_ref[...] = jnp.dot(onehot, cb,
                         preferred_element_type=jnp.float32).astype(q_ref.dtype)


def pallas_vq(x_flat, codebook):
    M, D = x_flat.shape
    E = codebook.shape[0]
    D_pad = _round_up(D, 128)
    E_pad = _round_up(E, 128)
    TM, M_pad = _tile_m(M)

    x_p = jnp.pad(x_flat.astype(jnp.bfloat16),
                  ((0, M_pad - M), (0, D_pad - D)))
    cb_p = jnp.pad(codebook.astype(jnp.float32),
                   ((0, E_pad - E), (0, D_pad - D)))
    e2 = jnp.sum(codebook * codebook, axis=-1)
    e2_p = jnp.pad(e2, (0, E_pad - E),
                   constant_values=1e30).reshape(1, E_pad).astype(jnp.float32)

    quant = pl.pallas_call(
        _vq_kernel,
        grid=(M_pad // TM,),
        in_specs=[pl.BlockSpec((TM, D_pad), lambda m: (m, 0)),
                  pl.BlockSpec((E_pad, D_pad), lambda m: (0, 0)),
                  pl.BlockSpec((1, E_pad), lambda m: (0, 0))],
        out_specs=pl.BlockSpec((TM, D_pad), lambda m: (m, 0)),
        out_shape=jax.ShapeDtypeStruct((M_pad, D_pad), jnp.bfloat16),
        compiler_params=pltpu.CompilerParams(
            dimension_semantics=("parallel",),
            vmem_limit_bytes=48 * 1024 * 1024,
        ),
    )(x_p, cb_p, e2_p)
    return quant[:M, :D]


# ----------------------------------------------------------------------------
# MSE reconstruction loss: streaming tiled reduction into an SMEM scalar
# ----------------------------------------------------------------------------

def _mse_kernel(a_ref, b_ref, o_ref):
    @pl.when(pl.program_id(0) == 0)
    def _():
        o_ref[0, 0] = 0.0

    d = a_ref[...] - b_ref[...]
    o_ref[0, 0] += jnp.sum(d * d)


def pallas_mse(a, b):
    n = a.size
    lane = 128
    rows = _round_up(pl.cdiv(n, lane), 8)
    TR = rows if rows <= 512 else 512
    rows_pad = _round_up(rows, TR)
    total = rows_pad * lane

    a2 = jnp.pad(a.reshape(-1).astype(jnp.float32),
                 (0, total - n)).reshape(rows_pad, lane)
    b2 = jnp.pad(b.reshape(-1).astype(jnp.float32),
                 (0, total - n)).reshape(rows_pad, lane)

    s = pl.pallas_call(
        _mse_kernel,
        grid=(rows_pad // TR,),
        in_specs=[pl.BlockSpec((TR, lane), lambda i: (i, 0)),
                  pl.BlockSpec((TR, lane), lambda i: (i, 0))],
        out_specs=pl.BlockSpec(memory_space=pltpu.MemorySpace.SMEM),
        out_shape=jax.ShapeDtypeStruct((1, 1), jnp.float32),
        compiler_params=pltpu.CompilerParams(
            dimension_semantics=("arbitrary",)),
    )(a2, b2)
    return s[0, 0] / n


# ----------------------------------------------------------------------------
# Conv glue: im2col patch extraction (plain JAX), matmul inside Pallas
# ----------------------------------------------------------------------------

def _im2col(x, k, stride, pad):
    B, H, W, C = x.shape
    xp = jnp.pad(x, ((0, 0), (pad, pad), (pad, pad), (0, 0)))
    Ho = (H + 2 * pad - k) // stride + 1
    Wo = (W + 2 * pad - k) // stride + 1
    cols = []
    for di in range(k):
        for dj in range(k):
            cols.append(xp[:, di:di + Ho * stride:stride,
                           dj:dj + Wo * stride:stride, :])
    patches = jnp.concatenate(cols, axis=-1)             # (B, Ho, Wo, k*k*C)
    return patches.reshape(B * Ho * Wo, k * k * C), (B, Ho, Wo)


def conv2d_im2col(x, w_kn, bias, k, stride, pad, relu_in=False,
                  out_dtype=jnp.bfloat16):
    patches, (B, Ho, Wo) = _im2col(x.astype(jnp.bfloat16), k, stride, pad)
    cout = w_kn.shape[1]
    out = pallas_matmul_bias(patches, w_kn, bias, relu_in=relu_in,
                             out_dtype=out_dtype)
    return out.reshape(B, Ho, Wo, cout)


def conv_transpose4x4_s2(x, w_sub, b_sub, relu_in=False,
                         out_dtype=jnp.bfloat16):
    """ConvTranspose2d(k=4, s=2, p=1) via the subpixel decomposition: one
    2x2/stride-1 im2col over the 1-padded input, one matmul producing all four
    output parities (N = 4*Cout), then a pixel shuffle.  No zero-FLOP work."""
    B, H, W, Cin = x.shape
    Cout = w_sub.shape[1] // 4
    patches, _ = _im2col(x.astype(jnp.bfloat16), k=2, stride=1, pad=1)
    y = pallas_matmul_bias(patches, w_sub, b_sub, relu_in=relu_in,
                           out_dtype=out_dtype)
    y = y.reshape(B, H + 1, W + 1, 4, Cout)
    subs = [y[:, py:py + H, px:px + W, 2 * py + px, :]
            for py in (0, 1) for px in (0, 1)]
    sub = jnp.stack(subs, axis=3).reshape(B, H, W, 2, 2, Cout)
    return jnp.transpose(sub, (0, 1, 3, 2, 4, 5)).reshape(B, 2 * H, 2 * W, Cout)


# ----------------------------------------------------------------------------
# Parameters (deterministic init; shapes follow the PyTorch module __init__)
# ----------------------------------------------------------------------------

def _conv_params(key, cout, cin, k):
    wkey, bkey = jax.random.split(key)
    scale = 1.0 / jnp.sqrt(float(cin * k * k))
    w = jax.random.uniform(wkey, (cout, cin, k, k), jnp.float32, -scale, scale)
    b = jax.random.uniform(bkey, (cout,), jnp.float32, -scale, scale)
    return w, b


def _convT_params(key, cin, cout, k):
    wkey, bkey = jax.random.split(key)
    scale = 1.0 / jnp.sqrt(float(cout * k * k))
    w = jax.random.uniform(wkey, (cin, cout, k, k), jnp.float32, -scale, scale)
    b = jax.random.uniform(bkey, (cout,), jnp.float32, -scale, scale)
    return w, b


def _prep_conv_w_mat(w_oihw):
    """(Cout,Cin,k,k) -> im2col-ordered (k*k*Cin, Cout) bf16."""
    cout, cin, k, _ = w_oihw.shape
    return (jnp.transpose(w_oihw, (2, 3, 1, 0))
            .reshape(k * k * cin, cout).astype(jnp.bfloat16))


def _prep_conv_w_taps(w_oihw):
    """(Cout,Cin,3,3) -> per-tap (9, Cin, Cout) bf16 for the fused 3x3 kernel."""
    cout, cin, k, _ = w_oihw.shape
    return (jnp.transpose(w_oihw, (2, 3, 1, 0))
            .reshape(k * k, cin, cout).astype(jnp.bfloat16))


def _prep_conv1x1_w(w_oihw):
    return jnp.transpose(w_oihw[:, :, 0, 0], (1, 0)).astype(jnp.bfloat16)


def _prep_convT3_taps(w_iohw):
    """ConvTranspose2d(k=3,s=1,p=1) == conv with flipped/transposed weight."""
    w_conv = jnp.transpose(w_iohw[:, :, ::-1, ::-1], (1, 0, 2, 3))
    return _prep_conv_w_taps(w_conv)


def _prep_convT4_subpixel(w_iohw, b):
    """ConvTranspose2d(k=4,s=2,p=1) weight (Cin,Cout,4,4) -> combined subpixel
    weight (4*Cin, 4*Cout): output channel block p = 2*py+px holds the 2x2
    sub-convolution producing output parity (py, px)."""
    cin, cout = int(w_iohw.shape[0]), int(w_iohw.shape[1])
    wm = jnp.zeros((4 * cin, 4 * cout), jnp.float32)
    for py in (0, 1):
        for px in (0, 1):
            p = 2 * py + px
            for di in (0, 1):
                for dj in (0, 1):
                    t = 2 * di + dj
                    ky = (3 - py) - 2 * di
                    kx = (3 - px) - 2 * dj
                    wm = wm.at[t * cin:(t + 1) * cin,
                               p * cout:(p + 1) * cout].set(w_iohw[:, :, ky, kx])
    bm = jnp.concatenate([b, b, b, b])
    return wm.astype(jnp.bfloat16), bm


def init_vqvae_params(key, in_channel, hid_channel, n_res_block, n_res_channel,
                      scale_factor, embd_dim, n_embed):
    keys = iter(jax.random.split(key, 64))
    params = {}

    # Encoder: SubSampleBlock strided 4x4/s2 convs
    hid = hid_channel // (2 ** scale_factor)
    enc_strided = []
    w, b = _conv_params(next(keys), hid, in_channel, 4)
    enc_strided.append(dict(w=_prep_conv_w_mat(w), b=b))
    for _ in range(scale_factor):
        w, b = _conv_params(next(keys), hid * 2, hid, 4)
        enc_strided.append(dict(w=_prep_conv_w_mat(w), b=b))
        hid *= 2
    params["enc_strided"] = enc_strided

    # Encoder trailing 3x3/s1 conv (hid == hid_channel at this point)
    w, b = _conv_params(next(keys), hid_channel, hid, 3)
    params["enc_conv3"] = dict(w=_prep_conv_w_taps(w), b=b)

    # Encoder ResBlocks
    params["enc_res"] = []
    for _ in range(n_res_block):
        w1, b1 = _conv_params(next(keys), n_res_channel, hid_channel, 3)
        w2, b2 = _conv_params(next(keys), hid_channel, n_res_channel, 1)
        params["enc_res"].append(dict(w1=_prep_conv_w_taps(w1), b1=b1,
                                      w2=_prep_conv1x1_w(w2), b2=b2))

    w, b = _conv_params(next(keys), embd_dim, hid_channel, 1)
    params["enc_out"] = dict(w=_prep_conv1x1_w(w), b=b)
    w, b = _conv_params(next(keys), hid_channel, embd_dim, 1)
    params["dec_in"] = dict(w=_prep_conv1x1_w(w), b=b)
    params["codebook"] = jax.random.normal(next(keys), (n_embed, embd_dim),
                                           jnp.float32)

    # Decoder ResBlocks
    params["dec_res"] = []
    for _ in range(n_res_block):
        w1, b1 = _conv_params(next(keys), n_res_channel, hid_channel, 3)
        w2, b2 = _conv_params(next(keys), hid_channel, n_res_channel, 1)
        params["dec_res"].append(dict(w1=_prep_conv_w_taps(w1), b1=b1,
                                      w2=_prep_conv1x1_w(w2), b2=b2))

    # Decoder: SubsampleTransposeBlock
    w, b = _convT_params(next(keys), hid_channel, hid_channel, 3)
    params["dec_conv3"] = dict(w=_prep_convT3_taps(w), b=b)
    hidt = hid_channel
    dec_up = []
    for _ in range(scale_factor):
        w, b = _convT_params(next(keys), hidt, hidt // 2, 4)
        wm, bm = _prep_convT4_subpixel(w, b)
        dec_up.append(dict(w=wm, b=bm))
        hidt //= 2
    w, b = _convT_params(next(keys), hidt, in_channel, 4)
    wm, bm = _prep_convT4_subpixel(w, b)
    dec_up.append(dict(w=wm, b=bm))
    params["dec_up"] = dec_up

    return params


# ----------------------------------------------------------------------------
# VQVAE forward (matches the PyTorch module's forward semantics)
# ----------------------------------------------------------------------------

@jax.jit
def vqvae_forward(params, x_nchw):
    x = jnp.transpose(x_nchw, (0, 2, 3, 1)).astype(jnp.float32)  # NHWC f32
    B = x.shape[0]

    # Encoder SubSampleBlock: Conv4x4/s2, (ReLU, Conv4x4/s2)*, ReLU, Conv3x3
    e = x
    for li, layer in enumerate(params["enc_strided"]):
        e = conv2d_im2col(e, layer["w"], layer["b"], k=4, stride=2, pad=1,
                          relu_in=(li > 0))
    Hh, Wh = e.shape[1], e.shape[2]
    eg = to_g(e)
    eg = pallas_g3x3(eg, params["enc_conv3"]["w"], params["enc_conv3"]["b"],
                     Hh, Wh, relu_in=True)

    # Encoder ResBlocks: out = Conv1x1(ReLU(Conv3x3(ReLU(in)))) + in (fused)
    for rb in params["enc_res"]:
        eg = pallas_g3x3(eg, rb["w1"], rb["b1"], Hh, Wh, relu_in=True,
                         w2=rb["w2"], b2=rb["b2"])
    e = from_g(eg, Hh, Wh)

    # Encoder trailing ReLU fused into enc_out 1x1 conv
    hid = e.shape[-1]
    flat = e.reshape(B * Hh * Wh, hid)
    enc = pallas_matmul_bias(flat, params["enc_out"]["w"],
                             params["enc_out"]["b"], relu_in=True)

    # Vector quantization ('b c h w -> b (h w) c' is free in NHWC)
    quant = pallas_vq(enc, params["codebook"])

    # dec_in 1x1 conv
    d = pallas_matmul_bias(quant, params["dec_in"]["w"], params["dec_in"]["b"])
    d = d.reshape(B, Hh, Wh, hid)

    # Decoder ResBlocks, then ReLU + ConvT3x3/s1 (all in G layout)
    dg = to_g(d)
    for rb in params["dec_res"]:
        dg = pallas_g3x3(dg, rb["w1"], rb["b1"], Hh, Wh, relu_in=True,
                         w2=rb["w2"], b2=rb["b2"])
    dg = pallas_g3x3(dg, params["dec_conv3"]["w"], params["dec_conv3"]["b"],
                     Hh, Wh, relu_in=True)
    d = from_g(dg, Hh, Wh)

    # Upsampling: (ReLU, ConvT4x4/s2)* via subpixel decomposition
    ups = params["dec_up"]
    for li, layer in enumerate(ups):
        last = li == len(ups) - 1
        d = conv_transpose4x4_s2(
            d, layer["w"], layer["b"], relu_in=True,
            out_dtype=jnp.float32 if last else jnp.bfloat16)

    recon_loss = pallas_mse(d, x)
    recons = jnp.transpose(d, (0, 3, 1, 2))  # back to NCHW
    return recons, recon_loss


if __name__ == "__main__":
    # Small deterministic config:
    B, C_IN, HW = 2, 4, 16
    HID, N_RES_BLOCK, N_RES_CH, SCALE = 32, 1, 16, 1
    EMBD_DIM, N_EMBED = 16, 32

    key = jax.random.PRNGKey(0)
    pkey, xkey = jax.random.split(key)
    params = init_vqvae_params(pkey, C_IN, HID, N_RES_BLOCK, N_RES_CH,
                               SCALE, EMBD_DIM, N_EMBED)
    x = jax.random.normal(xkey, (B, C_IN, HW, HW), jnp.float32)

    recons, loss = vqvae_forward(params, x)
    jax.block_until_ready((recons, loss))

    assert recons.shape == (B, C_IN, HW, HW), recons.shape
    assert loss.shape == (), loss.shape
    assert bool(jnp.isfinite(loss))
    print("KERNEL_OK")
</pallas_src>

<mosaic_0001>
module attributes {stable_mosaic.version = 11 : i64} {
  func.func @kernel(%arg0: i32, %arg1: i32, %arg2: memref<64x128xbf16, #tpu.memory_space<vmem>>, %arg3: memref<128x128xbf16, #tpu.memory_space<vmem>>, %arg4: memref<1x128xf32, #tpu.memory_space<vmem>>, %arg5: memref<64x128xbf16, #tpu.memory_space<vmem>>, %arg6: memref<64x128xf32, #tpu.memory_space<vmem>>) attributes {dimension_semantics = [#tpu.dimension_semantics<parallel>, #tpu.dimension_semantics<arbitrary>], iteration_bounds = array<i64: 2, 1>, scalar_prefetch = 0 : i64, scratch_operands = 1 : i64, tpu.core_type = #tpu.core_type<tc>, window_params = [{transform_indices = @transform_0, window_bounds = array<i64: 64, 128>}, {transform_indices = @transform_1, window_bounds = array<i64: 128, 128>}, {pipeline_mode = #tpu.pipeline_mode<synchronous>, transform_indices = @transform_2, window_bounds = array<i64: 1, 128>}, {transform_indices = @transform_3, window_bounds = array<i64: 64, 128>}]} {
    %c0_i32 = arith.constant 0 : i32
    %0 = arith.cmpi eq, %arg1, %c0_i32 : i32
    %1 = arith.extui %0 : i1 to i32
    %c0_i32_0 = arith.constant 0 : i32
    %2 = arith.cmpi ne, %1, %c0_i32_0 : i32
    scf.if %2 {
      %cst_10 = arith.constant 0.000000e+00 : f32
      %12 = vector.broadcast %cst_10 : f32 to vector<64x128xf32>
      %c0_11 = arith.constant 0 : index
      %c0_12 = arith.constant 0 : index
      %13 = vector.load %arg6[%c0_11, %c0_12] : memref<64x128xf32, #tpu.memory_space<vmem>>, vector<64x128xf32>
      tpu.vector_store %arg6[%c0_11, %c0_12], %12 {strides = array<i32>} : memref<64x128xf32, #tpu.memory_space<vmem>>, vector<64x128xf32>,
    } else {
    }
    %c0 = arith.constant 0 : index
    %c0_1 = arith.constant 0 : index
    %3 = vector.load %arg2[%c0, %c0_1] : memref<64x128xbf16, #tpu.memory_space<vmem>>, vector<64x128xbf16>
    %c0_2 = arith.constant 0 : index
    %c0_3 = arith.constant 0 : index
    %4 = vector.load %arg6[%c0_2, %c0_3] : memref<64x128xf32, #tpu.memory_space<vmem>>, vector<64x128xf32>
    %c0_4 = arith.constant 0 : index
    %c0_5 = arith.constant 0 : index
    %5 = vector.load %arg3[%c0_4, %c0_5] : memref<128x128xbf16, #tpu.memory_space<vmem>>, vector<128x128xbf16>
    %cst = arith.constant dense<0.000000e+00> : vector<64x128xf32>
    %6 = tpu.matmul %3, %5, %cst {dimension_numbers = #tpu.dot_dimension_numbers<[1], [0], [0], [1], [0, 0, 1, 1], [], []>} : vector<64x128xbf16>, vector<128x128xbf16>, vector<64x128xf32> -> vector<64x128xf32>
    %7 = arith.addf %4, %6 : vector<64x128xf32>
    %c0_6 = arith.constant 0 : index
    %c0_7 = arith.constant 0 : index
    %8 = vector.load %arg6[%c0_6, %c0_7] : memref<64x128xf32, #tpu.memory_space<vmem>>, vector<64x128xf32>
    tpu.vector_store %arg6[%c0_6, %c0_7], %7 {strides = array<i32>} : memref<64x128xf32, #tpu.memory_space<vmem>>, vector<64x128xf32>,
    %c0_i32_8 = arith.constant 0 : i32
    %9 = arith.cmpi eq, %arg1, %c0_i32_8 : i32
    %10 = arith.extui %9 : i1 to i32
    %c0_i32_9 = arith.constant 0 : i32
    %11 = arith.cmpi ne, %10, %c0_i32_9 : i32
    scf.if %11 {
      %c0_10 = arith.constant 0 : index
      %c0_11 = arith.constant 0 : index
      %12 = vector.load %arg6[%c0_10, %c0_11] : memref<64x128xf32, #tpu.memory_space<vmem>>, vector<64x128xf32>
      %c0_12 = arith.constant 0 : index
      %c0_13 = arith.constant 0 : index
      %13 = vector.load %arg4[%c0_12, %c0_13] : memref<1x128xf32, #tpu.memory_space<vmem>>, vector<1x128xf32>
      %14 = vector.broadcast %13 : vector<1x128xf32> to vector<64x128xf32>
      %15 = arith.addf %12, %14 : vector<64x128xf32>
      %16 = arith.truncf %15 : vector<64x128xf32> to vector<64x128xbf16>
      %c0_14 = arith.constant 0 : index
      %c0_15 = arith.constant 0 : index
      %17 = vector.load %arg5[%c0_14, %c0_15] : memref<64x128xbf16, #tpu.memory_space<vmem>>, vector<64x128xbf16>
      tpu.vector_store %arg5[%c0_14, %c0_15], %16 {strides = array<i32>} : memref<64x128xbf16, #tpu.memory_space<vmem>>, vector<64x128xbf16>,
    } else {
    }
    return
  }
  func.func @transform_0(%arg0: i32, %arg1: i32) -> (i32, i32) {
    %c0_i32 = arith.constant 0 : i32
    return %arg0, %arg1 : i32, i32
  }
  func.func @transform_1(%arg0: i32, %arg1: i32) -> (i32, i32) {
    %c0_i32 = arith.constant 0 : i32
    %c0_i32_0 = arith.constant 0 : i32
    return %arg1, %c0_i32 : i32, i32
  }
  func.func @transform_2(%arg0: i32, %arg1: i32) -> (i32, i32) {
    %c0_i32 = arith.constant 0 : i32
    %c0_i32_0 = arith.constant 0 : i32
    %c0_i32_1 = arith.constant 0 : i32
    return %c0_i32, %c0_i32_0 : i32, i32
  }
  func.func @transform_3(%arg0: i32, %arg1: i32) -> (i32, i32) {
    %c0_i32 = arith.constant 0 : i32
    %c0_i32_0 = arith.constant 0 : i32
    return %arg0, %c0_i32 : i32, i32
  }
}

module attributes {stable_mosaic.version = 11 : i64} {
  func.func @kernel(%arg0: i32, %arg1: i32, %arg2: memref<16x256xbf16, #tpu.memory_space<vmem>>, %arg3: memref<256x128xbf16, #tpu.memory_space<vmem>>, %arg4: memref<1x128xf32, #tpu.memory_space<vmem>>, %arg5: memref<16x128xbf16, #tpu.memory_space<vmem>>, %arg6: memref<16x128xf32, #tpu.memory_space<vmem>>) attributes {dimension_semantics = [#tpu.dimension_semantics<parallel>, #tpu.dimension_semantics<arbitrary>], iteration_bounds = array<i64: 2, 1>, scalar_prefetch = 0 : i64, scratch_operands = 1 : i64, tpu.core_type = #tpu.core_type<tc>, window_params = [{transform_indices = @transform_0, window_bounds = array<i64: 16, 256>}, {transform_indices = @transform_1, window_bounds = array<i64: 256, 128>}, {pipeline_mode = #tpu.pipeline_mode<synchronous>, transform_indices = @transform_2, window_bounds = array<i64: 1, 128>}, {transform_indices = @transform_3, window_bounds = array<i64: 16, 128>}]} {
    %c0_i32 = arith.constant 0 : i32
    %0 = arith.cmpi eq, %arg1, %c0_i32 : i32
    %1 = arith.extui %0 : i1 to i32
    %c0_i32_0 = arith.constant 0 : i32
    %2 = arith.cmpi ne, %1, %c0_i32_0 : i32
    scf.if %2 {
      %cst_11 = arith.constant 0.000000e+00 : f32
      %14 = vector.broadcast %cst_11 : f32 to vector<16x128xf32>
      %c0_12 = arith.constant 0 : index
      %c0_13 = arith.constant 0 : index
      %15 = vector.load %arg6[%c0_12, %c0_13] : memref<16x128xf32, #tpu.memory_space<vmem>>, vector<16x128xf32>
      tpu.vector_store %arg6[%c0_12, %c0_13], %14 {strides = array<i32>} : memref<16x128xf32, #tpu.memory_space<vmem>>, vector<16x128xf32>,
    } else {
    }
    %c0 = arith.constant 0 : index
    %c0_1 = arith.constant 0 : index
    %3 = vector.load %arg2[%c0, %c0_1] : memref<16x256xbf16, #tpu.memory_space<vmem>>, vector<16x256xbf16>
    %cst = arith.constant 0.000000e+00 : bf16
    %4 = vector.broadcast %cst : bf16 to vector<16x256xbf16>
    %5 = arith.maximumf %3, %4 : vector<16x256xbf16>
    %c0_2 = arith.constant 0 : index
    %c0_3 = arith.constant 0 : index
    %6 = vector.load %arg6[%c0_2, %c0_3] : memref<16x128xf32, #tpu.memory_space<vmem>>, vector<16x128xf32>
    %c0_4 = arith.constant 0 : index
    %c0_5 = arith.constant 0 : index
    %7 = vector.load %arg3[%c0_4, %c0_5] : memref<256x128xbf16, #tpu.memory_space<vmem>>, vector<256x128xbf16>
    %cst_6 = arith.constant dense<0.000000e+00> : vector<16x128xf32>
    %8 = tpu.matmul %5, %7, %cst_6 {dimension_numbers = #tpu.dot_dimension_numbers<[1], [0], [0], [1], [0, 0, 1, 1], [], []>} : vector<16x256xbf16>, vector<256x128xbf16>, vector<16x128xf32> -> vector<16x128xf32>
    %9 = arith.addf %6, %8 : vector<16x128xf32>
    %c0_7 = arith.constant 0 : index
    %c0_8 = arith.constant 0 : index
    %10 = vector.load %arg6[%c0_7, %c0_8] : memref<16x128xf32, #tpu.memory_space<vmem>>, vector<16x128xf32>
    tpu.vector_store %arg6[%c0_7, %c0_8], %9 {strides = array<i32>} : memref<16x128xf32, #tpu.memory_space<vmem>>, vector<16x128xf32>,
    %c0_i32_9 = arith.constant 0 : i32
    %11 = arith.cmpi eq, %arg1, %c0_i32_9 : i32
    %12 = arith.extui %11 : i1 to i32
    %c0_i32_10 = arith.constant 0 : i32
    %13 = arith.cmpi ne, %12, %c0_i32_10 : i32
    scf.if %13 {
      %c0_11 = arith.constant 0 : index
      %c0_12 = arith.constant 0 : index
      %14 = vector.load %arg6[%c0_11, %c0_12] : memref<16x128xf32, #tpu.memory_space<vmem>>, vector<16x128xf32>
      %c0_13 = arith.constant 0 : index
      %c0_14 = arith.constant 0 : index
      %15 = vector.load %arg4[%c0_13, %c0_14] : memref<1x128xf32, #tpu.memory_space<vmem>>, vector<1x128xf32>
      %16 = vector.broadcast %15 : vector<1x128xf32> to vector<16x128xf32>
      %17 = arith.addf %14, %16 : vector<16x128xf32>
      %18 = arith.truncf %17 : vector<16x128xf32> to vector<16x128xbf16>
      %c0_15 = arith.constant 0 : index
      %c0_16 = arith.constant 0 : index
      %19 = vector.load %arg5[%c0_15, %c0_16] : memref<16x128xbf16, #tpu.memory_space<vmem>>, vector<16x128xbf16>
      tpu.vector_store %arg5[%c0_15, %c0_16], %18 {strides = array<i32>} : memref<16x128xbf16, #tpu.memory_space<vmem>>, vector<16x128xbf16>,
    } else {
    }
    return
  }
  func.func @transform_0(%arg0: i32, %arg1: i32) -> (i32, i32) {
    %c0_i32 = arith.constant 0 : i32
    return %arg0, %arg1 : i32, i32
  }
  func.func @transform_1(%arg0: i32, %arg1: i32) -> (i32, i32) {
    %c0_i32 = arith.constant 0 : i32
    %c0_i32_0 = arith.constant 0 : i32
    return %arg1, %c0_i32 : i32, i32
  }
  func.func @transform_2(%arg0: i32, %arg1: i32) -> (i32, i32) {
    %c0_i32 = arith.constant 0 : i32
    %c0_i32_0 = arith.constant 0 : i32
    %c0_i32_1 = arith.constant 0 : i32
    return %c0_i32, %c0_i32_0 : i32, i32
  }
  func.func @transform_3(%arg0: i32, %arg1: i32) -> (i32, i32) {
    %c0_i32 = arith.constant 0 : i32
    %c0_i32_0 = arith.constant 0 : i32
    return %arg0, %c0_i32 : i32, i32
  }
}

module attributes {stable_mosaic.version = 11 : i64} {
  func.func @kernel(%arg0: i32, %arg1: memref<1x50x32xbf16, #tpu.memory_space<vmem>>, %arg2: memref<9x32x32xbf16, #tpu.memory_space<vmem>>, %arg3: memref<1x32xf32, #tpu.memory_space<vmem>>, %arg4: memref<36x1xf32, #tpu.memory_space<vmem>>, %arg5: memref<1x50x32xbf16, #tpu.memory_space<vmem>>) attributes {dimension_semantics = [#tpu.dimension_semantics<parallel>], iteration_bounds = array<i64: 2>, scalar_prefetch = 0 : i64, scratch_operands = 0 : i64, tpu.core_type = #tpu.core_type<tc>, window_params = [{transform_indices = @transform_0, window_bounds = array<i64: 1, 50, 32>}, {pipeline_mode = #tpu.pipeline_mode<synchronous>, transform_indices = @transform_1, window_bounds = array<i64: 9, 32, 32>}, {pipeline_mode = #tpu.pipeline_mode<synchronous>, transform_indices = @transform_2, window_bounds = array<i64: 1, 32>}, {pipeline_mode = #tpu.pipeline_mode<synchronous>, transform_indices = @transform_3, window_bounds = array<i64: 36, 1>}, {transform_indices = @transform_4, window_bounds = array<i64: 1, 50, 32>}]} {
    %cst = arith.constant 0.000000e+00 : f32
    %0 = vector.broadcast %cst : f32 to vector<36x32xf32>
    %c0 = arith.constant 0 : index
    %c0_0 = arith.constant 0 : index
    %c0_1 = arith.constant 0 : index
    %1 = vector.load %arg1[%c0, %c0_0, %c0_1] : memref<1x50x32xbf16, #tpu.memory_space<vmem>>, vector<1x36x32xbf16>
    %2 = vector.shape_cast %1 : vector<1x36x32xbf16> to vector<36x32xbf16>
    %cst_2 = arith.constant 0.000000e+00 : bf16
    %3 = vector.broadcast %cst_2 : bf16 to vector<36x32xbf16>
    %4 = arith.maximumf %2, %3 : vector<36x32xbf16>
    %c0_3 = arith.constant 0 : index
    %c0_4 = arith.constant 0 : index
    %c0_5 = arith.constant 0 : index
    %5 = vector.load %arg2[%c0_3, %c0_4, %c0_5] : memref<9x32x32xbf16, #tpu.memory_space<vmem>>, vector<1x32x32xbf16>
    %6 = vector.shape_cast %5 : vector<1x32x32xbf16> to vector<32x32xbf16>
    %cst_6 = arith.constant dense<0.000000e+00> : vector<36x32xf32>
    %7 = tpu.matmul %4, %6, %cst_6 {dimension_numbers = #tpu.dot_dimension_numbers<[1], [0], [0], [1], [0, 0, 1, 1], [], []>} : vector<36x32xbf16>, vector<32x32xbf16>, vector<36x32xf32> -> vector<36x32xf32>
    %8 = arith.addf %0, %7 : vector<36x32xf32>
    %c0_7 = arith.constant 0 : index
    %c1 = arith.constant 1 : index
    %c0_8 = arith.constant 0 : index
    %9 = vector.load %arg1[%c0_7, %c1, %c0_8] : memref<1x50x32xbf16, #tpu.memory_space<vmem>>, vector<1x36x32xbf16>
    %10 = vector.shape_cast %9 : vector<1x36x32xbf16> to vector<36x32xbf16>
    %cst_9 = arith.constant 0.000000e+00 : bf16
    %11 = vector.broadcast %cst_9 : bf16 to vector<36x32xbf16>
    %12 = arith.maximumf %10, %11 : vector<36x32xbf16>
    %c1_10 = arith.constant 1 : index
    %c0_11 = arith.constant 0 : index
    %c0_12 = arith.constant 0 : index
    %13 = vector.load %arg2[%c1_10, %c0_11, %c0_12] : memref<9x32x32xbf16, #tpu.memory_space<vmem>>, vector<1x32x32xbf16>
    %14 = vector.shape_cast %13 : vector<1x32x32xbf16> to vector<32x32xbf16>
    %cst_13 = arith.constant dense<0.000000e+00> : vector<36x32xf32>
    %15 = tpu.matmul %12, %14, %cst_13 {dimension_numbers = #tpu.dot_dimension_numbers<[1], [0], [0], [1], [0, 0, 1, 1], [], []>} : vector<36x32xbf16>, vector<32x32xbf16>, vector<36x32xf32> -> vector<36x32xf32>
    %16 = arith.addf %8, %15 : vector<36x32xf32>
    %c0_14 = arith.constant 0 : index
    %c2 = arith.constant 2 : index
    %c0_15 = arith.constant 0 : index
    %17 = vector.load %arg1[%c0_14, %c2, %c0_15] : memref<1x50x32xbf16, #tpu.memory_space<vmem>>, vector<1x36x32xbf16>
    %18 = vector.shape_cast %17 : vector<1x36x32xbf16> to vector<36x32xbf16>
    %cst_16 = arith.constant 0.000000e+00 : bf16
    %19 = vector.broadcast %cst_16 : bf16 to vector<36x32xbf16>
    %20 = arith.maximumf %18, %19 : vector<36x32xbf16>
    %c2_17 = arith.constant 2 : index
    %c0_18 = arith.constant 0 : index
    %c0_19 = arith.constant 0 : index
    %21 = vector.load %arg2[%c2_17, %c0_18, %c0_19] : memref<9x32x32xbf16, #tpu.memory_space<vmem>>, vector<1x32x32xbf16>
    %22 = vector.shape_cast %21 : vector<1x32x32xbf16> to vector<32x32xbf16>
    %cst_20 = arith.constant dense<0.000000e+00> : vector<36x32xf32>
    %23 = tpu.matmul %20, %22, %cst_20 {dimension_numbers = #tpu.dot_dimension_numbers<[1], [0], [0], [1], [0, 0, 1, 1], [], []>} : vector<36x32xbf16>, vector<32x32xbf16>, vector<36x32xf32> -> vector<36x32xf32>
    %24 = arith.addf %16, %23 : vector<36x32xf32>
    %c0_21 = arith.constant 0 : index
    %c6 = arith.constant 6 : index
    %c0_22 = arith.constant 0 : index
    %25 = vector.load %arg1[%c0_21, %c6, %c0_22] : memref<1x50x32xbf16, #tpu.memory_space<vmem>>, vector<1x36x32xbf16>
    %26 = vector.shape_cast %25 : vector<1x36x32xbf16> to vector<36x32xbf16>
    %cst_23 = arith.constant 0.000000e+00 : bf16
    %27 = vector.broadcast %cst_23 : bf16 to vector<36x32xbf16>
    %28 = arith.maximumf %26, %27 : vector<36x32xbf16>
    %c3 = arith.constant 3 : index
    %c0_24 = arith.constant 0 : index
    %c0_25 = arith.constant 0 : index
    %29 = vector.load %arg2[%c3, %c0_24, %c0_25] : memref<9x32x32xbf16, #tpu.memory_space<vmem>>, vector<1x32x32xbf16>
    %30 = vector.shape_cast %29 : vector<1x32x32xbf16> to vector<32x32xbf16>
    %cst_26 = arith.constant dense<0.000000e+00> : vector<36x32xf32>
    %31 = tpu.matmul %28, %30, %cst_26 {dimension_numbers = #tpu.dot_dimension_numbers<[1], [0], [0], [1], [0, 0, 1, 1], [], []>} : vector<36x32xbf16>, vector<32x32xbf16>, vector<36x32xf32> -> vector<36x32xf32>
    %32 = arith.addf %24, %31 : vector<36x32xf32>
    %c0_27 = arith.constant 0 : index
    %c7 = arith.constant 7 : index
    %c0_28 = arith.constant 0 : index
    %33 = vector.load %arg1[%c0_27, %c7, %c0_28] : memref<1x50x32xbf16, #tpu.memory_space<vmem>>, vector<1x36x32xbf16>
    %34 = vector.shape_cast %33 : vector<1x36x32xbf16> to vector<36x32xbf16>
    %cst_29 = arith.constant 0.000000e+00 : bf16
    %35 = vector.broadcast %cst_29 : bf16 to vector<36x32xbf16>
    %36 = arith.maximumf %34, %35 : vector<36x32xbf16>
    %c4 = arith.constant 4 : index
    %c0_30 = arith.constant 0 : index
    %c0_31 = arith.constant 0 : index
    %37 = vector.load %arg2[%c4, %c0_30, %c0_31] : memref<9x32x32xbf16, #tpu.memory_space<vmem>>, vector<1x32x32xbf16>
    %38 = vector.shape_cast %37 : vector<1x32x32xbf16> to vector<32x32xbf16>
    %cst_32 = arith.constant dense<0.000000e+00> : vector<36x32xf32>
    %39 = tpu.matmul %36, %38, %cst_32 {dimension_numbers = #tpu.dot_dimension_numbers<[1], [0], [0], [1], [0, 0, 1, 1], [], []>} : vector<36x32xbf16>, vector<32x32xbf16>, vector<36x32xf32> -> vector<36x32xf32>
    %40 = arith.addf %32, %39 : vector<36x32xf32>
    %c0_33 = arith.constant 0 : index
    %c8 = arith.constant 8 : index
    %c0_34 = arith.constant 0 : index
    %41 = vector.load %arg1[%c0_33, %c8, %c0_34] : memref<1x50x32xbf16, #tpu.memory_space<vmem>>, vector<1x36x32xbf16>
    %42 = vector.shape_cast %41 : vector<1x36x32xbf16> to vector<36x32xbf16>
    %cst_35 = arith.constant 0.000000e+00 : bf16
    %43 = vector.broadcast %cst_35 : bf16 to vector<36x32xbf16>
    %44 = arith.maximumf %42, %43 : vector<36x32xbf16>
    %c5 = arith.constant 5 : index
    %c0_36 = arith.constant 0 : index
    %c0_37 = arith.constant 0 : index
    %45 = vector.load %arg2[%c5, %c0_36, %c0_37] : memref<9x32x32xbf16, #tpu.memory_space<vmem>>, vector<1x32x32xbf16>
    %46 = vector.shape_cast %45 : vector<1x32x32xbf16> to vector<32x32xbf16>
    %cst_38 = arith.constant dense<0.000000e+00> : vector<36x32xf32>
    %47 = tpu.matmul %44, %46, %cst_38 {dimension_numbers = #tpu.dot_dimension_numbers<[1], [0], [0], [1], [0, 0, 1, 1], [], []>} : vector<36x32xbf16>, vector<32x32xbf16>, vector<36x32xf32> -> vector<36x32xf32>
    %48 = arith.addf %40, %47 : vector<36x32xf32>
    %c0_39 = arith.constant 0 : index
    %c12 = arith.constant 12 : index
    %c0_40 = arith.constant 0 : index
    %49 = vector.load %arg1[%c0_39, %c12, %c0_40] : memref<1x50x32xbf16, #tpu.memory_space<vmem>>, vector<1x36x32xbf16>
    %50 = vector.shape_cast %49 : vector<1x36x32xbf16> to vector<36x32xbf16>
    %cst_41 = arith.constant 0.000000e+00 : bf16
    %51 = vector.broadcast %cst_41 : bf16 to vector<36x32xbf16>
    %52 = arith.maximumf %50, %51 : vector<36x32xbf16>
    %c6_42 = arith.constant 6 : index
    %c0_43 = arith.constant 0 : index
    %c0_44 = arith.constant 0 : index
    %53 = vector.load %arg2[%c6_42, %c0_43, %c0_44] : memref<9x32x32xbf16, #tpu.memory_space<vmem>>, vector<1x32x32xbf16>
    %54 = vector.shape_cast %53 : vector<1x32x32xbf16> to vector<32x32xbf16>
    %cst_45 = arith.constant dense<0.000000e+00> : vector<36x32xf32>
    %55 = tpu.matmul %52, %54, %cst_45 {dimension_numbers = #tpu.dot_dimension_numbers<[1], [0], [0], [1], [0, 0, 1, 1], [], []>} : vector<36x32xbf16>, vector<32x32xbf16>, vector<36x32xf32> -> vector<36x32xf32>
    %56 = arith.addf %48, %55 : vector<36x32xf32>
    %c0_46 = arith.constant 0 : index
    %c13 = arith.constant 13 : index
    %c0_47 = arith.constant 0 : index
    %57 = vector.load %arg1[%c0_46, %c13, %c0_47] : memref<1x50x32xbf16, #tpu.memory_space<vmem>>, vector<1x36x32xbf16>
    %58 = vector.shape_cast %57 : vector<1x36x32xbf16> to vector<36x32xbf16>
    %cst_48 = arith.constant 0.000000e+00 : bf16
    %59 = vector.broadcast %cst_48 : bf16 to vector<36x32xbf16>
    %60 = arith.maximumf %58, %59 : vector<36x32xbf16>
    %c7_49 = arith.constant 7 : index
    %c0_50 = arith.constant 0 : index
    %c0_51 = arith.constant 0 : index
    %61 = vector.load %arg2[%c7_49, %c0_50, %c0_51] : memref<9x32x32xbf16, #tpu.memory_space<vmem>>, vector<1x32x32xbf16>
    %62 = vector.shape_cast %61 : vector<1x32x32xbf16> to vector<32x32xbf16>
    %cst_52 = arith.constant dense<0.000000e+00> : vector<36x32xf32>
    %63 = tpu.matmul %60, %62, %cst_52 {dimension_numbers = #tpu.dot_dimension_numbers<[1], [0], [0], [1], [0, 0, 1, 1], [], []>} : vector<36x32xbf16>, vector<32x32xbf16>, vector<36x32xf32> -> vector<36x32xf32>
    %64 = arith.addf %56, %63 : vector<36x32xf32>
    %c0_53 = arith.constant 0 : index
    %c14 = arith.constant 14 : index
    %c0_54 = arith.constant 0 : index
    %65 = vector.load %arg1[%c0_53, %c14, %c0_54] : memref<1x50x32xbf16, #tpu.memory_space<vmem>>, vector<1x36x32xbf16>
    %66 = vector.shape_cast %65 : vector<1x36x32xbf16> to vector<36x32xbf16>
    %cst_55 = arith.constant 0.000000e+00 : bf16
    %67 = vector.broadcast %cst_55 : bf16 to vector<36x32xbf16>
    %68 = arith.maximumf %66, %67 : vector<36x32xbf16>
    %c8_56 = arith.constant 8 : index
    %c0_57 = arith.constant 0 : index
    %c0_58 = arith.constant 0 : index
    %69 = vector.load %arg2[%c8_56, %c0_57, %c0_58] : memref<9x32x32xbf16, #tpu.memory_space<vmem>>, vector<1x32x32xbf16>
    %70 = vector.shape_cast %69 : vector<1x32x32xbf16> to vector<32x32xbf16>
    %cst_59 = arith.constant dense<0.000000e+00> : vector<36x32xf32>
    %71 = tpu.matmul %68, %70, %cst_59 {dimension_numbers = #tpu.dot_dimension_numbers<[1], [0], [0], [1], [0, 0, 1, 1], [], []>} : vector<36x32xbf16>, vector<32x32xbf16>, vector<36x32xf32> -> vector<36x32xf32>
    %72 = arith.addf %64, %71 : vector<36x32xf32>
    %c0_60 = arith.constant 0 : index
    %c0_61 = arith.constant 0 : index
    %73 = vector.load %arg3[%c0_60, %c0_61] : memref<1x32xf32, #tpu.memory_space<vmem>>, vector<1x32xf32>
    %74 = vector.broadcast %73 : vector<1x32xf32> to vector<36x32xf32>
    %75 = arith.addf %72, %74 : vector<36x32xf32>
    %c0_62 = arith.constant 0 : index
    %c0_63 = arith.constant 0 : index
    %76 = vector.load %arg4[%c0_62, %c0_63] : memref<36x1xf32, #tpu.memory_space<vmem>>, vector<36x1xf32>
    %77 = vector.broadcast %76 : vector<36x1xf32> to vector<36x32xf32>
    %78 = arith.mulf %75, %77 : vector<36x32xf32>
    %cst_64 = arith.constant 0.000000e+00 : bf16
    %79 = vector.broadcast %cst_64 : bf16 to vector<50x32xbf16>
    %c0_65 = arith.constant 0 : index
    %c0_66 = arith.constant 0 : index
    %c0_67 = arith.constant 0 : index
    %80 = vector.load %arg5[%c0_65, %c0_66, %c0_67] : memref<1x50x32xbf16, #tpu.memory_space<vmem>>, vector<1x50x32xbf16>
    %81 = vector.shape_cast %80 : vector<1x50x32xbf16> to vector<50x32xbf16>
    %82 = vector.shape_cast %79 : vector<50x32xbf16> to vector<1x50x32xbf16>
    tpu.vector_store %arg5[%c0_65, %c0_66, %c0_67], %82 {strides = array<i32>} : memref<1x50x32xbf16, #tpu.memory_space<vmem>>, vector<1x50x32xbf16>,
    %83 = arith.truncf %78 : vector<36x32xf32> to vector<36x32xbf16>
    %c0_68 = arith.constant 0 : index
    %c7_69 = arith.constant 7 : index
    %c0_70 = arith.constant 0 : index
    %84 = vector.load %arg5[%c0_68, %c7_69, %c0_70] : memref<1x50x32xbf16, #tpu.memory_space<vmem>>, vector<1x36x32xbf16>
    %85 = vector.shape_cast %84 : vector<1x36x32xbf16> to vector<36x32xbf16>
    %86 = vector.shape_cast %83 : vector<36x32xbf16> to vector<1x36x32xbf16>
    tpu.vector_store %arg5[%c0_68, %c7_69, %c0_70], %86 {strides = array<i32>} : memref<1x50x32xbf16, #tpu.memory_space<vmem>>, vector<1x36x32xbf16>,
    return
  }
  func.func @transform_0(%arg0: i32) -> (i32, i32, i32) {
    %c0_i32 = arith.constant 0 : i32
    %c0_i32_0 = arith.constant 0 : i32
    %c0_i32_1 = arith.constant 0 : i32
    return %arg0, %c0_i32, %c0_i32_0 : i32, i32, i32
  }
  func.func @transform_1(%arg0: i32) -> (i32, i32, i32) {
    %c0_i32 = arith.constant 0 : i32
    %c0_i32_0 = arith.constant 0 : i32
    %c0_i32_1 = arith.constant 0 : i32
    %c0_i32_2 = arith.constant 0 : i32
    return %c0_i32, %c0_i32_0, %c0_i32_1 : i32, i32, i32
  }
  func.func @transform_2(%arg0: i32) -> (i32, i32) {
    %c0_i32 = arith.constant 0 : i32
    %c0_i32_0 = arith.constant 0 : i32
    %c0_i32_1 = arith.constant 0 : i32
    return %c0_i32, %c0_i32_0 : i32, i32
  }
  func.func @transform_3(%arg0: i32) -> (i32, i32) {
    %c0_i32 = arith.constant 0 : i32
    %c0_i32_0 = arith.constant 0 : i32
    %c0_i32_1 = arith.constant 0 : i32
    return %c0_i32, %c0_i32_0 : i32, i32
  }
  func.func @transform_4(%arg0: i32) -> (i32, i32, i32) {
    %c0_i32 = arith.constant 0 : i32
    %c0_i32_0 = arith.constant 0 : i32
    %c0_i32_1 = arith.constant 0 : i32
    return %arg0, %c0_i32, %c0_i32_0 : i32, i32, i32
  }
}

module attributes {stable_mosaic.version = 11 : i64} {
  func.func @kernel(%arg0: i32, %arg1: memref<1x50x32xbf16, #tpu.memory_space<vmem>>, %arg2: memref<9x32x16xbf16, #tpu.memory_space<vmem>>, %arg3: memref<1x16xf32, #tpu.memory_space<vmem>>, %arg4: memref<16x32xbf16, #tpu.memory_space<vmem>>, %arg5: memref<1x32xf32, #tpu.memory_space<vmem>>, %arg6: memref<36x1xf32, #tpu.memory_space<vmem>>, %arg7: memref<1x50x32xbf16, #tpu.memory_space<vmem>>) attributes {dimension_semantics = [#tpu.dimension_semantics<parallel>], iteration_bounds = array<i64: 2>, scalar_prefetch = 0 : i64, scratch_operands = 0 : i64, tpu.core_type = #tpu.core_type<tc>, window_params = [{transform_indices = @transform_0, window_bounds = array<i64: 1, 50, 32>}, {pipeline_mode = #tpu.pipeline_mode<synchronous>, transform_indices = @transform_1, window_bounds = array<i64: 9, 32, 16>}, {pipeline_mode = #tpu.pipeline_mode<synchronous>, transform_indices = @transform_2, window_bounds = array<i64: 1, 16>}, {pipeline_mode = #tpu.pipeline_mode<synchronous>, transform_indices = @transform_3, window_bounds = array<i64: 16, 32>}, {pipeline_mode = #tpu.pipeline_mode<synchronous>, transform_indices = @transform_4, window_bounds = array<i64: 1, 32>}, {pipeline_mode = #tpu.pipeline_mode<synchronous>, transform_indices = @transform_5, window_bounds = array<i64: 36, 1>}, {transform_indices = @transform_6, window_bounds = array<i64: 1, 50, 32>}]} {
    %cst = arith.constant 0.000000e+00 : f32
    %0 = vector.broadcast %cst : f32 to vector<36x16xf32>
    %c0 = arith.constant 0 : index
    %c0_0 = arith.constant 0 : index
    %c0_1 = arith.constant 0 : index
    %1 = vector.load %arg1[%c0, %c0_0, %c0_1] : memref<1x50x32xbf16, #tpu.memory_space<vmem>>, vector<1x36x32xbf16>
    %2 = vector.shape_cast %1 : vector<1x36x32xbf16> to vector<36x32xbf16>
    %cst_2 = arith.constant 0.000000e+00 : bf16
    %3 = vector.broadcast %cst_2 : bf16 to vector<36x32xbf16>
    %4 = arith.maximumf %2, %3 : vector<36x32xbf16>
    %c0_3 = arith.constant 0 : index
    %c0_4 = arith.constant 0 : index
    %c0_5 = arith.constant 0 : index
    %5 = vector.load %arg2[%c0_3, %c0_4, %c0_5] : memref<9x32x16xbf16, #tpu.memory_space<vmem>>, vector<1x32x16xbf16>
    %6 = vector.shape_cast %5 : vector<1x32x16xbf16> to vector<32x16xbf16>
    %cst_6 = arith.constant dense<0.000000e+00> : vector<36x16xf32>
    %7 = tpu.matmul %4, %6, %cst_6 {dimension_numbers = #tpu.dot_dimension_numbers<[1], [0], [0], [1], [0, 0, 1, 1], [], []>} : vector<36x32xbf16>, vector<32x16xbf16>, vector<36x16xf32> -> vector<36x16xf32>
    %8 = arith.addf %0, %7 : vector<36x16xf32>
    %c0_7 = arith.constant 0 : index
    %c1 = arith.constant 1 : index
    %c0_8 = arith.constant 0 : index
    %9 = vector.load %arg1[%c0_7, %c1, %c0_8] : memref<1x50x32xbf16, #tpu.memory_space<vmem>>, vector<1x36x32xbf16>
    %10 = vector.shape_cast %9 : vector<1x36x32xbf16> to vector<36x32xbf16>
    %cst_9 = arith.constant 0.000000e+00 : bf16
    %11 = vector.broadcast %cst_9 : bf16 to vector<36x32xbf16>
    %12 = arith.maximumf %10, %11 : vector<36x32xbf16>
    %c1_10 = arith.constant 1 : index
    %c0_11 = arith.constant 0 : index
    %c0_12 = arith.constant 0 : index
    %13 = vector.load %arg2[%c1_10, %c0_11, %c0_12] : memref<9x32x16xbf16, #tpu.memory_space<vmem>>, vector<1x32x16xbf16>
    %14 = vector.shape_cast %13 : vector<1x32x16xbf16> to vector<32x16xbf16>
    %cst_13 = arith.constant dense<0.000000e+00> : vector<36x16xf32>
    %15 = tpu.matmul %12, %14, %cst_13 {dimension_numbers = #tpu.dot_dimension_numbers<[1], [0], [0], [1], [0, 0, 1, 1], [], []>} : vector<36x32xbf16>, vector<32x16xbf16>, vector<36x16xf32> -> vector<36x16xf32>
    %16 = arith.addf %8, %15 : vector<36x16xf32>
    %c0_14 = arith.constant 0 : index
    %c2 = arith.constant 2 : index
    %c0_15 = arith.constant 0 : index
    %17 = vector.load %arg1[%c0_14, %c2, %c0_15] : memref<1x50x32xbf16, #tpu.memory_space<vmem>>, vector<1x36x32xbf16>
    %18 = vector.shape_cast %17 : vector<1x36x32xbf16> to vector<36x32xbf16>
    %cst_16 = arith.constant 0.000000e+00 : bf16
    %19 = vector.broadcast %cst_16 : bf16 to vector<36x32xbf16>
    %20 = arith.maximumf %18, %19 : vector<36x32xbf16>
    %c2_17 = arith.constant 2 : index
    %c0_18 = arith.constant 0 : index
    %c0_19 = arith.constant 0 : index
    %21 = vector.load %arg2[%c2_17, %c0_18, %c0_19] : memref<9x32x16xbf16, #tpu.memory_space<vmem>>, vector<1x32x16xbf16>
    %22 = vector.shape_cast %21 : vector<1x32x16xbf16> to vector<32x16xbf16>
    %cst_20 = arith.constant dense<0.000000e+00> : vector<36x16xf32>
    %23 = tpu.matmul %20, %22, %cst_20 {dimension_numbers = #tpu.dot_dimension_numbers<[1], [0], [0], [1], [0, 0, 1, 1], [], []>} : vector<36x32xbf16>, vector<32x16xbf16>, vector<36x16xf32> -> vector<36x16xf32>
    %24 = arith.addf %16, %23 : vector<36x16xf32>
    %c0_21 = arith.constant 0 : index
    %c6 = arith.constant 6 : index
    %c0_22 = arith.constant 0 : index
    %25 = vector.load %arg1[%c0_21, %c6, %c0_22] : memref<1x50x32xbf16, #tpu.memory_space<vmem>>, vector<1x36x32xbf16>
    %26 = vector.shape_cast %25 : vector<1x36x32xbf16> to vector<36x32xbf16>
    %cst_23 = arith.constant 0.000000e+00 : bf16
    %27 = vector.broadcast %cst_23 : bf16 to vector<36x32xbf16>
    %28 = arith.maximumf %26, %27 : vector<36x32xbf16>
    %c3 = arith.constant 3 : index
    %c0_24 = arith.constant 0 : index
    %c0_25 = arith.constant 0 : index
    %29 = vector.load %arg2[%c3, %c0_24, %c0_25] : memref<9x32x16xbf16, #tpu.memory_space<vmem>>, vector<1x32x16xbf16>
    %30 = vector.shape_cast %29 : vector<1x32x16xbf16> to vector<32x16xbf16>
    %cst_26 = arith.constant dense<0.000000e+00> : vector<36x16xf32>
    %31 = tpu.matmul %28, %30, %cst_26 {dimension_numbers = #tpu.dot_dimension_numbers<[1], [0], [0], [1], [0, 0, 1, 1], [], []>} : vector<36x32xbf16>, vector<32x16xbf16>, vector<36x16xf32> -> vector<36x16xf32>
    %32 = arith.addf %24, %31 : vector<36x16xf32>
    %c0_27 = arith.constant 0 : index
    %c7 = arith.constant 7 : index
    %c0_28 = arith.constant 0 : index
    %33 = vector.load %arg1[%c0_27, %c7, %c0_28] : memref<1x50x32xbf16, #tpu.memory_space<vmem>>, vector<1x36x32xbf16>
    %34 = vector.shape_cast %33 : vector<1x36x32xbf16> to vector<36x32xbf16>
    %cst_29 = arith.constant 0.000000e+00 : bf16
    %35 = vector.broadcast %cst_29 : bf16 to vector<36x32xbf16>
    %36 = arith.maximumf %34, %35 : vector<36x32xbf16>
    %c4 = arith.constant 4 : index
    %c0_30 = arith.constant 0 : index
    %c0_31 = arith.constant 0 : index
    %37 = vector.load %arg2[%c4, %c0_30, %c0_31] : memref<9x32x16xbf16, #tpu.memory_space<vmem>>, vector<1x32x16xbf16>
    %38 = vector.shape_cast %37 : vector<1x32x16xbf16> to vector<32x16xbf16>
    %cst_32 = arith.constant dense<0.000000e+00> : vector<36x16xf32>
    %39 = tpu.matmul %36, %38, %cst_32 {dimension_numbers = #tpu.dot_dimension_numbers<[1], [0], [0], [1], [0, 0, 1, 1], [], []>} : vector<36x32xbf16>, vector<32x16xbf16>, vector<36x16xf32> -> vector<36x16xf32>
    %40 = arith.addf %32, %39 : vector<36x16xf32>
    %c0_33 = arith.constant 0 : index
    %c8 = arith.constant 8 : index
    %c0_34 = arith.constant 0 : index
    %41 = vector.load %arg1[%c0_33, %c8, %c0_34] : memref<1x50x32xbf16, #tpu.memory_space<vmem>>, vector<1x36x32xbf16>
    %42 = vector.shape_cast %41 : vector<1x36x32xbf16> to vector<36x32xbf16>
    %cst_35 = arith.constant 0.000000e+00 : bf16
    %43 = vector.broadcast %cst_35 : bf16 to vector<36x32xbf16>
    %44 = arith.maximumf %42, %43 : vector<36x32xbf16>
    %c5 = arith.constant 5 : index
    %c0_36 = arith.constant 0 : index
    %c0_37 = arith.constant 0 : index
    %45 = vector.load %arg2[%c5, %c0_36, %c0_37] : memref<9x32x16xbf16, #tpu.memory_space<vmem>>, vector<1x32x16xbf16>
    %46 = vector.shape_cast %45 : vector<1x32x16xbf16> to vector<32x16xbf16>
    %cst_38 = arith.constant dense<0.000000e+00> : vector<36x16xf32>
    %47 = tpu.matmul %44, %46, %cst_38 {dimension_numbers = #tpu.dot_dimension_numbers<[1], [0], [0], [1], [0, 0, 1, 1], [], []>} : vector<36x32xbf16>, vector<32x16xbf16>, vector<36x16xf32> -> vector<36x16xf32>
    %48 = arith.addf %40, %47 : vector<36x16xf32>
    %c0_39 = arith.constant 0 : index
    %c12 = arith.constant 12 : index
    %c0_40 = arith.constant 0 : index
    %49 = vector.load %arg1[%c0_39, %c12, %c0_40] : memref<1x50x32xbf16, #tpu.memory_space<vmem>>, vector<1x36x32xbf16>
    %50 = vector.shape_cast %49 : vector<1x36x32xbf16> to vector<36x32xbf16>
    %cst_41 = arith.constant 0.000000e+00 : bf16
    %51 = vector.broadcast %cst_41 : bf16 to vector<36x32xbf16>
    %52 = arith.maximumf %50, %51 : vector<36x32xbf16>
    %c6_42 = arith.constant 6 : index
    %c0_43 = arith.constant 0 : index
    %c0_44 = arith.constant 0 : index
    %53 = vector.load %arg2[%c6_42, %c0_43, %c0_44] : memref<9x32x16xbf16, #tpu.memory_space<vmem>>, vector<1x32x16xbf16>
    %54 = vector.shape_cast %53 : vector<1x32x16xbf16> to vector<32x16xbf16>
    %cst_45 = arith.constant dense<0.000000e+00> : vector<36x16xf32>
    %55 = tpu.matmul %52, %54, %cst_45 {dimension_numbers = #tpu.dot_dimension_numbers<[1], [0], [0], [1], [0, 0, 1, 1], [], []>} : vector<36x32xbf16>, vector<32x16xbf16>, vector<36x16xf32> -> vector<36x16xf32>
    %56 = arith.addf %48, %55 : vector<36x16xf32>
    %c0_46 = arith.constant 0 : index
    %c13 = arith.constant 13 : index
    %c0_47 = arith.constant 0 : index
    %57 = vector.load %arg1[%c0_46, %c13, %c0_47] : memref<1x50x32xbf16, #tpu.memory_space<vmem>>, vector<1x36x32xbf16>
    %58 = vector.shape_cast %57 : vector<1x36x32xbf16> to vector<36x32xbf16>
    %cst_48 = arith.constant 0.000000e+00 : bf16
    %59 = vector.broadcast %cst_48 : bf16 to vector<36x32xbf16>
    %60 = arith.maximumf %58, %59 : vector<36x32xbf16>
    %c7_49 = arith.constant 7 : index
    %c0_50 = arith.constant 0 : index
    %c0_51 = arith.constant 0 : index
    %61 = vector.load %arg2[%c7_49, %c0_50, %c0_51] : memref<9x32x16xbf16, #tpu.memory_space<vmem>>, vector<1x32x16xbf16>
    %62 = vector.shape_cast %61 : vector<1x32x16xbf16> to vector<32x16xbf16>
    %cst_52 = arith.constant dense<0.000000e+00> : vector<36x16xf32>
    %63 = tpu.matmul %60, %62, %cst_52 {dimension_numbers = #tpu.dot_dimension_numbers<[1], [0], [0], [1], [0, 0, 1, 1], [], []>} : vector<36x32xbf16>, vector<32x16xbf16>, vector<36x16xf32> -> vector<36x16xf32>
    %64 = arith.addf %56, %63 : vector<36x16xf32>
    %c0_53 = arith.constant 0 : index
    %c14 = arith.constant 14 : index
    %c0_54 = arith.constant 0 : index
    %65 = vector.load %arg1[%c0_53, %c14, %c0_54] : memref<1x50x32xbf16, #tpu.memory_space<vmem>>, vector<1x36x32xbf16>
    %66 = vector.shape_cast %65 : vector<1x36x32xbf16> to vector<36x32xbf16>
    %cst_55 = arith.constant 0.000000e+00 : bf16
    %67 = vector.broadcast %cst_55 : bf16 to vector<36x32xbf16>
    %68 = arith.maximumf %66, %67 : vector<36x32xbf16>
    %c8_56 = arith.constant 8 : index
    %c0_57 = arith.constant 0 : index
    %c0_58 = arith.constant 0 : index
    %69 = vector.load %arg2[%c8_56, %c0_57, %c0_58] : memref<9x32x16xbf16, #tpu.memory_space<vmem>>, vector<1x32x16xbf16>
    %70 = vector.shape_cast %69 : vector<1x32x16xbf16> to vector<32x16xbf16>
    %cst_59 = arith.constant dense<0.000000e+00> : vector<36x16xf32>
    %71 = tpu.matmul %68, %70, %cst_59 {dimension_numbers = #tpu.dot_dimension_numbers<[1], [0], [0], [1], [0, 0, 1, 1], [], []>} : vector<36x32xbf16>, vector<32x16xbf16>, vector<36x16xf32> -> vector<36x16xf32>
    %72 = arith.addf %64, %71 : vector<36x16xf32>
    %c0_60 = arith.constant 0 : index
    %c0_61 = arith.constant 0 : index
    %73 = vector.load %arg3[%c0_60, %c0_61] : memref<1x16xf32, #tpu.memory_space<vmem>>, vector<1x16xf32>
    %74 = vector.broadcast %73 : vector<1x16xf32> to vector<36x16xf32>
    %75 = arith.addf %72, %74 : vector<36x16xf32>
    %cst_62 = arith.constant 0.000000e+00 : f32
    %76 = vector.broadcast %cst_62 : f32 to vector<36x16xf32>
    %77 = arith.maximumf %75, %76 : vector<36x16xf32>
    %78 = arith.truncf %77 : vector<36x16xf32> to vector<36x16xbf16>
    %c0_63 = arith.constant 0 : index
    %c0_64 = arith.constant 0 : index
    %79 = vector.load %arg4[%c0_63, %c0_64] : memref<16x32xbf16, #tpu.memory_space<vmem>>, vector<16x32xbf16>
    %cst_65 = arith.constant dense<0.000000e+00> : vector<36x32xf32>
    %80 = tpu.matmul %78, %79, %cst_65 {dimension_numbers = #tpu.dot_dimension_numbers<[1], [0], [0], [1], [0, 0, 1, 1], [], []>} : vector<36x16xbf16>, vector<16x32xbf16>, vector<36x32xf32> -> vector<36x32xf32>
    %c0_66 = arith.constant 0 : index
    %c0_67 = arith.constant 0 : index
    %81 = vector.load %arg5[%c0_66, %c0_67] : memref<1x32xf32, #tpu.memory_space<vmem>>, vector<1x32xf32>
    %82 = vector.broadcast %81 : vector<1x32xf32> to vector<36x32xf32>
    %83 = arith.addf %80, %82 : vector<36x32xf32>
    %c0_68 = arith.constant 0 : index
    %c0_69 = arith.constant 0 : index
    %84 = vector.load %arg6[%c0_68, %c0_69] : memref<36x1xf32, #tpu.memory_space<vmem>>, vector<36x1xf32>
    %85 = vector.broadcast %84 : vector<36x1xf32> to vector<36x32xf32>
    %86 = arith.mulf %83, %85 : vector<36x32xf32>
    %c0_70 = arith.constant 0 : index
    %c7_71 = arith.constant 7 : index
    %c0_72 = arith.constant 0 : index
    %87 = vector.load %arg1[%c0_70, %c7_71, %c0_72] : memref<1x50x32xbf16, #tpu.memory_space<vmem>>, vector<1x36x32xbf16>
    %88 = vector.shape_cast %87 : vector<1x36x32xbf16> to vector<36x32xbf16>
    %89 = arith.extf %88 : vector<36x32xbf16> to vector<36x32xf32>
    %90 = arith.addf %86, %89 : vector<36x32xf32>
    %cst_73 = arith.constant 0.000000e+00 : bf16
    %91 = vector.broadcast %cst_73 : bf16 to vector<50x32xbf16>
    %c0_74 = arith.constant 0 : index
    %c0_75 = arith.constant 0 : index
    %c0_76 = arith.constant 0 : index
    %92 = vector.load %arg7[%c0_74, %c0_75, %c0_76] : memref<1x50x32xbf16, #tpu.memory_space<vmem>>, vector<1x50x32xbf16>
    %93 = vector.shape_cast %92 : vector<1x50x32xbf16> to vector<50x32xbf16>
    %94 = vector.shape_cast %91 : vector<50x32xbf16> to vector<1x50x32xbf16>
    tpu.vector_store %arg7[%c0_74, %c0_75, %c0_76], %94 {strides = array<i32>} : memref<1x50x32xbf16, #tpu.memory_space<vmem>>, vector<1x50x32xbf16>,
    %95 = arith.truncf %90 : vector<36x32xf32> to vector<36x32xbf16>
    %c0_77 = arith.constant 0 : index
    %c7_78 = arith.constant 7 : index
    %c0_79 = arith.constant 0 : index
    %96 = vector.load %arg7[%c0_77, %c7_78, %c0_79] : memref<1x50x32xbf16, #tpu.memory_space<vmem>>, vector<1x36x32xbf16>
    %97 = vector.shape_cast %96 : vector<1x36x32xbf16> to vector<36x32xbf16>
    %98 = vector.shape_cast %95 : vector<36x32xbf16> to vector<1x36x32xbf16>
    tpu.vector_store %arg7[%c0_77, %c7_78, %c0_79], %98 {strides = array<i32>} : memref<1x50x32xbf16, #tpu.memory_space<vmem>>, vector<1x36x32xbf16>,
    return
  }
  func.func @transform_0(%arg0: i32) -> (i32, i32, i32) {
    %c0_i32 = arith.constant 0 : i32
    %c0_i32_0 = arith.constant 0 : i32
    %c0_i32_1 = arith.constant 0 : i32
    return %arg0, %c0_i32, %c0_i32_0 : i32, i32, i32
  }
  func.func @transform_1(%arg0: i32) -> (i32, i32, i32) {
    %c0_i32 = arith.constant 0 : i32
    %c0_i32_0 = arith.constant 0 : i32
    %c0_i32_1 = arith.constant 0 : i32
    %c0_i32_2 = arith.constant 0 : i32
    return %c0_i32, %c0_i32_0, %c0_i32_1 : i32, i32, i32
  }
  func.func @transform_2(%arg0: i32) -> (i32, i32) {
    %c0_i32 = arith.constant 0 : i32
    %c0_i32_0 = arith.constant 0 : i32
    %c0_i32_1 = arith.constant 0 : i32
    return %c0_i32, %c0_i32_0 : i32, i32
  }
  func.func @transform_3(%arg0: i32) -> (i32, i32) {
    %c0_i32 = arith.constant 0 : i32
    %c0_i32_0 = arith.constant 0 : i32
    %c0_i32_1 = arith.constant 0 : i32
    return %c0_i32, %c0_i32_0 : i32, i32
  }
  func.func @transform_4(%arg0: i32) -> (i32, i32) {
    %c0_i32 = arith.constant 0 : i32
    %c0_i32_0 = arith.constant 0 : i32
    %c0_i32_1 = arith.constant 0 : i32
    return %c0_i32, %c0_i32_0 : i32, i32
  }
  func.func @transform_5(%arg0: i32) -> (i32, i32) {
    %c0_i32 = arith.constant 0 : i32
    %c0_i32_0 = arith.constant 0 : i32
    %c0_i32_1 = arith.constant 0 : i32
    return %c0_i32, %c0_i32_0 : i32, i32
  }
  func.func @transform_6(%arg0: i32) -> (i32, i32, i32) {
    %c0_i32 = arith.constant 0 : i32
    %c0_i32_0 = arith.constant 0 : i32
    %c0_i32_1 = arith.constant 0 : i32
    return %arg0, %c0_i32, %c0_i32_0 : i32, i32, i32
  }
}

module attributes {stable_mosaic.version = 11 : i64} {
  func.func @kernel(%arg0: i32, %arg1: i32, %arg2: memref<16x128xbf16, #tpu.memory_space<vmem>>, %arg3: memref<128x128xbf16, #tpu.memory_space<vmem>>, %arg4: memref<1x128xf32, #tpu.memory_space<vmem>>, %arg5: memref<16x128xbf16, #tpu.memory_space<vmem>>, %arg6: memref<16x128xf32, #tpu.memory_space<vmem>>) attributes {dimension_semantics = [#tpu.dimension_semantics<parallel>, #tpu.dimension_semantics<arbitrary>], iteration_bounds = array<i64: 2, 1>, scalar_prefetch = 0 : i64, scratch_operands = 1 : i64, tpu.core_type = #tpu.core_type<tc>, window_params = [{transform_indices = @transform_0, window_bounds = array<i64: 16, 128>}, {transform_indices = @transform_1, window_bounds = array<i64: 128, 128>}, {pipeline_mode = #tpu.pipeline_mode<synchronous>, transform_indices = @transform_2, window_bounds = array<i64: 1, 128>}, {transform_indices = @transform_3, window_bounds = array<i64: 16, 128>}]} {
    %c0_i32 = arith.constant 0 : i32
    %0 = arith.cmpi eq, %arg1, %c0_i32 : i32
    %1 = arith.extui %0 : i1 to i32
    %c0_i32_0 = arith.constant 0 : i32
    %2 = arith.cmpi ne, %1, %c0_i32_0 : i32
    scf.if %2 {
      %cst_11 = arith.constant 0.000000e+00 : f32
      %14 = vector.broadcast %cst_11 : f32 to vector<16x128xf32>
      %c0_12 = arith.constant 0 : index
      %c0_13 = arith.constant 0 : index
      %15 = vector.load %arg6[%c0_12, %c0_13] : memref<16x128xf32, #tpu.memory_space<vmem>>, vector<16x128xf32>
      tpu.vector_store %arg6[%c0_12, %c0_13], %14 {strides = array<i32>} : memref<16x128xf32, #tpu.memory_space<vmem>>, vector<16x128xf32>,
    } else {
    }
    %c0 = arith.constant 0 : index
    %c0_1 = arith.constant 0 : index
    %3 = vector.load %arg2[%c0, %c0_1] : memref<16x128xbf16, #tpu.memory_space<vmem>>, vector<16x128xbf16>
    %cst = arith.constant 0.000000e+00 : bf16
    %4 = vector.broadcast %cst : bf16 to vector<16x128xbf16>
    %5 = arith.maximumf %3, %4 : vector<16x128xbf16>
    %c0_2 = arith.constant 0 : index
    %c0_3 = arith.constant 0 : index
    %6 = vector.load %arg6[%c0_2, %c0_3] : memref<16x128xf32, #tpu.memory_space<vmem>>, vector<16x128xf32>
    %c0_4 = arith.constant 0 : index
    %c0_5 = arith.constant 0 : index
    %7 = vector.load %arg3[%c0_4, %c0_5] : memref<128x128xbf16, #tpu.memory_space<vmem>>, vector<128x128xbf16>
    %cst_6 = arith.constant dense<0.000000e+00> : vector<16x128xf32>
    %8 = tpu.matmul %5, %7, %cst_6 {dimension_numbers = #tpu.dot_dimension_numbers<[1], [0], [0], [1], [0, 0, 1, 1], [], []>} : vector<16x128xbf16>, vector<128x128xbf16>, vector<16x128xf32> -> vector<16x128xf32>
    %9 = arith.addf %6, %8 : vector<16x128xf32>
    %c0_7 = arith.constant 0 : index
    %c0_8 = arith.constant 0 : index
    %10 = vector.load %arg6[%c0_7, %c0_8] : memref<16x128xf32, #tpu.memory_space<vmem>>, vector<16x128xf32>
    tpu.vector_store %arg6[%c0_7, %c0_8], %9 {strides = array<i32>} : memref<16x128xf32, #tpu.memory_space<vmem>>, vector<16x128xf32>,
    %c0_i32_9 = arith.constant 0 : i32
    %11 = arith.cmpi eq, %arg1, %c0_i32_9 : i32
    %12 = arith.extui %11 : i1 to i32
    %c0_i32_10 = arith.constant 0 : i32
    %13 = arith.cmpi ne, %12, %c0_i32_10 : i32
    scf.if %13 {
      %c0_11 = arith.constant 0 : index
      %c0_12 = arith.constant 0 : index
      %14 = vector.load %arg6[%c0_11, %c0_12] : memref<16x128xf32, #tpu.memory_space<vmem>>, vector<16x128xf32>
      %c0_13 = arith.constant 0 : index
      %c0_14 = arith.constant 0 : index
      %15 = vector.load %arg4[%c0_13, %c0_14] : memref<1x128xf32, #tpu.memory_space<vmem>>, vector<1x128xf32>
      %16 = vector.broadcast %15 : vector<1x128xf32> to vector<16x128xf32>
      %17 = arith.addf %14, %16 : vector<16x128xf32>
      %18 = arith.truncf %17 : vector<16x128xf32> to vector<16x128xbf16>
      %c0_15 = arith.constant 0 : index
      %c0_16 = arith.constant 0 : index
      %19 = vector.load %arg5[%c0_15, %c0_16] : memref<16x128xbf16, #tpu.memory_space<vmem>>, vector<16x128xbf16>
      tpu.vector_store %arg5[%c0_15, %c0_16], %18 {strides = array<i32>} : memref<16x128xbf16, #tpu.memory_space<vmem>>, vector<16x128xbf16>,
    } else {
    }
    return
  }
  func.func @transform_0(%arg0: i32, %arg1: i32) -> (i32, i32) {
    %c0_i32 = arith.constant 0 : i32
    return %arg0, %arg1 : i32, i32
  }
  func.func @transform_1(%arg0: i32, %arg1: i32) -> (i32, i32) {
    %c0_i32 = arith.constant 0 : i32
    %c0_i32_0 = arith.constant 0 : i32
    return %arg1, %c0_i32 : i32, i32
  }
  func.func @transform_2(%arg0: i32, %arg1: i32) -> (i32, i32) {
    %c0_i32 = arith.constant 0 : i32
    %c0_i32_0 = arith.constant 0 : i32
    %c0_i32_1 = arith.constant 0 : i32
    return %c0_i32, %c0_i32_0 : i32, i32
  }
  func.func @transform_3(%arg0: i32, %arg1: i32) -> (i32, i32) {
    %c0_i32 = arith.constant 0 : i32
    %c0_i32_0 = arith.constant 0 : i32
    return %arg0, %c0_i32 : i32, i32
  }
}

module attributes {stable_mosaic.version = 11 : i64} {
  func.func @_vq_kernel(%arg0: i32, %arg1: memref<16x128xbf16, #tpu.memory_space<vmem>>, %arg2: memref<128x128xf32, #tpu.memory_space<vmem>>, %arg3: memref<1x128xf32, #tpu.memory_space<vmem>>, %arg4: memref<16x128xbf16, #tpu.memory_space<vmem>>) attributes {dimension_semantics = [#tpu.dimension_semantics<parallel>], iteration_bounds = array<i64: 2>, scalar_prefetch = 0 : i64, scratch_operands = 0 : i64, tpu.core_type = #tpu.core_type<tc>, window_params = [{transform_indices = @transform_0, window_bounds = array<i64: 16, 128>}, {pipeline_mode = #tpu.pipeline_mode<synchronous>, transform_indices = @transform_1, window_bounds = array<i64: 128, 128>}, {pipeline_mode = #tpu.pipeline_mode<synchronous>, transform_indices = @transform_2, window_bounds = array<i64: 1, 128>}, {transform_indices = @transform_3, window_bounds = array<i64: 16, 128>}]} {
    %c0 = arith.constant 0 : index
    %c0_0 = arith.constant 0 : index
    %0 = vector.load %arg1[%c0, %c0_0] : memref<16x128xbf16, #tpu.memory_space<vmem>>, vector<16x128xbf16>
    %c0_1 = arith.constant 0 : index
    %c0_2 = arith.constant 0 : index
    %1 = vector.load %arg2[%c0_1, %c0_2] : memref<128x128xf32, #tpu.memory_space<vmem>>, vector<128x128xf32>
    %2 = arith.extf %0 : vector<16x128xbf16> to vector<16x128xf32>
    %3 = arith.mulf %2, %2 : vector<16x128xf32>
    %cst = arith.constant dense<0.000000e+00> : vector<16xf32>
    %4 = vector.multi_reduction <add>, %3, %cst [1] : vector<16x128xf32> to vector<16xf32>
    %5 = vector.shape_cast %4 : vector<16xf32> to vector<16x1xf32>
    %6 = arith.truncf %1 : vector<128x128xf32> to vector<128x128xbf16>
    %cst_3 = arith.constant dense<0.000000e+00> : vector<16x128xf32>
    %7 = tpu.matmul %0, %6, %cst_3 {dimension_numbers = #tpu.dot_dimension_numbers<[1], [1], [0], [0], [0, 0, 1, 0], [], []>} : vector<16x128xbf16>, vector<128x128xbf16>, vector<16x128xf32> -> vector<16x128xf32>
    %cst_4 = arith.constant 2.000000e+00 : f32
    %8 = vector.broadcast %cst_4 : f32 to vector<16x128xf32>
    %9 = arith.mulf %8, %7 : vector<16x128xf32>
    %10 = vector.broadcast %5 : vector<16x1xf32> to vector<16x128xf32>
    %11 = arith.subf %10, %9 : vector<16x128xf32>
    %c0_5 = arith.constant 0 : index
    %c0_6 = arith.constant 0 : index
    %12 = vector.load %arg3[%c0_5, %c0_6] : memref<1x128xf32, #tpu.memory_space<vmem>>, vector<1x128xf32>
    %13 = vector.broadcast %12 : vector<1x128xf32> to vector<16x128xf32>
    %14 = arith.addf %11, %13 : vector<16x128xf32>
    %15 = tpu.iota {dimensions = array<i32: 1>} : vector<16x128xi32>
    %cst_7 = arith.constant dense<0x7F800000> : vector<16xf32>
    %16 = vector.multi_reduction <minimumf>, %14, %cst_7 [1] : vector<16x128xf32> to vector<16xf32>
    %17 = vector.shape_cast %16 : vector<16xf32> to vector<16x1xf32>
    %18 = vector.broadcast %17 : vector<16x1xf32> to vector<16x128xf32>
    %19 = arith.cmpf ole, %14, %18 : vector<16x128xf32>
    %c128_i32 = arith.constant 128 : i32
    %20 = vector.broadcast %c128_i32 : i32 to vector<16x128xi32>
    %21 = arith.select %19, %15, %20 : vector<16x128xi1>, vector<16x128xi32>
    %cst_8 = arith.constant dense<2147483647> : vector<16xi32>
    %22 = vector.multi_reduction <minsi>, %21, %cst_8 [1] : vector<16x128xi32> to vector<16xi32>
    %23 = vector.shape_cast %22 : vector<16xi32> to vector<16x1xi32>
    %24 = vector.broadcast %23 : vector<16x1xi32> to vector<16x128xi32>
    %25 = arith.cmpi eq, %15, %24 : vector<16x128xi32>
    %26 = arith.extui %25 : vector<16x128xi1> to vector<16x128xi32>
    %27 = arith.sitofp %26 : vector<16x128xi32> to vector<16x128xf32>
    %cst_9 = arith.constant dense<0.000000e+00> : vector<16x128xf32>
    %28 = tpu.matmul %27, %1, %cst_9 {dimension_numbers = #tpu.dot_dimension_numbers<[1], [0], [0], [1], [0, 0, 1, 1], [], []>} : vector<16x128xf32>, vector<128x128xf32>, vector<16x128xf32> -> vector<16x128xf32>
    %29 = arith.truncf %28 : vector<16x128xf32> to vector<16x128xbf16>
    %c0_10 = arith.constant 0 : index
    %c0_11 = arith.constant 0 : index
    %30 = vector.load %arg4[%c0_10, %c0_11] : memref<16x128xbf16, #tpu.memory_space<vmem>>, vector<16x128xbf16>
    tpu.vector_store %arg4[%c0_10, %c0_11], %29 {strides = array<i32>} : memref<16x128xbf16, #tpu.memory_space<vmem>>, vector<16x128xbf16>,
    return
  }
  func.func @transform_0(%arg0: i32) -> (i32, i32) {
    %c0_i32 = arith.constant 0 : i32
    %c0_i32_0 = arith.constant 0 : i32
    return %arg0, %c0_i32 : i32, i32
  }
  func.func @transform_1(%arg0: i32) -> (i32, i32) {
    %c0_i32 = arith.constant 0 : i32
    %c0_i32_0 = arith.constant 0 : i32
    %c0_i32_1 = arith.constant 0 : i32
    return %c0_i32, %c0_i32_0 : i32, i32
  }
  func.func @transform_2(%arg0: i32) -> (i32, i32) {
    %c0_i32 = arith.constant 0 : i32
    %c0_i32_0 = arith.constant 0 : i32
    %c0_i32_1 = arith.constant 0 : i32
    return %c0_i32, %c0_i32_0 : i32, i32
  }
  func.func @transform_3(%arg0: i32) -> (i32, i32) {
    %c0_i32 = arith.constant 0 : i32
    %c0_i32_0 = arith.constant 0 : i32
    return %arg0, %c0_i32 : i32, i32
  }
}

module attributes {stable_mosaic.version = 11 : i64} {
  func.func @kernel(%arg0: i32, %arg1: i32, %arg2: memref<16x128xbf16, #tpu.memory_space<vmem>>, %arg3: memref<128x128xbf16, #tpu.memory_space<vmem>>, %arg4: memref<1x128xf32, #tpu.memory_space<vmem>>, %arg5: memref<16x128xbf16, #tpu.memory_space<vmem>>, %arg6: memref<16x128xf32, #tpu.memory_space<vmem>>) attributes {dimension_semantics = [#tpu.dimension_semantics<parallel>, #tpu.dimension_semantics<arbitrary>], iteration_bounds = array<i64: 2, 1>, scalar_prefetch = 0 : i64, scratch_operands = 1 : i64, tpu.core_type = #tpu.core_type<tc>, window_params = [{transform_indices = @transform_0, window_bounds = array<i64: 16, 128>}, {transform_indices = @transform_1, window_bounds = array<i64: 128, 128>}, {pipeline_mode = #tpu.pipeline_mode<synchronous>, transform_indices = @transform_2, window_bounds = array<i64: 1, 128>}, {transform_indices = @transform_3, window_bounds = array<i64: 16, 128>}]} {
    %c0_i32 = arith.constant 0 : i32
    %0 = arith.cmpi eq, %arg1, %c0_i32 : i32
    %1 = arith.extui %0 : i1 to i32
    %c0_i32_0 = arith.constant 0 : i32
    %2 = arith.cmpi ne, %1, %c0_i32_0 : i32
    scf.if %2 {
      %cst_10 = arith.constant 0.000000e+00 : f32
      %12 = vector.broadcast %cst_10 : f32 to vector<16x128xf32>
      %c0_11 = arith.constant 0 : index
      %c0_12 = arith.constant 0 : index
      %13 = vector.load %arg6[%c0_11, %c0_12] : memref<16x128xf32, #tpu.memory_space<vmem>>, vector<16x128xf32>
      tpu.vector_store %arg6[%c0_11, %c0_12], %12 {strides = array<i32>} : memref<16x128xf32, #tpu.memory_space<vmem>>, vector<16x128xf32>,
    } else {
    }
    %c0 = arith.constant 0 : index
    %c0_1 = arith.constant 0 : index
    %3 = vector.load %arg2[%c0, %c0_1] : memref<16x128xbf16, #tpu.memory_space<vmem>>, vector<16x128xbf16>
    %c0_2 = arith.constant 0 : index
    %c0_3 = arith.constant 0 : index
    %4 = vector.load %arg6[%c0_2, %c0_3] : memref<16x128xf32, #tpu.memory_space<vmem>>, vector<16x128xf32>
    %c0_4 = arith.constant 0 : index
    %c0_5 = arith.constant 0 : index
    %5 = vector.load %arg3[%c0_4, %c0_5] : memref<128x128xbf16, #tpu.memory_space<vmem>>, vector<128x128xbf16>
    %cst = arith.constant dense<0.000000e+00> : vector<16x128xf32>
    %6 = tpu.matmul %3, %5, %cst {dimension_numbers = #tpu.dot_dimension_numbers<[1], [0], [0], [1], [0, 0, 1, 1], [], []>} : vector<16x128xbf16>, vector<128x128xbf16>, vector<16x128xf32> -> vector<16x128xf32>
    %7 = arith.addf %4, %6 : vector<16x128xf32>
    %c0_6 = arith.constant 0 : index
    %c0_7 = arith.constant 0 : index
    %8 = vector.load %arg6[%c0_6, %c0_7] : memref<16x128xf32, #tpu.memory_space<vmem>>, vector<16x128xf32>
    tpu.vector_store %arg6[%c0_6, %c0_7], %7 {strides = array<i32>} : memref<16x128xf32, #tpu.memory_space<vmem>>, vector<16x128xf32>,
    %c0_i32_8 = arith.constant 0 : i32
    %9 = arith.cmpi eq, %arg1, %c0_i32_8 : i32
    %10 = arith.extui %9 : i1 to i32
    %c0_i32_9 = arith.constant 0 : i32
    %11 = arith.cmpi ne, %10, %c0_i32_9 : i32
    scf.if %11 {
      %c0_10 = arith.constant 0 : index
      %c0_11 = arith.constant 0 : index
      %12 = vector.load %arg6[%c0_10, %c0_11] : memref<16x128xf32, #tpu.memory_space<vmem>>, vector<16x128xf32>
      %c0_12 = arith.constant 0 : index
      %c0_13 = arith.constant 0 : index
      %13 = vector.load %arg4[%c0_12, %c0_13] : memref<1x128xf32, #tpu.memory_space<vmem>>, vector<1x128xf32>
      %14 = vector.broadcast %13 : vector<1x128xf32> to vector<16x128xf32>
      %15 = arith.addf %12, %14 : vector<16x128xf32>
      %16 = arith.truncf %15 : vector<16x128xf32> to vector<16x128xbf16>
      %c0_14 = arith.constant 0 : index
      %c0_15 = arith.constant 0 : index
      %17 = vector.load %arg5[%c0_14, %c0_15] : memref<16x128xbf16, #tpu.memory_space<vmem>>, vector<16x128xbf16>
      tpu.vector_store %arg5[%c0_14, %c0_15], %16 {strides = array<i32>} : memref<16x128xbf16, #tpu.memory_space<vmem>>, vector<16x128xbf16>,
    } else {
    }
    return
  }
  func.func @transform_0(%arg0: i32, %arg1: i32) -> (i32, i32) {
    %c0_i32 = arith.constant 0 : i32
    return %arg0, %arg1 : i32, i32
  }
  func.func @transform_1(%arg0: i32, %arg1: i32) -> (i32, i32) {
    %c0_i32 = arith.constant 0 : i32
    %c0_i32_0 = arith.constant 0 : i32
    return %arg1, %c0_i32 : i32, i32
  }
  func.func @transform_2(%arg0: i32, %arg1: i32) -> (i32, i32) {
    %c0_i32 = arith.constant 0 : i32
    %c0_i32_0 = arith.constant 0 : i32
    %c0_i32_1 = arith.constant 0 : i32
    return %c0_i32, %c0_i32_0 : i32, i32
  }
  func.func @transform_3(%arg0: i32, %arg1: i32) -> (i32, i32) {
    %c0_i32 = arith.constant 0 : i32
    %c0_i32_0 = arith.constant 0 : i32
    return %arg0, %c0_i32 : i32, i32
  }
}

module attributes {stable_mosaic.version = 11 : i64} {
  func.func @kernel(%arg0: i32, %arg1: i32, %arg2: memref<32x128xbf16, #tpu.memory_space<vmem>>, %arg3: memref<128x128xbf16, #tpu.memory_space<vmem>>, %arg4: memref<1x128xf32, #tpu.memory_space<vmem>>, %arg5: memref<32x128xbf16, #tpu.memory_space<vmem>>, %arg6: memref<32x128xf32, #tpu.memory_space<vmem>>) attributes {dimension_semantics = [#tpu.dimension_semantics<parallel>, #tpu.dimension_semantics<arbitrary>], iteration_bounds = array<i64: 2, 1>, scalar_prefetch = 0 : i64, scratch_operands = 1 : i64, tpu.core_type = #tpu.core_type<tc>, window_params = [{transform_indices = @transform_0, window_bounds = array<i64: 32, 128>}, {transform_indices = @transform_1, window_bounds = array<i64: 128, 128>}, {pipeline_mode = #tpu.pipeline_mode<synchronous>, transform_indices = @transform_2, window_bounds = array<i64: 1, 128>}, {transform_indices = @transform_3, window_bounds = array<i64: 32, 128>}]} {
    %c0_i32 = arith.constant 0 : i32
    %0 = arith.cmpi eq, %arg1, %c0_i32 : i32
    %1 = arith.extui %0 : i1 to i32
    %c0_i32_0 = arith.constant 0 : i32
    %2 = arith.cmpi ne, %1, %c0_i32_0 : i32
    scf.if %2 {
      %cst_11 = arith.constant 0.000000e+00 : f32
      %14 = vector.broadcast %cst_11 : f32 to vector<32x128xf32>
      %c0_12 = arith.constant 0 : index
      %c0_13 = arith.constant 0 : index
      %15 = vector.load %arg6[%c0_12, %c0_13] : memref<32x128xf32, #tpu.memory_space<vmem>>, vector<32x128xf32>
      tpu.vector_store %arg6[%c0_12, %c0_13], %14 {strides = array<i32>} : memref<32x128xf32, #tpu.memory_space<vmem>>, vector<32x128xf32>,
    } else {
    }
    %c0 = arith.constant 0 : index
    %c0_1 = arith.constant 0 : index
    %3 = vector.load %arg2[%c0, %c0_1] : memref<32x128xbf16, #tpu.memory_space<vmem>>, vector<32x128xbf16>
    %cst = arith.constant 0.000000e+00 : bf16
    %4 = vector.broadcast %cst : bf16 to vector<32x128xbf16>
    %5 = arith.maximumf %3, %4 : vector<32x128xbf16>
    %c0_2 = arith.constant 0 : index
    %c0_3 = arith.constant 0 : index
    %6 = vector.load %arg6[%c0_2, %c0_3] : memref<32x128xf32, #tpu.memory_space<vmem>>, vector<32x128xf32>
    %c0_4 = arith.constant 0 : index
    %c0_5 = arith.constant 0 : index
    %7 = vector.load %arg3[%c0_4, %c0_5] : memref<128x128xbf16, #tpu.memory_space<vmem>>, vector<128x128xbf16>
    %cst_6 = arith.constant dense<0.000000e+00> : vector<32x128xf32>
    %8 = tpu.matmul %5, %7, %cst_6 {dimension_numbers = #tpu.dot_dimension_numbers<[1], [0], [0], [1], [0, 0, 1, 1], [], []>} : vector<32x128xbf16>, vector<128x128xbf16>, vector<32x128xf32> -> vector<32x128xf32>
    %9 = arith.addf %6, %8 : vector<32x128xf32>
    %c0_7 = arith.constant 0 : index
    %c0_8 = arith.constant 0 : index
    %10 = vector.load %arg6[%c0_7, %c0_8] : memref<32x128xf32, #tpu.memory_space<vmem>>, vector<32x128xf32>
    tpu.vector_store %arg6[%c0_7, %c0_8], %9 {strides = array<i32>} : memref<32x128xf32, #tpu.memory_space<vmem>>, vector<32x128xf32>,
    %c0_i32_9 = arith.constant 0 : i32
    %11 = arith.cmpi eq, %arg1, %c0_i32_9 : i32
    %12 = arith.extui %11 : i1 to i32
    %c0_i32_10 = arith.constant 0 : i32
    %13 = arith.cmpi ne, %12, %c0_i32_10 : i32
    scf.if %13 {
      %c0_11 = arith.constant 0 : index
      %c0_12 = arith.constant 0 : index
      %14 = vector.load %arg6[%c0_11, %c0_12] : memref<32x128xf32, #tpu.memory_space<vmem>>, vector<32x128xf32>
      %c0_13 = arith.constant 0 : index
      %c0_14 = arith.constant 0 : index
      %15 = vector.load %arg4[%c0_13, %c0_14] : memref<1x128xf32, #tpu.memory_space<vmem>>, vector<1x128xf32>
      %16 = vector.broadcast %15 : vector<1x128xf32> to vector<32x128xf32>
      %17 = arith.addf %14, %16 : vector<32x128xf32>
      %18 = arith.truncf %17 : vector<32x128xf32> to vector<32x128xbf16>
      %c0_15 = arith.constant 0 : index
      %c0_16 = arith.constant 0 : index
      %19 = vector.load %arg5[%c0_15, %c0_16] : memref<32x128xbf16, #tpu.memory_space<vmem>>, vector<32x128xbf16>
      tpu.vector_store %arg5[%c0_15, %c0_16], %18 {strides = array<i32>} : memref<32x128xbf16, #tpu.memory_space<vmem>>, vector<32x128xbf16>,
    } else {
    }
    return
  }
  func.func @transform_0(%arg0: i32, %arg1: i32) -> (i32, i32) {
    %c0_i32 = arith.constant 0 : i32
    return %arg0, %arg1 : i32, i32
  }
  func.func @transform_1(%arg0: i32, %arg1: i32) -> (i32, i32) {
    %c0_i32 = arith.constant 0 : i32
    %c0_i32_0 = arith.constant 0 : i32
    return %arg1, %c0_i32 : i32, i32
  }
  func.func @transform_2(%arg0: i32, %arg1: i32) -> (i32, i32) {
    %c0_i32 = arith.constant 0 : i32
    %c0_i32_0 = arith.constant 0 : i32
    %c0_i32_1 = arith.constant 0 : i32
    return %c0_i32, %c0_i32_0 : i32, i32
  }
  func.func @transform_3(%arg0: i32, %arg1: i32) -> (i32, i32) {
    %c0_i32 = arith.constant 0 : i32
    %c0_i32_0 = arith.constant 0 : i32
    return %arg0, %c0_i32 : i32, i32
  }
}

module attributes {stable_mosaic.version = 11 : i64} {
  func.func @kernel(%arg0: i32, %arg1: i32, %arg2: memref<88x128xbf16, #tpu.memory_space<vmem>>, %arg3: memref<128x128xbf16, #tpu.memory_space<vmem>>, %arg4: memref<1x128xf32, #tpu.memory_space<vmem>>, %arg5: memref<88x128xf32, #tpu.memory_space<vmem>>, %arg6: memref<88x128xf32, #tpu.memory_space<vmem>>) attributes {dimension_semantics = [#tpu.dimension_semantics<parallel>, #tpu.dimension_semantics<arbitrary>], iteration_bounds = array<i64: 2, 1>, scalar_prefetch = 0 : i64, scratch_operands = 1 : i64, tpu.core_type = #tpu.core_type<tc>, window_params = [{transform_indices = @transform_0, window_bounds = array<i64: 88, 128>}, {transform_indices = @transform_1, window_bounds = array<i64: 128, 128>}, {pipeline_mode = #tpu.pipeline_mode<synchronous>, transform_indices = @transform_2, window_bounds = array<i64: 1, 128>}, {transform_indices = @transform_3, window_bounds = array<i64: 88, 128>}]} {
    %c0_i32 = arith.constant 0 : i32
    %0 = arith.cmpi eq, %arg1, %c0_i32 : i32
    %1 = arith.extui %0 : i1 to i32
    %c0_i32_0 = arith.constant 0 : i32
    %2 = arith.cmpi ne, %1, %c0_i32_0 : i32
    scf.if %2 {
      %cst_11 = arith.constant 0.000000e+00 : f32
      %14 = vector.broadcast %cst_11 : f32 to vector<88x128xf32>
      %c0_12 = arith.constant 0 : index
      %c0_13 = arith.constant 0 : index
      %15 = vector.load %arg6[%c0_12, %c0_13] : memref<88x128xf32, #tpu.memory_space<vmem>>, vector<88x128xf32>
      tpu.vector_store %arg6[%c0_12, %c0_13], %14 {strides = array<i32>} : memref<88x128xf32, #tpu.memory_space<vmem>>, vector<88x128xf32>,
    } else {
    }
    %c0 = arith.constant 0 : index
    %c0_1 = arith.constant 0 : index
    %3 = vector.load %arg2[%c0, %c0_1] : memref<88x128xbf16, #tpu.memory_space<vmem>>, vector<88x128xbf16>
    %cst = arith.constant 0.000000e+00 : bf16
    %4 = vector.broadcast %cst : bf16 to vector<88x128xbf16>
    %5 = arith.maximumf %3, %4 : vector<88x128xbf16>
    %c0_2 = arith.constant 0 : index
    %c0_3 = arith.constant 0 : index
    %6 = vector.load %arg6[%c0_2, %c0_3] : memref<88x128xf32, #tpu.memory_space<vmem>>, vector<88x128xf32>
    %c0_4 = arith.constant 0 : index
    %c0_5 = arith.constant 0 : index
    %7 = vector.load %arg3[%c0_4, %c0_5] : memref<128x128xbf16, #tpu.memory_space<vmem>>, vector<128x128xbf16>
    %cst_6 = arith.constant dense<0.000000e+00> : vector<88x128xf32>
    %8 = tpu.matmul %5, %7, %cst_6 {dimension_numbers = #tpu.dot_dimension_numbers<[1], [0], [0], [1], [0, 0, 1, 1], [], []>} : vector<88x128xbf16>, vector<128x128xbf16>, vector<88x128xf32> -> vector<88x128xf32>
    %9 = arith.addf %6, %8 : vector<88x128xf32>
    %c0_7 = arith.constant 0 : index
    %c0_8 = arith.constant 0 : index
    %10 = vector.load %arg6[%c0_7, %c0_8] : memref<88x128xf32, #tpu.memory_space<vmem>>, vector<88x128xf32>
    tpu.vector_store %arg6[%c0_7, %c0_8], %9 {strides = array<i32>} : memref<88x128xf32, #tpu.memory_space<vmem>>, vector<88x128xf32>,
    %c0_i32_9 = arith.constant 0 : i32
    %11 = arith.cmpi eq, %arg1, %c0_i32_9 : i32
    %12 = arith.extui %11 : i1 to i32
    %c0_i32_10 = arith.constant 0 : i32
    %13 = arith.cmpi ne, %12, %c0_i32_10 : i32
    scf.if %13 {
      %c0_11 = arith.constant 0 : index
      %c0_12 = arith.constant 0 : index
      %14 = vector.load %arg6[%c0_11, %c0_12] : memref<88x128xf32, #tpu.memory_space<vmem>>, vector<88x128xf32>
      %c0_13 = arith.constant 0 : index
      %c0_14 = arith.constant 0 : index
      %15 = vector.load %arg4[%c0_13, %c0_14] : memref<1x128xf32, #tpu.memory_space<vmem>>, vector<1x128xf32>
      %16 = vector.broadcast %15 : vector<1x128xf32> to vector<88x128xf32>
      %17 = arith.addf %14, %16 : vector<88x128xf32>
      %c0_15 = arith.constant 0 : index
      %c0_16 = arith.constant 0 : index
      %18 = vector.load %arg5[%c0_15, %c0_16] : memref<88x128xf32, #tpu.memory_space<vmem>>, vector<88x128xf32>
      tpu.vector_store %arg5[%c0_15, %c0_16], %17 {strides = array<i32>} : memref<88x128xf32, #tpu.memory_space<vmem>>, vector<88x128xf32>,
    } else {
    }
    return
  }
  func.func @transform_0(%arg0: i32, %arg1: i32) -> (i32, i32) {
    %c0_i32 = arith.constant 0 : i32
    return %arg0, %arg1 : i32, i32
  }
  func.func @transform_1(%arg0: i32, %arg1: i32) -> (i32, i32) {
    %c0_i32 = arith.constant 0 : i32
    %c0_i32_0 = arith.constant 0 : i32
    return %arg1, %c0_i32 : i32, i32
  }
  func.func @transform_2(%arg0: i32, %arg1: i32) -> (i32, i32) {
    %c0_i32 = arith.constant 0 : i32
    %c0_i32_0 = arith.constant 0 : i32
    %c0_i32_1 = arith.constant 0 : i32
    return %c0_i32, %c0_i32_0 : i32, i32
  }
  func.func @transform_3(%arg0: i32, %arg1: i32) -> (i32, i32) {
    %c0_i32 = arith.constant 0 : i32
    %c0_i32_0 = arith.constant 0 : i32
    return %arg0, %c0_i32 : i32, i32
  }
}

module attributes {stable_mosaic.version = 11 : i64} {
  func.func @_mse_kernel(%arg0: i32, %arg1: memref<16x128xf32, #tpu.memory_space<vmem>>, %arg2: memref<16x128xf32, #tpu.memory_space<vmem>>, %arg3: memref<1x1xf32, #tpu.memory_space<smem>>) attributes {dimension_semantics = [#tpu.dimension_semantics<arbitrary>], iteration_bounds = array<i64: 1>, scalar_prefetch = 0 : i64, scratch_operands = 0 : i64, tpu.core_type = #tpu.core_type<tc>, window_params = [{transform_indices = @transform_0, window_bounds = array<i64: 16, 128>}, {transform_indices = @transform_1, window_bounds = array<i64: 16, 128>}, {transform_indices = @transform_2, window_bounds = array<i64: 1, 1>}]} {
    %c0_i32 = arith.constant 0 : i32
    %0 = arith.cmpi eq, %arg0, %c0_i32 : i32
    %1 = arith.extui %0 : i1 to i32
    %c0_i32_0 = arith.constant 0 : i32
    %2 = arith.cmpi ne, %1, %c0_i32_0 : i32
    scf.if %2 {
      %cst_8 = arith.constant 0.000000e+00 : f32
      %c0_9 = arith.constant 0 : index
      %c0_10 = arith.constant 0 : index
      %14 = memref.load %arg3[%c0_9, %c0_10] : memref<1x1xf32, #tpu.memory_space<smem>>
      memref.store %cst_8, %arg3[%c0_9, %c0_10] : memref<1x1xf32, #tpu.memory_space<smem>>
    } else {
    }
    %c0 = arith.constant 0 : index
    %c0_1 = arith.constant 0 : index
    %3 = vector.load %arg1[%c0, %c0_1] : memref<16x128xf32, #tpu.memory_space<vmem>>, vector<16x128xf32>
    %c0_2 = arith.constant 0 : index
    %c0_3 = arith.constant 0 : index
    %4 = vector.load %arg2[%c0_2, %c0_3] : memref<16x128xf32, #tpu.memory_space<vmem>>, vector<16x128xf32>
    %5 = arith.subf %3, %4 : vector<16x128xf32>
    %c0_4 = arith.constant 0 : index
    %c0_5 = arith.constant 0 : index
    %6 = memref.load %arg3[%c0_4, %c0_5] : memref<1x1xf32, #tpu.memory_space<smem>>
    %7 = arith.mulf %5, %5 : vector<16x128xf32>
    %8 = vector.shape_cast %7 : vector<16x128xf32> to vector<1x16x128xf32>
    %cst = arith.constant dense<0.000000e+00> : vector<1xf32>
    %9 = vector.multi_reduction <add>, %8, %cst [1, 2] : vector<1x16x128xf32> to vector<1xf32>
    %10 = vector.shape_cast %9 : vector<1xf32> to vector<1x1x1xf32>
    %11 = vector.extract %10[0, 0, 0] : f32 from vector<1x1x1xf32>
    %12 = arith.addf %6, %11 : f32
    %c0_6 = arith.constant 0 : index
    %c0_7 = arith.constant 0 : index
    %13 = memref.load %arg3[%c0_6, %c0_7] : memref<1x1xf32, #tpu.memory_space<smem>>
    memref.store %12, %arg3[%c0_6, %c0_7] : memref<1x1xf32, #tpu.memory_space<smem>>
    return
  }
  func.func @transform_0(%arg0: i32) -> (i32, i32) {
    %c0_i32 = arith.constant 0 : i32
    %c0_i32_0 = arith.constant 0 : i32
    return %arg0, %c0_i32 : i32, i32
  }
  func.func @transform_1(%arg0: i32) -> (i32, i32) {
    %c0_i32 = arith.constant 0 : i32
    %c0_i32_0 = arith.constant 0 : i32
    return %arg0, %c0_i32 : i32, i32
  }
  func.func @transform_2(%arg0: i32) -> (i32, i32) {
    %c0_i32 = arith.constant 0 : i32
    %c0_i32_0 = arith.constant 0 : i32
    %c0_i32_1 = arith.constant 0 : i32
    return %c0_i32, %c0_i32_0 : i32, i32
  }
}

</mosaic_0001>

<bundles_post_ra>
// kernel: vqvae_forward.12
= control target key start
LH: loop header
LB: loop body
LE: loop exit
PB: predicated region body
PF: predicated region fallthrough
CT: control target
= control target key end

     0   :  { %s762_s12 = smov 0   ;;  %s764_s13 = smov 0   ;;  %s835_s0 = inlined_call_operand.vmem [shape: bf16[128,128], index: 0, kind: input, shape index: {}]   ;;  %s836_s1 = inlined_call_operand.vmem [shape: bf16[128,128], index: 1, kind: input, shape index: {}]   ;;  %s837_s2 = inlined_call_operand.vmem [shape: f32[1,128], index: 2, kind: input, shape index: {}]   ;;  %s838_s3 = inlined_call_operand.vmem [shape: bf16[128,128], index: 3, kind: output, shape index: {}]  }
   0x1   :  { %s766_s14 = smov 0  }
   0x2 LB: > { %s25_s15 = sadd.s32 1, %s736_s13  ;;  %p571_p0 = scmp.ge.s32.totalorder %s740_s14, 1  ;;  %s740_s14 = sphi %s766_s14, %s13_s14   ;;  %s736_s13 = sphi %s764_s13, %s840_s13   ;;  %s732_s12 = sphi %s762_s12, %s839_s12  }
   0x3   : > { %p27_p1 = scmp.ge.s32.totalorder %s25_s15, 2  ;;  %p166_p2 = scmp.lt.s32.totalorder %s740_s14, 3 }
   0x5   : > { %s842_s15 = smov (%p27_p1, %s25_s15), 0  ;;  %p167_p3 = pnand %p571_p0, %p166_p2 }
   0x6   : > { %v706_v0 = vld [vmem:[%s836_s1] sm:$0xff] (!%p167_p3)   ;;  %s572_s18 = sshll.u32 (!%p167_p3), %s732_s12, 3  ;;  %v707_v1 = vld [vmem:[%s836_s1 + $0x8] sm:$0xff] (!%p167_p3)   ;;  %v708_v2 = vld [vmem:[%s836_s1 + $0x10] sm:$0xff] (!%p167_p3)  }
   0x7   : > { %170 = sbr.rel (%p167_p3) target bundleno = 259 (0x103), region = 32  ;;  %p199_p4 = scmp.lt.s32.totalorder (!%p167_p3), %s572_s18, 15  ;;  %642 = vmatprep.subr.bf16.mxu0 (!%p167_p3), %v706_v0  ;;  %666 = vmatprep.subr.bf16.mxu1 (!%p167_p3), %v706_v0  ;;  %v709_v3 = vld [vmem:[%s836_s1 + $0x18] sm:$0xff] (!%p167_p3)   ;;  %v710_v6 = vld [vmem:[%s836_s1 + $0x20] sm:$0xff] (!%p167_p3)   ;;  %v711_v7 = vld [vmem:[%s836_s1 + $0x28] sm:$0xff] (!%p167_p3)  }
   0x8   : > { %643 = vmatpush3.bf16.msra.mxu0 (!%p167_p3), %v706_v0  ;;  %674 = vmatpush3.bf16.msra.mxu1 (!%p167_p3), %v706_v0  ;;  %v712_v8 = vld [vmem:[%s836_s1 + $0x30] sm:$0xff] (!%p167_p3)   ;;  %v713_v9 = vld [vmem:[%s836_s1 + $0x38] sm:$0xff] (!%p167_p3)   ;;  %v588_v13 = vld [vmem:[%s837_s2] ss:$0 sm:$0xff] (!%p167_p3) }
   0x9   : > { %644 = vmatprep.subr.bf16.mxu0 (!%p167_p3), %v707_v1  ;;  %667 = vmatprep.subr.bf16.mxu1 (!%p167_p3), %v707_v1 }
   0xc   : > { %645 = vmatpush3.bf16.msra.mxu0 (!%p167_p3), %v707_v1  ;;  %675 = vmatpush3.bf16.msra.mxu1 (!%p167_p3), %v707_v1 }
   0xd   : > { %646 = vmatprep.subr.bf16.mxu0 (!%p167_p3), %v708_v2  ;;  %668 = vmatprep.subr.bf16.mxu1 (!%p167_p3), %v708_v2 }
   0xe   : > { %s844_s18 = smov (!%p199_p4, %s572_s18), 15 }
   0xf   : > { %s573_s23 = sshll.u32 %s844_s18, 2 }
  0x10   : > { %s797_s26 = scalar_lea.vmem %s835_s0, %s573_s23  ;;  %647 = vmatpush3.bf16.msra.mxu0 %v708_v2  ;;  %676 = vmatpush3.bf16.msra.mxu1 %v708_v2  ;;  %s217_s17 = scalar_lea.vmem %s838_s3, %s573_s23 }
  0x11   : > { %v714_v4 = vld [vmem:[%s797_s26] sm:$0xff]   ;;  %v715_v5 = vld [vmem:[%s797_s26 + $0x10] sm:$0xff]   ;;  %648 = vmatprep.subr.bf16.mxu0 %v709_v3  ;;  %669 = vmatprep.subr.bf16.mxu1 %v709_v3  ;;  %v716_v10 = vld [vmem:[%s797_s26 + $0x8] sm:$0xff]  }
  0x12   : > { %658 = vmatprep.mubr.bf16.mxu0 %v714_v4  ;;  %662 = vmatprep.mubr.bf16.mxu1 %v715_v5  ;;  %v717_v11 = vld [vmem:[%s797_s26 + $0x18] sm:$0xff]  }
  0x14   : > { %649 = vmatpush3.bf16.msra.mxu0 %v709_v3  ;;  %677 = vmatpush3.bf16.msra.mxu1 %v709_v3 }
  0x15   : > { %650 = vmatprep.subr.bf16.mxu0 %v710_v6  ;;  %670 = vmatprep.subr.bf16.mxu1 %v710_v6 }
  0x18   : > { %651 = vmatpush3.bf16.msra.mxu0 %v710_v6  ;;  %678 = vmatpush3.bf16.msra.mxu1 %v710_v6 }
  0x19   : > { %652 = vmatprep.subr.bf16.mxu0 %v711_v7  ;;  %671 = vmatprep.subr.bf16.mxu1 %v711_v7 }
  0x1c   : > { %653 = vmatpush3.bf16.msra.mxu0 %v711_v7  ;;  %679 = vmatpush3.bf16.msra.mxu1 %v711_v7 }
  0x1d   : > { %654 = vmatprep.subr.bf16.mxu0 %v712_v8  ;;  %672 = vmatprep.subr.bf16.mxu1 %v712_v8 }
  0x20   : > { %655 = vmatpush3.bf16.msra.mxu0 %v712_v8  ;;  %680 = vmatpush3.bf16.msra.mxu1 %v712_v8 }
  0x21   : > { %656 = vmatprep.subr.bf16.mxu0 %v713_v9  ;;  %673 = vmatprep.subr.bf16.mxu1 %v713_v9 }
  0x24   : > { %657 = vmatpush3.bf16.msra.mxu0 %v713_v9  ;;  %681 = vmatpush3.bf16.msra.mxu1 %v713_v9 }
  0x27   : > { %659 = vmatmul.mubr.bf16.vlgmr.msra.gmra.mrb[0].mxu0 %v716_v10  ;;  %663 = vmatmul.mubr.bf16.vlgmr.msra.gmra.mrb[0].mxu1 %v717_v11 }
  0xfa   : > { %v660_v12 = vpop.f32.mrb[0].mxu0  ;;  %v664_v14 = vpop.f32.mrb[0].mxu1 }
  0xfb   : > { %v370_v15 = vpop.f32.mrb[1].mxu0  ;;  %v386_v16 = vpop.f32.mrb[1].mxu1  ;;  %v437_v19 = vadd.f32 %v660_v12, %v588_v13  ;;  %v441_v20 = vadd.f32 %v664_v14, %v588_v13 }
  0xfc   : > { %v661_v17 = vpop.f32.mrb[2].mxu0  ;;  %v665_v18 = vpop.f32.mrb[2].mxu1  ;;  %v435_v25 = vadd.f32 %v588_v13, %v370_v15  ;;  %v439_v26 = vadd.f32 %v588_v13, %v386_v16 }
  0xfd   : > { %v438_v21 = vadd.f32 %v661_v17, %v588_v13  ;;  %v442_v22 = vadd.f32 %v665_v18, %v588_v13  ;;  %v373_v23 = vpop.f32.mrb[3].mxu0  ;;  %v389_v24 = vpop.f32.mrb[3].mxu1 }
  0xfe   : > { %v436_v27 = vadd.f32 %v588_v13, %v373_v23  ;;  %v440_v28 = vadd.f32 %v588_v13, %v389_v24 }
  0xff   : > { %v615_v29 = vpack.c.bf16 %v438_v21, %v437_v19  ;;  %v625_v30 = vpack.c.bf16 %v442_v22, %v441_v20 }
 0x100   : > { %v610_v31 = vpack.c.bf16 %v436_v27, %v435_v25  ;;  %v620_v32 = vpack.c.bf16 %v440_v28, %v439_v26 }
 0x101   : > { %627 = vst [vmem:[%s217_s17 + $0x8] sm:$0xff] %v615_v29   ;;  %629 = vst [vmem:[%s217_s17 + $0x18] sm:$0xff] %v625_v30  }
 0x102   : > { %611 = vst [vmem:[%s217_s17] sm:$0xff] %v610_v31   ;;  %628 = vst [vmem:[%s217_s17 + $0x10] sm:$0xff] %v620_v32  }
 0x103 PF: > { %s13_s14 = sadd.s32 1, %s740_s14   ;;  %s839_s12 = smov %s736_s13 }
 0x104   : > { %p10_p5 = scmp.ge.s32.totalorder %s13_s14, 4   ;;  %s840_s13 = smov %s842_s15 }
 0x106   :  { %12 = sbr.rel (!%p10_p5) target bundleno = 2 (0x2), region = 73 }

// kernel: vqvae_forward.13
= control target key start
LH: loop header
LB: loop body
LE: loop exit
PB: predicated region body
PF: predicated region fallthrough
CT: control target
= control target key end

     0   :  { %s683_s12 = smov 0   ;;  %s685_s13 = smov 0   ;;  %s771_s0 = inlined_call_operand.vmem [shape: bf16[32,256], index: 0, kind: input, shape index: {}]   ;;  %s772_s1 = inlined_call_operand.vmem [shape: bf16[256,128], index: 1, kind: input, shape index: {}]   ;;  %s773_s2 = inlined_call_operand.vmem [shape: f32[1,128], index: 2, kind: input, shape index: {}]   ;;  %s774_s3 = inlined_call_operand.vmem [shape: bf16[32,128], index: 3, kind: output, shape index: {}]  }
   0x1   :  { %s687_s14 = smov 0  }
   0x2 LB: > { %s25_s15 = sadd.s32 1, %s656_s13  ;;  %p538_p0 = scmp.ge.s32.totalorder %s660_s14, 1  ;;  %s660_s14 = sphi %s687_s14, %s13_s14   ;;  %s656_s13 = sphi %s685_s13, %s776_s13   ;;  %s652_s12 = sphi %s683_s12, %s775_s12  }
   0x3   : > { %p27_p1 = scmp.ge.s32.totalorder %s25_s15, 2  ;;  %p169_p2 = scmp.lt.s32.totalorder %s660_s14, 3 }
   0x5   : > { %s778_s15 = smov (%p27_p1, %s25_s15), 0  ;;  %p170_p3 = pnand %p538_p0, %p169_p2 }
   0x6   : > { %v622_v0 = vld [vmem:[%s772_s1 + $0x40] sm:$0xff] (!%p170_p3)   ;;  %s539_s18 = sshll.u32 (!%p170_p3), %s652_s12, 1  ;;  %v624_v2 = vld [vmem:[%s772_s1 + $0x48] sm:$0xff] (!%p170_p3)   ;;  %v626_v4 = vld [vmem:[%s772_s1 + $0x50] sm:$0xff] (!%p170_p3)   ;;  %v662_v13 = vmov (!%p170_p3), 0  }
   0x7   : > { %173 = sbr.rel (%p170_p3) target bundleno = 261 (0x105), region = 32  ;;  %v623_v1 = vld [vmem:[%s772_s1] sm:$0xff] (!%p170_p3)   ;;  %575 = vmatprep.subr.bf16.mxu0 (!%p170_p3), %v622_v0  ;;  %p205_p4 = scmp.lt.s32.totalorder (!%p170_p3), %s539_s18, 3  ;;  %v625_v3 = vld [vmem:[%s772_s1 + $0x8] sm:$0xff] (!%p170_p3)   ;;  %v627_v5 = vld [vmem:[%s772_s1 + $0x10] sm:$0xff] (!%p170_p3)  }
   0x8   : > { %576 = vmatpush3.bf16.msra.mxu0 (!%p170_p3), %v623_v1  ;;  %v628_v6 = vld [vmem:[%s772_s1 + $0x58] sm:$0xff] (!%p170_p3)   ;;  %v630_v8 = vld [vmem:[%s772_s1 + $0x60] sm:$0xff] (!%p170_p3)   ;;  %v632_v10 = vld [vmem:[%s772_s1 + $0x68] sm:$0xff] (!%p170_p3)  }
   0x9   : > { %577 = vmatprep.subr.bf16.mxu0 (!%p170_p3), %v624_v2  ;;  %v629_v7 = vld [vmem:[%s772_s1 + $0x18] sm:$0xff] (!%p170_p3)   ;;  %v631_v9 = vld [vmem:[%s772_s1 + $0x20] sm:$0xff] (!%p170_p3)   ;;  %v633_v16 = vld [vmem:[%s772_s1 + $0x28] sm:$0xff] (!%p170_p3)  }
   0xa   : > { %v634_v18 = vld [vmem:[%s772_s1 + $0x70] sm:$0xff] (!%p170_p3)   ;;  %v636_v20 = vld [vmem:[%s772_s1 + $0x78] sm:$0xff] (!%p170_p3)   ;;  %v562_v27 = vld [vmem:[%s773_s2] ss:$0 sm:$0xff] (!%p170_p3) }
   0xb   : > { %v635_v19 = vld [vmem:[%s772_s1 + $0x30] sm:$0xff] (!%p170_p3)   ;;  %v637_v21 = vld [vmem:[%s772_s1 + $0x38] sm:$0xff] (!%p170_p3)  }
   0xc   : > { %578 = vmatpush3.bf16.msra.mxu0 (!%p170_p3), %v625_v3 }
   0xd   : > { %579 = vmatprep.subr.bf16.mxu0 (!%p170_p3), %v626_v4 }
   0xe   : > { %s780_s18 = smov (!%p205_p4, %s539_s18), 3 }
   0xf   : > { %s567_s4 = sshll.u32 %s780_s18, 3  ;;  %s543_s5 = sshll.u32 %s780_s18, 2 }
  0x10   : > { %580 = vmatpush3.bf16.msra.mxu0 %v627_v5  ;;  %s212_s11 = scalar_lea.vmem %s771_s0, %s567_s4  ;;  %s225_s8 = scalar_lea.vmem %s774_s3, %s543_s5 }
  0x11   : > { %581 = vmatprep.subr.bf16.mxu0 %v628_v6  ;;  %v234_v11 = vld [vmem:[%s212_s11] sm:$0xff]  ;;  %v235_v12 = vld [vmem:[%s212_s11 + $0x8] sm:$0xff] }
  0x12   : > { %v236_v14 = vmax.bf16 %v662_v13, %v234_v11  ;;  %v237_v15 = vmax.bf16 %v662_v13, %v235_v12 }
  0x14   : > { %582 = vmatpush3.bf16.msra.mxu0 %v629_v7  ;;  %v545_v17 = vcombine.high %v236_v14, %v237_v15  ;;  %v544_v22 = vcombine.low %v236_v14, %v237_v15 }
  0x15   : > { %583 = vmatprep.subr.bf16.mxu0 %v630_v8 }
  0x16   : > { %410 = vmatprep.mubr.bf16.mxu0 %v545_v17 }
  0x18   : > { %584 = vmatpush3.bf16.msra.mxu0 %v631_v9 }
  0x19   : > { %585 = vmatprep.subr.bf16.mxu0 %v632_v10 }
  0x1c   : > { %586 = vmatpush3.bf16.msra.mxu0 %v633_v16 }
  0x1d   : > { %587 = vmatprep.subr.bf16.mxu0 %v634_v18 }
  0x20   : > { %588 = vmatpush3.bf16.msra.mxu0 %v635_v19 }
  0x21   : > { %589 = vmatprep.subr.bf16.mxu0 %v636_v20 }
  0x24   : > { %590 = vmatpush3.bf16.msra.mxu0 %v637_v21 }
  0x27   : > { %411 = vmatmul.mubr.bf16.vlgmr.msra.gmra.mrb[0].mxu0 %v544_v22 }
  0xfa   : > { %v591_v23 = vpop.f32.mrb[0].mxu0 }
  0xfb   : > { %v592_v24 = vpop.f32.mrb[1].mxu0 }
  0xfc   : > { %v593_v25 = vadd.f32 %v592_v24, %v591_v23  ;;  %v594_v26 = vpop.f32.mrb[2].mxu0 }
  0xfd   : > { %v595_v28 = vpop.f32.mrb[3].mxu0 }
  0xfe   : > { %v596_v29 = vadd.f32 %v595_v28, %v594_v26  ;;  %v435_v30 = vadd.f32 %v593_v25, %v562_v27 }
 0x100   : > { %v436_v31 = vadd.f32 %v596_v29, %v562_v27 }
 0x102   : > { %v573_v32 = vpack.c.bf16 %v436_v31, %v435_v30 }
 0x104   : > { %574 = vst [vmem:[%s225_s8] sm:$0xff] %v573_v32  }
 0x105 PF: > { %s13_s14 = sadd.s32 1, %s660_s14   ;;  %s775_s12 = smov %s656_s13 }
 0x106   : > { %p10_p5 = scmp.ge.s32.totalorder %s13_s14, 4   ;;  %s776_s13 = smov %s778_s15 }
 0x108   :  { %12 = sbr.rel (!%p10_p5) target bundleno = 2 (0x2), region = 73 }

// kernel: vqvae_forward.14
= control target key start
LH: loop header
LB: loop body
LE: loop exit
PB: predicated region body
PF: predicated region fallthrough
CT: control target
= control target key end

     0   :  { %s1758_s15 = smov 0   ;;  %s2122_s0 = inlined_call_operand.vmem [shape: bf16[2,50,32], index: 0, kind: input, shape index: {}]   ;;  %s2123_s1 = inlined_call_operand.vmem [shape: bf16[9,32,32], index: 1, kind: input, shape index: {}]   ;;  %s2124_s2 = inlined_call_operand.vmem [shape: f32[1,32], index: 2, kind: input, shape index: {}]   ;;  %s2125_s3 = inlined_call_operand.vmem [shape: f32[36,1], index: 3, kind: input, shape index: {}]   ;;  %s2126_s4 = inlined_call_operand.vmem [shape: bf16[2,50,32], index: 4, kind: output, shape index: {}]  }
   0x1 LB: > { %s1382_s16 = sadd.s32 4294967295, %s1728_s15   ;;  %p1386_p0 = scmp.ge.s32.totalorder %s1728_s15, 1  ;;  %s1728_s15 = sphi %s1758_s15, %s14_s15  }
   0x2   : > { %p162_p1 = scmp.lt.s32.totalorder %s1728_s15, 3 }
   0x4   : > { %p163_p2 = pnand %p1386_p0, %p162_p1 }
   0x5   : > { %v1704_v0 = vld [vmem:[%s2123_s1 + $0x10] sm:$0xff] (!%p163_p2)   ;;  %v1730_v1 = vmov (!%p163_p2), 0.0   ;;  %v1705_v2 = vld [vmem:[%s2123_s1 + $0x18] sm:$0xff] (!%p163_p2)   ;;  %vm1731_vm0 = vmmov (!%p163_p2), 0   ;;  %p188_p3 = scmp.lt.s32.totalorder (!%p163_p2), %s1382_s16, 1  ;;  %v1732_v3 = vmov (!%p163_p2), 0  }
   0x6   : > { %166 = sbr.rel (%p163_p2) target bundleno = 365 (0x16d), region = 36  ;;  %1686 = vmatprep.subr.bf16.mxu1 (!%p163_p2), %v1730_v1  ;;  %1542 = vmatprep.subr.bf16.mxu0 (!%p163_p2), %v1730_v1  ;;  %vm233_vm1 = vsmask.f32 (!%p163_p2), 7424  ;;  %vm269_vm2 = vcmask (!%p163_p2), 261120   ;;  %v1706_v28 = vld [vmem:[%s2123_s1] sm:$0xff] (!%p163_p2)   ;;  %v1707_v35 = vld [vmem:[%s2123_s1 + $0x8] sm:$0xff] (!%p163_p2)  }
   0x7   : > { %1688 = vmatpush3.bf16.msra.mxu1 (!%p163_p2), %v1704_v0  ;;  %1550 = vmatprep.mubr.msk.bf16.mxu1 (!%p163_p2), %vm1731_vm0, %v1730_v1  ;;  %v1708_v31 = vld [vmem:[%s2123_s1 + $0x20] sm:$0xff] (!%p163_p2)   ;;  %v1709_v36 = vld [vmem:[%s2123_s1 + $0x28] sm:$0xff] (!%p163_p2)   ;;  %vm423_vm3 = vcmask (!%p163_p2), 1046528   ;;  %v1195_v48 = vld [vmem:[%s2125_s3 + $0x10] sm:$0xff] (!%p163_p2)  ;;  %vm641_vm4 = vsmask.f32 (!%p163_p2), 4352 }
   0x8   : > { %1687 = vmatprep.subr.bf16.mxu1 (!%p163_p2), %v1730_v1  ;;  %1543 = vmatpush3.bf16.msra.mxu0 (!%p163_p2), %v1704_v0  ;;  %v1193_v40 = vld [vmem:[%s2125_s3] sm:$0xff] (!%p163_p2)  ;;  %v1194_v47 = vld [vmem:[%s2125_s3 + $0x8] sm:$0xff] (!%p163_p2)  ;;  %v1196_v55 = vld [vmem:[%s2125_s3 + $0x18] sm:$0xff] (!%p163_p2)  ;;  %vm543_vm5 = vcmask (!%p163_p2), 1044480   ;;  %vm855_vm6 = vcmask (!%p163_p2), 1045504   ;;  %vm1228_vm8 = vcmask (!%p163_p2), 257024  }
   0x9   : > { %1544 = vmatprep.subr.bf16.mxu0 (!%p163_p2), %v1730_v1  ;;  %1546 = vmatprep.mubr.msk.bf16.mxu0 (!%p163_p2), %vm1731_vm0, %v1730_v1  ;;  %v1711_v42 = vld [vmem:[%s2123_s1 + $0x40] sm:$0xff] (!%p163_p2)   ;;  %v1713_v51 = vld [vmem:[%s2123_s1 + $0x48] sm:$0xff] (!%p163_p2)   ;;  %v1710_v56 = vld [vmem:[%s2123_s1 + $0x30] sm:$0xff] (!%p163_p2)   ;;  %vm975_vm7 = vsmask.f32 (!%p163_p2), 5376  ;;  %vm1235_vm9 = vcmask (!%p163_p2), 253952  }
   0xa   : > { %1702 = vset.pattern.permute.xlu0 (!%p163_p2), %v1732_v3  ;;  %1703 = vset.pattern.permute.xlu1 (!%p163_p2), %v1732_v3  ;;  %v1197_v62 = vld [vmem:[%s2125_s3 + $0x20] sm:$0xf] (!%p163_p2)  ;;  %v1712_v63 = vld [vmem:[%s2123_s1 + $0x38] sm:$0xff] (!%p163_p2)   ;;  %vm1311_vm10 = vcmask (!%p163_p2), 257027   ;;  %vm1312_vm11 = vsmask.f32 (!%p163_p2), 7950 }
   0xb   : > { %1689 = vmatpush3.bf16.msra.mxu1 (!%p163_p2), %v1705_v2  ;;  %1200 = vperm.xlu0 (!%p163_p2), %1702, %v1193_v40   ;;  %vm2085_vm12 = vmand (!%p163_p2), %vm1311_vm10, %vm1312_vm11  ;;  %vm1253_vm13 = vsmask.f32 (!%p163_p2), 3328  ;;  %vm1254_vm14 = vsmask.f32 (!%p163_p2), 7440 }
   0xc   : > { %1558 = vmatprep.subr.bf16.mxu1 (!%p163_p2), %v1730_v1  ;;  %1545 = vmatpush3.bf16.msra.mxu0 (!%p163_p2), %v1705_v2  ;;  %vm2095_vm15 = vmor (!%p163_p2), %vm1253_vm13, %vm1254_vm14 }
   0xd   : > { %s2132_s16 = smov (!%p188_p3, %s1382_s16), 1  ;;  %1574 = vmatprep.subr.bf16.mxu0 %v1730_v1  ;;  %1210 = vperm.xlu1 %1703, %v1195_v48  }
   0xe   : > { %s1690_s21 = smul.u32 28, %s2132_s16 }
   0xf   : > { %1205 = vperm.xlu0 %1702, %v1194_v47  }
  0x10   : > { %s1791_s24 = scalar_lea.vmem %s2122_s0, %s1690_s21  ;;  %s2053_s23 = scalar_lea.vmem %s2126_s4, %s1690_s21 }
  0x11   : > { %v201_v4 = vld [vmem:[%s1791_s24 + $0x8] sm:$0xf]  ;;  %v202_v5 = vld [vmem:[%s1791_s24 + $0xc] sm:$0xf]  ;;  %v213_v6 = vld [vmem:[%s1791_s24 + $0x10] sm:$0x7]  ;;  %1215 = vperm.xlu1 %1703, %v1196_v55  }
  0x12   : > { %v206_v7 = vmax.bf16 %v1732_v3, %v201_v4  ;;  %v207_v8 = vmax.bf16 %v1732_v3, %v202_v5  ;;  %v214_v9 = vmax.bf16 %v1732_v3, %v213_v6  ;;  %v199_v10 = vld [vmem:[%s1791_s24] sm:$0xf]  ;;  %v200_v11 = vld [vmem:[%s1791_s24 + $0x4] sm:$0xf]  ;;  %v513_v45 = vld [vmem:[%s1791_s24 + $0x8] sm:$0xf] }
  0x13   : > { %v204_v12 = vmax.bf16 %v1732_v3, %v199_v10  ;;  %v205_v13 = vmax.bf16 %v1732_v3, %v200_v11  ;;  %v413_v17 = vld [vmem:[%s1791_s24] sm:$0xe]  ;;  %v512_v44 = vld [vmem:[%s1791_s24 + $0x4] sm:$0xf]  ;;  %v514_v46 = vld [vmem:[%s1791_s24 + $0xc] sm:$0xf]  ;;  %v1873_v53 = vmax.bf16 %v1732_v3, %v513_v45  ;;  %1220 = vperm.xlu0 %1702, %v1197_v62  }
  0x14   : > { %v1804_v14 = vcombine.low %v206_v7, %v207_v8  ;;  %v1806_v15 = vcombine.low %v214_v9, %v214_v9  ;;  %v414_v25 = vmax.bf16 %v1732_v3, %v413_v17  ;;  %v511_v43 = vld [vmem:[%s1791_s24] sm:$0x8]  ;;  %v1870_v52 = vmax.bf16 %v1732_v3, %v512_v44  ;;  %v515_v60 = vld [vmem:[%s1791_s24 + $0x10] sm:$0xf]  ;;  %v631_v61 = vld [vmem:[%s1791_s24 + $0x14] sm:$0x3] }
  0x15   : > { %v1808_v16 = vcombine.low %v204_v12, %v205_v13  ;;  %v517_v49 = vmax.bf16 %v1732_v3, %v511_v43  ;;  %v1876_v54 = vmax.bf16 %v1732_v3, %v514_v46  ;;  %v1907_v0 = vmax.bf16 %v1732_v3, %v515_v60  ;;  %v203_v8 = vld [vmem:[%s1791_s24 + $0x10] sm:$0x3]  ;;  %v1719_v46 = vld [vmem:[%s2123_s1 + $0x80] sm:$0xff]   ;;  %v945_v55 = vld [vmem:[%s1791_s24 + $0xc] sm:$0xf] }
  0x16   : > { %v242_v18 = vshll.u32 %v1804_v14, 16  ;;  %v246_v19 = vshrl.u32 %v1804_v14, 16  ;;  %v250_v20 = vshll.u32 %v1806_v15, 16  ;;  %v1411_v32 = vcombine.low %v414_v25, %v205_v13  ;;  %1229 = vst.msk [vmem:[%s2053_s23] sm:$0xf] %vm1228_vm8, %v1732_v3 }
  0x17   : > { %v235_v21 = vshrl.u32 %v1808_v16, 16  ;;  %v237_v22 = vshll.u32 %v1808_v16, 16  ;;  %v254_v34 = vshrl.u32 %v1806_v15, 16  ;;  %v425_v38 = vrot.slane %v1804_v14, 1  ;;  %1236 = vst.msk [vmem:[%s2053_s23 + $0x18] sm:$0x1] %vm1235_vm9, %v1732_v3 }
  0x18   : > { %v244_v23 = vrot.slane %v242_v18, 1  ;;  %v252_v24 = vrot.slane %v250_v20, 1  ;;  %v424_v37 = vrot.slane %v1411_v32, 1  ;;  %v427_v50 = vrot.slane %v1806_v15, 1  ;;  %1230 = vst.msk [vmem:[%s2053_s23 + $0x4] sm:$0xf] %vm1228_vm8, %v1732_v3 }
  0x19   : > { %v239_v26 = vrot.slane %v237_v22, 1  ;;  %v1421_v58 = vcombine.low %v517_v49, %v1870_v52  ;;  %v1889_v59 = vcombine.low %v1873_v53, %v1876_v54  ;;  %v1910_v2 = vmax.bf16 %v1732_v3, %v631_v61  ;;  %v1721_v49 = vld [vmem:[%s2123_s1 + $0x88] sm:$0xff]   ;;  %1231 = vst.msk [vmem:[%s2053_s23 + $0x8] sm:$0xf] %vm1228_vm8, %v1732_v3  ;;  %1232 = vst.msk [vmem:[%s2053_s23 + $0xc] sm:$0xf] %vm1228_vm8, %v1732_v3 }
  0x1a   : > { %v248_v27 = vor.u32 %v246_v19, %v244_v23  ;;  %v256_v39 = vor.u32 %v254_v34, %v252_v24  ;;  %v426_v41 = vsel %vm423_vm3, %v424_v37, %v425_v38  ;;  %v428_v57 = vsel %vm423_vm3, %v425_v38, %v427_v50  ;;  %v840_v34 = vld [vmem:[%s1791_s24 + $0x4] sm:$0xc]  ;;  %1233 = vst.msk [vmem:[%s2053_s23 + $0x10] sm:$0xf] %vm1228_vm8, %v1732_v3 }
  0x1b   : > { %v240_v29 = vor.u32 %v239_v26, %v235_v21  ;;  %v643_v4 = vshrl.u32 %v1421_v58, 16  ;;  %v646_v5 = vshll.u32 %v1421_v58, 16  ;;  %v651_v6 = vshrl.u32 %v1889_v59, 16  ;;  %v516_v21 = vld [vmem:[%s1791_s24 + $0x14] sm:$0x1] }
  0x1c   : > { %v253_v30 = vsel %vm233_vm1, %v248_v27, %v252_v24  ;;  %v654_v7 = vshll.u32 %v1889_v59, 16  ;;  %v1433_v9 = vcombine.low %v1907_v0, %v1910_v2  ;;  %v208_v15 = vmax.bf16 %v1732_v3, %v203_v8  ;;  %1234 = vst.msk [vmem:[%s2053_s23 + $0x14] sm:$0xf] %vm1228_vm8, %v1732_v3 }
  0x1d   : > { %1551 = vmatmul.mubr.msk.bf16.vlgmr.msra.gmra.mrb[0].mxu1 %vm269_vm2, %v253_v30  ;;  %v245_v33 = vsel %vm233_vm1, %v240_v29, %v244_v23  ;;  %v645_v10 = vrot.slane %v643_v4, 3  ;;  %v648_v11 = vrot.slane %v646_v5, 4  ;;  %v653_v12 = vrot.slane %v651_v6, 3  ;;  %v1717_v29 = vld [vmem:[%s2123_s1 + $0x68] sm:$0xff]   ;;  %v947_v5 = vld [vmem:[%s1791_s24 + $0x14] sm:$0xf] }
  0x1e   : > { %1559 = vmatpush3.bf16.msra.mxu1 %v1706_v28  ;;  %1547 = vmatmul.mubr.msk.bf16.vlgmr.msra.gmra.mrb[0].mxu0 %vm269_vm2, %v245_v33  ;;  %v656_v13 = vrot.slane %v654_v7, 4  ;;  %v660_v18 = vshrl.u32 %v1433_v9, 16  ;;  %v663_v19 = vshll.u32 %v1433_v9, 16  ;;  %v1401_v20 = vcombine.low %v208_v15, %v208_v15  ;;  %v948_v6 = vld [vmem:[%s1791_s24 + $0x18] sm:$0x1] }
  0x1f   : > { %1554 = vmatprep.mubr.msk.bf16.mxu1 %vm1731_vm0, %v1730_v1  ;;  %1560 = vmatprep.subr.bf16.mxu1 %v1730_v1  ;;  %v544_v25 = vrot.slane %v1421_v58, 3  ;;  %v545_v26 = vrot.slane %v1889_v59, 3  ;;  %v522_v27 = vmax.bf16 %v1732_v3, %v516_v21  ;;  %v842_v37 = vmax.bf16 %v1732_v3, %v840_v34 }
  0x20   : > { %1575 = vmatpush3.bf16.msra.mxu0 %v1708_v31  ;;  %1578 = vmatprep.mubr.msk.bf16.mxu0 %vm1731_vm0, %v1730_v1  ;;  %v657_v17 = vor.u32 %v656_v13, %v653_v12  ;;  %v662_v23 = vrot.slane %v660_v18, 3  ;;  %v665_v24 = vrot.slane %v663_v19, 4  ;;  %v1714_v31 = vld [vmem:[%s2123_s1 + $0x50] sm:$0xff]   ;;  %v951_v60 = vmax.bf16 %v1732_v3, %v945_v55 }
  0x21   : > { %1576 = vmatprep.subr.bf16.mxu0 %v1730_v1  ;;  %v546_v30 = vsel %vm543_vm5, %v544_v25, %v545_v26  ;;  %v1423_v32 = vcombine.low %v1907_v0, %v522_v27  ;;  %v1455_v40 = vcombine.low %v842_v37, %v1873_v53  ;;  %v953_v8 = vmax.bf16 %v1732_v3, %v947_v5 }
  0x22   : > { %1561 = vmatpush3.bf16.msra.mxu1 %v1707_v35  ;;  %v666_v28 = vor.u32 %v665_v24, %v662_v23  ;;  %v954_v9 = vmax.bf16 %v1732_v3, %v948_v6  ;;  %vm1322_vm1 = vsmask.f32 1280 }
  0x23   : > { %1590 = vmatprep.subr.bf16.mxu1 %v1730_v1  ;;  %v547_v35 = vrot.slane %v1423_v32, 3 }
  0x24   : > { %1577 = vmatpush3.bf16.msra.mxu0 %v1709_v36  ;;  %v667_v33 = vsel %vm641_vm4, %v657_v17, %v666_v28  ;;  %v1716_v36 = vld [vmem:[%s2123_s1 + $0x58] sm:$0xff]   ;;  %v1468_v18 = vcombine.low %v953_v8, %v954_v9 }
  0x25   : > { %1555 = vmatmul.mubr.msk.bf16.gmra.mrb[4].mxu1 %vm269_vm2, %v256_v39  ;;  %1606 = vmatprep.subr.bf16.mxu0 %v1730_v1  ;;  %v548_v38 = vsel %vm543_vm5, %v545_v26, %v547_v35  ;;  %v1444_v39 = vcombine.low %v1876_v54, %v1907_v0  ;;  %v944_v54 = vld [vmem:[%s1791_s24 + $0x8] sm:$0xf] }
  0x26   : > { %1562 = vmatprep.mubr.msk.bf16.mxu1 %vm1731_vm0, %v1730_v1  ;;  %v950_v59 = vmax.bf16 %v1732_v3, %v944_v54  ;;  %v994_v25 = vshrl.u32 %v1468_v18, 16  ;;  %v997_v26 = vshll.u32 %v1468_v18, 16 }
  0x27   : > { %1579 = vmatmul.mubr.msk.bf16.vlgmr.msra.gmra.mrb[4].mxu0 %vm269_vm2, %v426_v41  ;;  %v841_v41 = vld [vmem:[%s1791_s24 + $0x14] sm:$0xf]  ;;  %v857_v43 = vrot.slane %v1444_v39, 2 }
  0x28   : > { %1607 = vmatpush3.bf16.msra.mxu0 %v1711_v42  ;;  %1582 = vmatprep.mubr.msk.bf16.mxu0 %vm1731_vm0, %v1730_v1  ;;  %v856_v42 = vrot.slane %v1455_v40, 2  ;;  %v843_v44 = vmax.bf16 %v1732_v3, %v841_v41 }
  0x29   : > { %1608 = vmatprep.subr.bf16.mxu0 %v1730_v1 }
  0x2a   : > { %v858_v45 = vsel %vm855_vm6, %v856_v42, %v857_v43  ;;  %v1456_v47 = vcombine.low %v843_v44, %v843_v44 }
  0x2c   : > { %1609 = vmatpush3.bf16.msra.mxu0 %v1713_v51  ;;  %v859_v48 = vrot.slane %v1456_v47, 2  ;;  %v1718_v51 = vld [vmem:[%s2123_s1 + $0x70] sm:$0xff]  }
  0x2d   : > { %1563 = vmatmul.mubr.msk.bf16.vlgmr.msra.gmra.mrb[8].mxu1 %vm269_vm2, %v1808_v16  ;;  %1638 = vmatprep.subr.bf16.mxu0 %v1730_v1  ;;  %v649_v16 = vor.u32 %v648_v11, %v645_v10 }
  0x2e   : > { %1591 = vmatpush3.bf16.msra.mxu1 %v1710_v56  ;;  %1566 = vmatprep.mubr.msk.bf16.mxu1 %vm1731_vm0, %v1730_v1  ;;  %v946_v56 = vld [vmem:[%s1791_s24 + $0x10] sm:$0xf]  ;;  %v860_v58 = vsel %vm855_vm6, %v857_v43, %v859_v48 }
  0x2f   : > { %1583 = vmatmul.mubr.msk.bf16.gmra.mrb[8].mxu0 %vm269_vm2, %v428_v57  ;;  %1592 = vmatprep.subr.bf16.mxu1 %v1730_v1  ;;  %v658_v22 = vsel %vm641_vm4, %v649_v16, %v657_v17  ;;  %v943_v57 = vld [vmem:[%s1791_s24 + $0x4] sm:$0xc]  ;;  %v952_v61 = vmax.bf16 %v1732_v3, %v946_v56  ;;  %v1445_v17 = vcombine.low %v1910_v2, %v1910_v2  ;;  %v1097_v2 = vrot.slane %v1468_v18, 3 }
  0x30   : > { %1586 = vmatprep.mubr.msk.bf16.mxu0 %vm1731_vm0, %v1730_v1  ;;  %v949_v62 = vmax.bf16 %v1732_v3, %v943_v57 }
  0x31   : > { %v1467_v0 = vcombine.low %v951_v60, %v952_v61 }
  0x32   : > { %1593 = vmatpush3.bf16.msra.mxu1 %v1712_v63  ;;  %v1466_v4 = vcombine.low %v949_v62, %v950_v59 }
  0x33   : > { %1622 = vmatprep.subr.bf16.mxu1 %v1730_v1  ;;  %v985_v12 = vshrl.u32 %v1467_v0, 16  ;;  %v988_v13 = vshll.u32 %v1467_v0, 16  ;;  %v1095_v16 = vrot.slane %v1467_v0, 3 }
  0x34   : > { %v977_v10 = vshrl.u32 %v1466_v4, 16  ;;  %v980_v11 = vshll.u32 %v1466_v4, 16 }
  0x35   : > { %1567 = vmatmul.mubr.msk.bf16.gmra.mrb[12].mxu1 %vm269_vm2, %v1804_v14  ;;  %v1715_v14 = vld [vmem:[%s2123_s1 + $0x60] sm:$0xff]   ;;  %v987_v21 = vrot.slane %v985_v12, 2 }
  0x36   : > { %1570 = vmatprep.mubr.msk.bf16.mxu1 %vm1731_vm0, %v1730_v1  ;;  %v979_v19 = vrot.slane %v977_v10, 2 }
  0x37   : > { %1587 = vmatmul.mubr.msk.bf16.gmra.mrb[12].mxu0 %vm269_vm2, %v427_v50  ;;  %v1443_v50 = vcombine.low %v1870_v52, %v1873_v53  ;;  %v1084_v52 = vld [vmem:[%s1791_s24 + $0x4] sm:$0x8]  ;;  %v1720_v53 = vld [vmem:[%s2123_s1 + $0x78] sm:$0xff]  }
  0x38   : > { %1610 = vmatprep.mubr.msk.bf16.mxu0 %vm1731_vm0, %v1730_v1  ;;  %v1085_v63 = vmax.bf16 %v1732_v3, %v1084_v52 }
  0x3a   : > { %v1478_v7 = vcombine.low %v1085_v63, %v950_v59 }
  0x3c   : > { %v1094_v15 = vrot.slane %v1478_v7, 3 }
  0x3d   : > { %1571 = vmatmul.mubr.msk.bf16.gmra.mrb[16].mxu1 %vm269_vm2, %v1401_v20  ;;  %v982_v20 = vrot.slane %v980_v11, 3 }
  0x3e   : > { %1594 = vmatprep.mubr.msk.bf16.mxu1 %vm1731_vm0, %v1730_v1 }
  0x3f   : > { %1611 = vmatmul.mubr.msk.bf16.vlgmr.msra.gmra.mrb[16].mxu0 %vm269_vm2, %v658_v22  ;;  %v990_v22 = vrot.slane %v988_v13, 3  ;;  %v983_v23 = vor.u32 %v982_v20, %v979_v19 }
  0x40   : > { %1639 = vmatpush3.bf16.msra.mxu0 %v1715_v14  ;;  %1614 = vmatprep.mubr.msk.bf16.mxu0 %vm1731_vm0, %v1730_v1  ;;  %v1096_v14 = vsel %vm543_vm5, %v1094_v15, %v1095_v16 }
  0x41   : > { %1640 = vmatprep.subr.bf16.mxu0 %v1730_v1  ;;  %v991_v24 = vor.u32 %v990_v22, %v987_v21 }
  0x43   : > { %v992_v27 = vsel %vm975_vm7, %v983_v23, %v991_v24 }
  0x44   : > { %1641 = vmatpush3.bf16.msra.mxu0 %v1717_v29  ;;  %v999_v29 = vrot.slane %v997_v26, 3 }
  0x45   : > { %1595 = vmatmul.mubr.msk.bf16.vlgmr.msra.gmra.mrb[20].mxu1 %vm269_vm2, %v546_v30  ;;  %1670 = vmatprep.subr.bf16.mxu0 %v1730_v1  ;;  %v1098_v30 = vsel %vm543_vm5, %v1095_v16, %v1097_v2 }
  0x46   : > { %1623 = vmatpush3.bf16.msra.mxu1 %v1714_v31  ;;  %1598 = vmatprep.mubr.msk.bf16.mxu1 %vm1731_vm0, %v1730_v1 }
  0x47   : > { %1615 = vmatmul.mubr.msk.bf16.gmra.mrb[20].mxu0 %vm269_vm2, %v667_v33  ;;  %1624 = vmatprep.subr.bf16.mxu1 %v1730_v1 }
  0x48   : > { %1618 = vmatprep.mubr.msk.bf16.mxu0 %vm1731_vm0, %v1730_v1 }
  0x4a   : > { %1625 = vmatpush3.bf16.msra.mxu1 %v1716_v36 }
  0x4b   : > { %1654 = vmatprep.subr.bf16.mxu1 %v1730_v1 }
  0x4d   : > { %1599 = vmatmul.mubr.msk.bf16.gmra.mrb[24].mxu1 %vm269_vm2, %v548_v38 }
  0x4e   : > { %1602 = vmatprep.mubr.msk.bf16.mxu1 %vm1731_vm0, %v1730_v1 }
  0x4f   : > { %1619 = vmatmul.mubr.msk.bf16.gmra.mrb[24].mxu0 %vm269_vm2, %v666_v28  ;;  %v996_v28 = vrot.slane %v994_v25, 2 }
  0x50   : > { %1642 = vmatprep.mubr.msk.bf16.mxu0 %vm1731_vm0, %v1730_v1 }
  0x51   : > { %v1000_v31 = vor.u32 %v999_v29, %v996_v28 }
  0x53   : > { %v1001_v32 = vsel %vm975_vm7, %v991_v24, %v1000_v31 }
  0x55   : > { %1603 = vmatmul.mubr.msk.bf16.gmra.mrb[28].mxu1 %vm269_vm2, %v547_v35 }
  0x56   : > { %1626 = vmatprep.mubr.msk.bf16.mxu1 %vm1731_vm0, %v1730_v1 }
  0x57   : > { %1643 = vmatmul.mubr.msk.bf16.vlgmr.msra.gmra.mrb[28].mxu0 %vm269_vm2, %v858_v45 }
  0x58   : > { %1671 = vmatpush3.bf16.msra.mxu0 %v1719_v46  ;;  %1646 = vmatprep.mubr.msk.bf16.mxu0 %vm1731_vm0, %v1730_v1 }
  0x59   : > { %1672 = vmatprep.subr.bf16.mxu0 %v1730_v1 }
  0x5c   : > { %1673 = vmatpush3.bf16.msra.mxu0 %v1721_v49 }
  0x5d   : > { %1627 = vmatmul.mubr.msk.bf16.vlgmr.msra.gmra.mrb[32].mxu1 %vm269_vm2, %v1443_v50 }
  0x5e   : > { %1655 = vmatpush3.bf16.msra.mxu1 %v1718_v51  ;;  %1630 = vmatprep.mubr.msk.bf16.mxu1 %vm1731_vm0, %v1730_v1 }
  0x5f   : > { %1647 = vmatmul.mubr.msk.bf16.gmra.mrb[32].mxu0 %vm269_vm2, %v860_v58  ;;  %1656 = vmatprep.subr.bf16.mxu1 %v1730_v1 }
  0x60   : > { %1650 = vmatprep.mubr.msk.bf16.mxu0 %vm1731_vm0, %v1730_v1 }
  0x62   : > { %1657 = vmatpush3.bf16.msra.mxu1 %v1720_v53 }
  0x65   : > { %1631 = vmatmul.mubr.msk.bf16.gmra.mrb[36].mxu1 %vm269_vm2, %v1444_v39 }
  0x66   : > { %1634 = vmatprep.mubr.msk.bf16.mxu1 %vm1731_vm0, %v1730_v1 }
  0x67   : > { %1651 = vmatmul.mubr.msk.bf16.gmra.mrb[36].mxu0 %vm269_vm2, %v859_v48 }
  0x68   : > { %1674 = vmatprep.mubr.msk.bf16.mxu0 %vm1731_vm0, %v1730_v1 }
  0x6d   : > { %1635 = vmatmul.mubr.msk.bf16.gmra.mrb[40].mxu1 %vm269_vm2, %v1445_v17 }
  0x6e   : > { %1658 = vmatprep.mubr.msk.bf16.mxu1 %vm1731_vm0, %v1730_v1 }
  0x6f   : > { %1675 = vmatmul.mubr.msk.bf16.vlgmr.msra.gmra.mrb[40].mxu0 %vm269_vm2, %v1096_v14 }
  0x70   : > { %1678 = vmatprep.mubr.msk.bf16.mxu0 %vm1731_vm0, %v1730_v1 }
  0x75   : > { %1659 = vmatmul.mubr.msk.bf16.vlgmr.msra.gmra.mrb[44].mxu1 %vm269_vm2, %v992_v27 }
  0x76   : > { %1662 = vmatprep.mubr.msk.bf16.mxu1 %vm1731_vm0, %v1730_v1 }
  0x77   : > { %1679 = vmatmul.mubr.msk.bf16.gmra.mrb[44].mxu0 %vm269_vm2, %v1098_v30 }
  0x78   : > { %1682 = vmatprep.mubr.msk.bf16.mxu0 %vm1731_vm0, %v1730_v1 }
  0x7d   : > { %1663 = vmatmul.mubr.msk.bf16.gmra.mrb[48].mxu1 %vm269_vm2, %v1001_v32 }
  0x7e   : > { %1666 = vmatprep.mubr.msk.bf16.mxu1 %vm1731_vm0, %v1730_v1  ;;  %vm1321_vm0 = vcmask 254976  }
  0x7f   : > { %1683 = vmatmul.mubr.msk.bf16.gmra.mrb[48].mxu0 %vm269_vm2, %v1097_v2 }
  0x85   : > { %1667 = vmatmul.mubr.msk.bf16.gmra.mrb[52].mxu1 %vm269_vm2, %v1000_v31  ;;  %vm1323_vm2 = vmand %vm1321_vm0, %vm1322_vm1 }
  0xf0   : > { %v321_v1 = vpop.f32.mrb[0].mxu1 }
  0xf1   : > { %v1552_v33 = vpop.f32.mrb[1].mxu1  ;;  %v313_v34 = vpop.f32.mrb[0].mxu0 }
  0xf2   : > { %v324_v35 = vpop.f32.mrb[2].mxu1  ;;  %v1548_v36 = vpop.f32.mrb[1].mxu0 }
  0xf3   : > { %v1553_v37 = vpop.f32.mrb[3].mxu1  ;;  %v316_v38 = vpop.f32.mrb[2].mxu0 }
  0xf4   : > { %v1549_v39 = vpop.f32.mrb[3].mxu0 }
  0xf8   : > { %v329_v40 = vpop.f32.mrb[4].mxu1 }
  0xf9   : > { %v1556_v41 = vpop.f32.mrb[5].mxu1 }
  0xfa   : > { %v332_v42 = vpop.f32.mrb[6].mxu1  ;;  %v484_v43 = vpop.f32.mrb[4].mxu0 }
  0xfb   : > { %v1557_v44 = vpop.f32.mrb[7].mxu1  ;;  %v1580_v45 = vpop.f32.mrb[5].mxu0 }
  0xfc   : > { %v487_v46 = vpop.f32.mrb[6].mxu0 }
  0xfd   : > { %v1581_v47 = vpop.f32.mrb[7].mxu0 }
 0x100   : > { %v391_v48 = vpop.f32.mrb[8].mxu1 }
 0x101   : > { %v392_v49 = vadd.f32 %v391_v48, %v313_v34  ;;  %v1564_v50 = vpop.f32.mrb[9].mxu1 }
 0x102   : > { %v394_v3 = vpop.f32.mrb[10].mxu1  ;;  %v492_v51 = vpop.f32.mrb[8].mxu0 }
 0x103   : > { %v395_v54 = vadd.f32 %v394_v3, %v316_v38  ;;  %v1565_v55 = vpop.f32.mrb[11].mxu1  ;;  %v1584_v56 = vpop.f32.mrb[9].mxu0  ;;  %v506_v57 = vadd.f32 %v484_v43, %v392_v49 }
 0x104   : > { %v495_v58 = vpop.f32.mrb[10].mxu0 }
 0x105   : > { %v1585_v59 = vpop.f32.mrb[11].mxu0  ;;  %v507_v52 = vadd.f32 %v487_v46, %v395_v54 }
 0x108   : > { %v399_v53 = vpop.f32.mrb[12].mxu1 }
 0x109   : > { %v400_v60 = vadd.f32 %v399_v53, %v321_v1  ;;  %v1568_v61 = vpop.f32.mrb[13].mxu1 }
 0x10a   : > { %v402_v62 = vpop.f32.mrb[14].mxu1  ;;  %v500_v63 = vpop.f32.mrb[12].mxu0 }
 0x10b   : > { %v403_v0 = vadd.f32 %v402_v62, %v324_v35  ;;  %v1569_v4 = vpop.f32.mrb[15].mxu1  ;;  %v1588_v5 = vpop.f32.mrb[13].mxu0  ;;  %v508_v6 = vadd.f32 %v492_v51, %v400_v60 }
 0x10c   : > { %v503_v7 = vpop.f32.mrb[14].mxu0 }
 0x10d   : > { %v1589_v8 = vpop.f32.mrb[15].mxu0  ;;  %v509_v9 = vadd.f32 %v495_v58, %v403_v0 }
 0x110   : > { %v407_v10 = vpop.f32.mrb[16].mxu1 }
 0x111   : > { %v408_v11 = vadd.f32 %v407_v10, %v329_v40  ;;  %v1572_v12 = vpop.f32.mrb[17].mxu1 }
 0x112   : > { %v410_v13 = vpop.f32.mrb[18].mxu1  ;;  %v723_v15 = vpop.f32.mrb[16].mxu0 }
 0x113   : > { %v1573_v16 = vpop.f32.mrb[19].mxu1  ;;  %v1612_v17 = vpop.f32.mrb[17].mxu0  ;;  %v510_v18 = vadd.f32 %v500_v63, %v408_v11 }
 0x114   : > { %v726_v19 = vpop.f32.mrb[18].mxu0 }
 0x115   : > { %v1613_v20 = vpop.f32.mrb[19].mxu0 }
 0x118   : > { %v604_v21 = vpop.f32.mrb[20].mxu1 }
 0x119   : > { %v626_v22 = vadd.f32 %v604_v21, %v506_v57  ;;  %v1596_v14 = vpop.f32.mrb[21].mxu1 }
 0x11a   : > { %v607_v23 = vpop.f32.mrb[22].mxu1  ;;  %v731_v24 = vpop.f32.mrb[20].mxu0 }
 0x11b   : > { %v627_v25 = vadd.f32 %v607_v23, %v507_v52  ;;  %v1597_v26 = vpop.f32.mrb[23].mxu1  ;;  %v1616_v2 = vpop.f32.mrb[21].mxu0  ;;  %v745_v27 = vadd.f32 %v723_v15, %v626_v22 }
 0x11c   : > { %v734_v28 = vpop.f32.mrb[22].mxu0 }
 0x11d   : > { %v1617_v29 = vpop.f32.mrb[23].mxu0  ;;  %v746_v30 = vadd.f32 %v726_v19, %v627_v25  ;;  %v1201_v25 = vpop.permute.xlu0 %1200 }
 0x120   : > { %v612_v31 = vpop.f32.mrb[24].mxu1 }
 0x121   : > { %v628_v32 = vadd.f32 %v612_v31, %v508_v6  ;;  %v1600_v1 = vpop.f32.mrb[25].mxu1 }
 0x122   : > { %v615_v33 = vpop.f32.mrb[26].mxu1  ;;  %v739_v34 = vpop.f32.mrb[24].mxu0 }
 0x123   : > { %v629_v35 = vadd.f32 %v615_v33, %v509_v9  ;;  %v1601_v36 = vpop.f32.mrb[27].mxu1  ;;  %v1620_v37 = vpop.f32.mrb[25].mxu0  ;;  %v747_v38 = vadd.f32 %v731_v24, %v628_v32 }
 0x124   : > { %v742_v39 = vpop.f32.mrb[26].mxu0  ;;  %v1206_v37 = vpop.permute.xlu0 %1205 }
 0x125   : > { %v1621_v40 = vpop.f32.mrb[27].mxu0  ;;  %v748_v41 = vadd.f32 %v734_v28, %v629_v35  ;;  %v2078_v28 = vld [vmem:[%s2124_s2] ss:$0 sm:$0xff] }
 0x128   : > { %v620_v42 = vpop.f32.mrb[28].mxu1 }
 0x129   : > { %v630_v43 = vadd.f32 %v620_v42, %v510_v18  ;;  %v1604_v44 = vpop.f32.mrb[29].mxu1 }
 0x12a   : > { %v623_v45 = vpop.f32.mrb[30].mxu1  ;;  %v916_v46 = vpop.f32.mrb[28].mxu0 }
 0x12b   : > { %v1605_v47 = vpop.f32.mrb[31].mxu1  ;;  %v1644_v48 = vpop.f32.mrb[29].mxu0  ;;  %v749_v49 = vadd.f32 %v739_v34, %v630_v43 }
 0x12c   : > { %v919_v50 = vpop.f32.mrb[30].mxu0  ;;  %v1211_v45 = vpop.permute.xlu1 %1210 }
 0x12d   : > { %v1645_v3 = vpop.f32.mrb[31].mxu0 }
 0x130   : > { %v813_v51 = vpop.f32.mrb[32].mxu1 }
 0x131   : > { %v835_v54 = vadd.f32 %v813_v51, %v745_v27  ;;  %v1628_v55 = vpop.f32.mrb[33].mxu1 }
 0x132   : > { %v816_v56 = vpop.f32.mrb[34].mxu1  ;;  %v924_v57 = vpop.f32.mrb[32].mxu0 }
 0x133   : > { %v836_v58 = vadd.f32 %v816_v56, %v746_v30  ;;  %v1629_v59 = vpop.f32.mrb[35].mxu1  ;;  %v1648_v52 = vpop.f32.mrb[33].mxu0  ;;  %v938_v53 = vadd.f32 %v916_v46, %v835_v54 }
 0x134   : > { %v927_v60 = vpop.f32.mrb[34].mxu0 }
 0x135   : > { %v1649_v61 = vpop.f32.mrb[35].mxu0  ;;  %v939_v62 = vadd.f32 %v919_v50, %v836_v58  ;;  %v1314_v50 = vld [vmem:[%s2053_s23] sm:$0x8] }
 0x138   : > { %v821_v63 = vpop.f32.mrb[36].mxu1 }
 0x139   : > { %v837_v0 = vadd.f32 %v821_v63, %v747_v38  ;;  %v1632_v4 = vpop.f32.mrb[37].mxu1 }
 0x13a   : > { %v824_v5 = vpop.f32.mrb[38].mxu1  ;;  %v932_v6 = vpop.f32.mrb[36].mxu0 }
 0x13b   : > { %v838_v7 = vadd.f32 %v824_v5, %v748_v41  ;;  %v1633_v8 = vpop.f32.mrb[39].mxu1  ;;  %v1652_v9 = vpop.f32.mrb[37].mxu0  ;;  %v940_v10 = vadd.f32 %v924_v57, %v837_v0 }
 0x13c   : > { %v935_v11 = vpop.f32.mrb[38].mxu0 }
 0x13d   : > { %v1653_v12 = vpop.f32.mrb[39].mxu0  ;;  %v941_v13 = vadd.f32 %v927_v60, %v838_v7  ;;  %v1216_v7 = vpop.permute.xlu1 %1215 }
 0x140   : > { %v829_v15 = vpop.f32.mrb[40].mxu1 }
 0x141   : > { %v839_v16 = vadd.f32 %v829_v15, %v749_v49  ;;  %v1636_v17 = vpop.f32.mrb[41].mxu1 }
 0x142   : > { %v832_v18 = vpop.f32.mrb[42].mxu1  ;;  %v1154_v19 = vpop.f32.mrb[40].mxu0 }
 0x143   : > { %v1637_v20 = vpop.f32.mrb[43].mxu1  ;;  %v1676_v21 = vpop.f32.mrb[41].mxu0  ;;  %v942_v22 = vadd.f32 %v932_v6, %v839_v16 }
 0x144   : > { %v1157_v14 = vpop.f32.mrb[42].mxu0 }
 0x145   : > { %v1677_v23 = vpop.f32.mrb[43].mxu0 }
 0x148   : > { %v1057_v24 = vpop.f32.mrb[44].mxu1 }
 0x149   : > { %v1079_v26 = vadd.f32 %v1057_v24, %v938_v53  ;;  %v1660_v2 = vpop.f32.mrb[45].mxu1 }
 0x14a   : > { %v1060_v27 = vpop.f32.mrb[46].mxu1  ;;  %v1162_v29 = vpop.f32.mrb[44].mxu0 }
 0x14b   : > { %v1176_v30 = vadd.f32 %v1154_v19, %v1079_v26  ;;  %v1080_v31 = vadd.f32 %v1060_v27, %v939_v62  ;;  %v1661_v32 = vpop.f32.mrb[47].mxu1  ;;  %v1680_v1 = vpop.f32.mrb[45].mxu0 }
 0x14c   : > { %v1165_v33 = vpop.f32.mrb[46].mxu0 }
 0x14d   : > { %v1177_v34 = vadd.f32 %v1157_v14, %v1080_v31  ;;  %v1188_v35 = vadd.f32 %v2078_v28, %v1176_v30  ;;  %v1681_v36 = vpop.f32.mrb[47].mxu0 }
 0x14f   : > { %v1223_v38 = vmul.f32 %v1201_v25, %v1188_v35  ;;  %v1189_v39 = vadd.f32 %v2078_v28, %v1177_v34 }
 0x150   : > { %v1065_v40 = vpop.f32.mrb[48].mxu1 }
 0x151   : > { %v1492_v41 = vpack.c.bf16 %v1223_v38, %v1223_v38  ;;  %v1224_v42 = vmul.f32 %v1206_v37, %v1189_v39  ;;  %v1081_v43 = vadd.f32 %v1065_v40, %v940_v10  ;;  %v1664_v44 = vpop.f32.mrb[49].mxu1 }
 0x152   : > { %v1068_v46 = vpop.f32.mrb[50].mxu1  ;;  %v1170_v47 = vpop.f32.mrb[48].mxu0 }
 0x153   : > { %v1257_v48 = vshll.u32 %v1492_v41, 16  ;;  %v1260_v49 = vshrl.u32 %v1492_v41, 16  ;;  %v1493_v3 = vpack.c.bf16 %v1224_v42, %v1224_v42  ;;  %v1178_v51 = vadd.f32 %v1162_v29, %v1081_v43  ;;  %v1665_v54 = vpop.f32.mrb[51].mxu1  ;;  %v1684_v55 = vpop.f32.mrb[49].mxu0 }
 0x154   : > { %v1082_v57 = vadd.f32 %v1068_v46, %v941_v13  ;;  %v1173_v58 = vpop.f32.mrb[50].mxu0  ;;  %v1221_v29 = vpop.permute.xlu0 %1220  ;;  %v1324_v46 = vld [vmem:[%s2053_s23 + $0x14] sm:$0x3] }
 0x155   : > { %v1259_v59 = vrot.slane %v1257_v48, 5  ;;  %v1262_v52 = vrot.slane %v1260_v49, 4  ;;  %v1266_v53 = vshll.u32 %v1493_v3, 16  ;;  %v1270_v60 = vshrl.u32 %v1493_v3, 16  ;;  %v1685_v61 = vpop.f32.mrb[51].mxu0 }
 0x156   : > { %v1179_v62 = vadd.f32 %v1165_v33, %v1082_v57  ;;  %v1190_v63 = vadd.f32 %v2078_v28, %v1178_v51 }
 0x157   : > { %v1263_v0 = vor.u32 %v1262_v52, %v1259_v59  ;;  %v1315_v4 = vsel %vm2085_vm12, %v1259_v59, %v1314_v50  ;;  %v1268_v5 = vrot.slane %v1266_v53, 5  ;;  %v1272_v6 = vrot.slane %v1270_v60, 4 }
 0x158   : > { %1316 = vst [vmem:[%s2053_s23] sm:$0x8] %v1315_v4  ;;  %v1225_v9 = vmul.f32 %v1211_v45, %v1190_v63  ;;  %v1191_v10 = vadd.f32 %v2078_v28, %v1179_v62  ;;  %v1073_v11 = vpop.f32.mrb[52].mxu1 }
 0x159   : > { %v1264_v12 = vrot.slane %v1263_v0, 4  ;;  %v1273_v13 = vor.u32 %v1272_v6, %v1268_v5  ;;  %v1083_v15 = vadd.f32 %v1073_v11, %v942_v22  ;;  %v1668_v16 = vpop.f32.mrb[53].mxu1 }
 0x15a   : > { %v1494_v17 = vpack.c.bf16 %v1225_v9, %v1225_v9  ;;  %v1226_v18 = vmul.f32 %v1216_v7, %v1191_v10  ;;  %v1076_v19 = vpop.f32.mrb[54].mxu1 }
 0x15b   : > { %v1269_v20 = vsel %vm2095_vm15, %v1264_v12, %v1268_v5  ;;  %v1180_v21 = vadd.f32 %v1170_v47, %v1083_v15  ;;  %v1669_v14 = vpop.f32.mrb[55].mxu1  ;;  %v1274_v26 = vrot.slane %v1273_v13, 4 }
 0x15c   : > { %1317 = vst.msk [vmem:[%s2053_s23 + $0x4] sm:$0xf] %vm1228_vm8, %v1269_v20  ;;  %v1276_v23 = vshll.u32 %v1494_v17, 16  ;;  %v1280_v24 = vshrl.u32 %v1494_v17, 16  ;;  %v1495_v25 = vpack.c.bf16 %v1226_v18, %v1226_v18 }
 0x15d   : > { %v1192_v2 = vadd.f32 %v2078_v28, %v1180_v21 }
 0x15e   : > { %v1278_v27 = vrot.slane %v1276_v23, 5  ;;  %v1282_v22 = vrot.slane %v1280_v24, 4  ;;  %v1286_v30 = vshll.u32 %v1495_v25, 16  ;;  %v1290_v31 = vshrl.u32 %v1495_v25, 16 }
 0x15f   : > { %v1227_v32 = vmul.f32 %v1221_v29, %v1192_v2 }
 0x160   : > { %v1279_v1 = vsel %vm2095_vm15, %v1274_v26, %v1278_v27  ;;  %v1283_v33 = vor.u32 %v1282_v22, %v1278_v27  ;;  %v1288_v34 = vrot.slane %v1286_v30, 5  ;;  %v1292_v35 = vrot.slane %v1290_v31, 4 }
 0x161   : > { %1318 = vst.msk [vmem:[%s2053_s23 + $0x8] sm:$0xf] %vm1228_vm8, %v1279_v1  ;;  %v1496_v36 = vpack.c.bf16 %v1227_v32, %v1227_v32 }
 0x162   : > { %v1284_v37 = vrot.slane %v1283_v33, 4  ;;  %v1293_v28 = vor.u32 %v1292_v35, %v1288_v34 }
 0x163   : > { %v1296_v38 = vshll.u32 %v1496_v36, 16  ;;  %v1300_v39 = vshrl.u32 %v1496_v36, 16 }
 0x164   : > { %v1289_v40 = vsel %vm2095_vm15, %v1284_v37, %v1288_v34  ;;  %v1294_v41 = vrot.slane %v1293_v28, 4 }
 0x165   : > { %1319 = vst.msk [vmem:[%s2053_s23 + $0xc] sm:$0xf] %vm1228_vm8, %v1289_v40  ;;  %v1298_v42 = vrot.slane %v1296_v38, 5  ;;  %v1302_v43 = vrot.slane %v1300_v39, 4 }
 0x167   : > { %v1299_v44 = vsel %vm2095_vm15, %v1294_v41, %v1298_v42  ;;  %v1303_v45 = vor.u32 %v1302_v43, %v1298_v42 }
 0x168   : > { %1320 = vst.msk [vmem:[%s2053_s23 + $0x10] sm:$0xf] %vm1228_vm8, %v1299_v44 }
 0x169   : > { %v1304_v47 = vrot.slane %v1303_v45, 4 }
 0x16b   : > { %v1325_v48 = vsel %vm1323_vm2, %v1304_v47, %v1324_v46 }
 0x16c   : > { %1326 = vst [vmem:[%s2053_s23 + $0x14] sm:$0x3] %v1325_v48 }
 0x16d PF: > { %s14_s15 = sadd.s32 1, %s1728_s15  }
 0x16e   : > { %p11_p4 = scmp.ge.s32.totalorder %s14_s15, 4  }
 0x170   :  { %13 = sbr.rel (!%p11_p4) target bundleno = 1 (0x1), region = 74 }

// kernel: vqvae_forward.15
= control target key start
LH: loop header
LB: loop body
LE: loop exit
PB: predicated region body
PF: predicated region fallthrough
CT: control target
= control target key end

     0   :  { %s1965_s21 = smov 0   ;;  %s2401_s0 = inlined_call_operand.vmem [shape: bf16[2,50,32], index: 0, kind: input, shape index: {}]   ;;  %s2402_s1 = inlined_call_operand.vmem [shape: bf16[9,32,16], index: 1, kind: input, shape index: {}]   ;;  %s2403_s2 = inlined_call_operand.vmem [shape: f32[1,16], index: 2, kind: input, shape index: {}]   ;;  %s2404_s3 = inlined_call_operand.vmem [shape: bf16[16,32], index: 3, kind: input, shape index: {}]   ;;  %s2405_s4 = inlined_call_operand.vmem [shape: f32[1,32], index: 4, kind: input, shape index: {}]   ;;  %s2406_s5 = inlined_call_operand.vmem [shape: f32[36,1], index: 5, kind: input, shape index: {}]   ;;  %s2407_s6 = inlined_call_operand.vmem [shape: bf16[2,50,32], index: 6, kind: output, shape index: {}]  }
   0x1 LB: > { %s1559_s22 = sadd.s32 4294967295, %s1925_s21   ;;  %p1563_p0 = scmp.ge.s32.totalorder %s1925_s21, 1  ;;  %s1925_s21 = sphi %s1965_s21, %s16_s21  }
   0x2   : > { %p212_p1 = scmp.lt.s32.totalorder %s1925_s21, 3 }
   0x4   : > { %p213_p2 = pnand %p1563_p0, %p212_p1 }
   0x5   : > { %v1900_v0 = vld [vmem:[%s2402_s1 + $0x10] sm:$0xff] (!%p213_p2)   ;;  %v1927_v1 = vmov (!%p213_p2), 0.0   ;;  %v1901_v2 = vld [vmem:[%s2402_s1] sm:$0xff] (!%p213_p2)   ;;  %v1902_v3 = vld [vmem:[%s2402_s1 + $0x18] sm:$0xff] (!%p213_p2)   ;;  %vm1928_vm0 = vmmov (!%p213_p2), 0   ;;  %p242_p3 = scmp.lt.s32.totalorder (!%p213_p2), %s1559_s22, 1 }
   0x6   : > { %216 = sbr.rel (%p213_p2) target bundleno = 593 (0x251), region = 44  ;;  %1728 = vmatprep.subr.bf16.mxu0 (!%p213_p2), %v1927_v1  ;;  %1744 = vmatprep.subr.bf16.mxu1 (!%p213_p2), %v1927_v1  ;;  %v1903_v4 = vld [vmem:[%s2402_s1 + $0x8] sm:$0xff] (!%p213_p2)   ;;  %v1929_v5 = vmov (!%p213_p2), 0   ;;  %vm323_vm1 = vcmask (!%p213_p2), 261120   ;;  %v1906_v16 = vld [vmem:[%s2402_s1 + $0x30] sm:$0xff] (!%p213_p2)   ;;  %v1907_v23 = vld [vmem:[%s2402_s1 + $0x38] sm:$0xff] (!%p213_p2)  }
   0x7   : > { %1729 = vmatpush3.bf16.msra.mxu0 (!%p213_p2), %v1900_v0  ;;  %1732 = vmatprep.mubr.msk.bf16.mxu0 (!%p213_p2), %vm1928_vm0, %v1927_v1  ;;  %vm287_vm2 = vsmask.f32 (!%p213_p2), 7424  ;;  %v1904_v26 = vld [vmem:[%s2402_s1 + $0x20] sm:$0xff] (!%p213_p2)   ;;  %v1905_v38 = vld [vmem:[%s2402_s1 + $0x28] sm:$0xff] (!%p213_p2)   ;;  %vm597_vm3 = vcmask (!%p213_p2), 1044480   ;;  %vm477_vm4 = vcmask (!%p213_p2), 1046528  }
   0x8   : > { %1745 = vmatpush3.bf16.msra.mxu1 (!%p213_p2), %v1901_v2  ;;  %1730 = vmatprep.subr.bf16.mxu0 (!%p213_p2), %v1927_v1  ;;  %vm695_vm5 = vsmask.f32 (!%p213_p2), 4352  ;;  %vm1029_vm6 = vsmask.f32 (!%p213_p2), 5376  ;;  %vm909_vm7 = vcmask (!%p213_p2), 1045504   ;;  %vm1270_vm8 = vcmask (!%p213_p2), 130048  }
   0x9   : > { %1746 = vmatprep.subr.bf16.mxu1 (!%p213_p2), %v1927_v1  ;;  %1748 = vmatprep.mubr.msk.bf16.mxu1 (!%p213_p2), %vm1928_vm0, %v1927_v1  ;;  %vm1405_vm9 = vcmask (!%p213_p2), 257024   ;;  %vm1412_vm10 = vcmask (!%p213_p2), 253952   ;;  %vm1383_vm11 = vcmask (!%p213_p2), 1040384   ;;  %vm1488_vm12 = vcmask (!%p213_p2), 257027  }
   0xa   : > { %1898 = vset.pattern.permute.xlu0 (!%p213_p2), %v1929_v5  ;;  %1899 = vset.pattern.permute.xlu1 (!%p213_p2), %v1929_v5  ;;  %vm1489_vm13 = vsmask.f32 (!%p213_p2), 7950  ;;  %vm1430_vm15 = vsmask.f32 (!%p213_p2), 3328 }
   0xb   : > { %1731 = vmatpush3.bf16.msra.mxu0 (!%p213_p2), %v1902_v3  ;;  %vm2361_vm14 = vmand (!%p213_p2), %vm1488_vm12, %vm1489_vm13 }
   0xc   : > { %1747 = vmatpush3.bf16.msra.mxu1 (!%p213_p2), %v1903_v4  ;;  %1760 = vmatprep.subr.bf16.mxu0 (!%p213_p2), %v1927_v1 }
   0xd   : > { %s2413_s22 = smov (!%p242_p3, %s1559_s22), 1  ;;  %1776 = vmatprep.subr.bf16.mxu1 %v1927_v1 }
   0xe   : > { %s1886_s7 = smul.u32 28, %s2413_s22 }
  0x10   : > { %s2004_s10 = scalar_lea.vmem %s2401_s0, %s1886_s7  ;;  %s2323_s14 = scalar_lea.vmem %s2407_s6, %s1886_s7 }
  0x11   : > { %v253_v6 = vld [vmem:[%s2004_s10] sm:$0xf]  ;;  %v254_v7 = vld [vmem:[%s2004_s10 + $0x4] sm:$0xf]  ;;  %v255_v8 = vld [vmem:[%s2004_s10 + $0x8] sm:$0xf] }
  0x12   : > { %v256_v9 = vld [vmem:[%s2004_s10 + $0xc] sm:$0xf]  ;;  %v258_v10 = vmax.bf16 %v1929_v5, %v253_v6  ;;  %v2013_v11 = vmax.bf16 %v1929_v5, %v254_v7  ;;  %v260_v12 = vmax.bf16 %v1929_v5, %v255_v8  ;;  %v267_v13 = vld [vmem:[%s2004_s10 + $0x10] sm:$0x7]  ;;  %v2042_v31 = vld [vmem:[%s2004_s10] sm:$0x8] }
  0x13   : > { %v261_v14 = vmax.bf16 %v1929_v5, %v256_v9  ;;  %v268_v15 = vmax.bf16 %v1929_v5, %v267_v13  ;;  %v257_v30 = vld [vmem:[%s2004_s10 + $0x10] sm:$0x3]  ;;  %v2046_v33 = vld [vmem:[%s2004_s10 + $0x4] sm:$0xf]  ;;  %v2051_v34 = vld [vmem:[%s2004_s10 + $0x8] sm:$0xf]  ;;  %v571_v40 = vmax.bf16 %v1929_v5, %v2042_v31 }
  0x14   : > { %v1570_v17 = vcombine.low %v258_v10, %v2013_v11  ;;  %v2054_v35 = vld [vmem:[%s2004_s10 + $0xc] sm:$0xf]  ;;  %v262_v39 = vmax.bf16 %v1929_v5, %v257_v30  ;;  %v2071_v41 = vmax.bf16 %v1929_v5, %v2046_v33  ;;  %v2075_v42 = vmax.bf16 %v1929_v5, %v2051_v34  ;;  %v467_v47 = vld [vmem:[%s2004_s10] sm:$0xe]  ;;  %v2086_v48 = vld [vmem:[%s2004_s10 + $0x10] sm:$0xf] }
  0x15   : > { %v2023_v18 = vcombine.low %v260_v12, %v261_v14  ;;  %v2026_v21 = vcombine.low %v268_v15, %v268_v15  ;;  %v2079_v43 = vmax.bf16 %v1929_v5, %v2054_v35  ;;  %v999_v45 = vld [vmem:[%s2004_s10 + $0xc] sm:$0xf]  ;;  %v1000_v49 = vld [vmem:[%s2004_s10 + $0x10] sm:$0xf]  ;;  %v570_v52 = vld [vmem:[%s2004_s10 + $0x14] sm:$0x1]  ;;  %v468_v59 = vmax.bf16 %v1929_v5, %v467_v47 }
  0x16   : > { %v289_v19 = vshrl.u32 %v1570_v17, 16  ;;  %v291_v20 = vshll.u32 %v1570_v17, 16  ;;  %1749 = vmatmul.mubr.msk.bf16.vlgmr.msra.gmra.mrb[0].mxu1 %vm323_vm1, %v1570_v17  ;;  %v1578_v46 = vcombine.low %v262_v39, %v262_v39  ;;  %v2090_v50 = vcombine.low %v571_v40, %v2071_v41  ;;  %v1001_v53 = vld [vmem:[%s2004_s10 + $0x14] sm:$0xf]  ;;  %v1002_v54 = vld [vmem:[%s2004_s10 + $0x18] sm:$0x1] }
  0x17   : > { %v296_v22 = vshll.u32 %v2023_v18, 16  ;;  %1752 = vmatprep.mubr.msk.bf16.mxu1 %vm1928_vm0, %v1927_v1  ;;  %1777 = vmatpush3.bf16.msra.mxu1 %v1906_v16  ;;  %v300_v28 = vshrl.u32 %v2023_v18, 16  ;;  %v304_v29 = vshll.u32 %v2026_v21, 16  ;;  %v2094_v51 = vcombine.low %v2075_v42, %v2079_v43  ;;  %v998_v56 = vld [vmem:[%s2004_s10 + $0x8] sm:$0xf]  ;;  %v1910_v16 = vld [vmem:[%s2402_s1 + $0x50] sm:$0xff]  }
  0x18   : > { %v293_v24 = vrot.slane %v291_v20, 1  ;;  %1778 = vmatprep.subr.bf16.mxu1 %v1927_v1  ;;  %v308_v55 = vshrl.u32 %v2026_v21, 16  ;;  %v1005_v57 = vmax.bf16 %v1929_v5, %v999_v45  ;;  %v1006_v58 = vmax.bf16 %v1929_v5, %v1000_v49  ;;  %v1138_v62 = vld [vmem:[%s2004_s10 + $0x4] sm:$0x8]  ;;  %1406 = vst.msk [vmem:[%s2323_s14] sm:$0xf] %vm1405_vm9, %v1929_v5 }
  0x19   : > { %v298_v25 = vrot.slane %v296_v22, 1  ;;  %v306_v37 = vrot.slane %v304_v29, 1  ;;  %v1007_v60 = vmax.bf16 %v1929_v5, %v1001_v53  ;;  %v1008_v61 = vmax.bf16 %v1929_v5, %v1002_v54  ;;  %v1909_v29 = vld [vmem:[%s2402_s1 + $0x48] sm:$0xff]   ;;  %1407 = vst.msk [vmem:[%s2323_s14 + $0x4] sm:$0xf] %vm1405_vm9, %v1929_v5 }
  0x1a   : > { %v294_v27 = vor.u32 %v293_v24, %v289_v19  ;;  %v598_v63 = vrot.slane %v2090_v50, 3  ;;  %v599_v0 = vrot.slane %v2094_v51, 3  ;;  %v2117_v2 = vmax.bf16 %v1929_v5, %v2086_v48  ;;  %1408 = vst.msk [vmem:[%s2323_s14 + $0x8] sm:$0xf] %vm1405_vm9, %v1929_v5  ;;  %1409 = vst.msk [vmem:[%s2323_s14 + $0xc] sm:$0xf] %vm1405_vm9, %v1929_v5 }
  0x1b   : > { %1779 = vmatpush3.bf16.msra.mxu1 %v1907_v23  ;;  %v302_v36 = vor.u32 %v300_v28, %v298_v25  ;;  %v576_v3 = vmax.bf16 %v1929_v5, %v570_v52  ;;  %v310_v4 = vor.u32 %v308_v55, %v306_v37  ;;  %v2121_v6 = vmax.bf16 %v1929_v5, %v998_v56 }
  0x1c   : > { %v299_v32 = vsel %vm287_vm2, %v294_v27, %v298_v25  ;;  %1808 = vmatprep.subr.bf16.mxu1 %v1927_v1  ;;  %v2123_v7 = vcombine.low %v1005_v57, %v1006_v58  ;;  %v1139_v8 = vmax.bf16 %v1929_v5, %v1138_v62  ;;  %v1588_v9 = vcombine.low %v468_v59, %v2013_v11  ;;  %v1912_v58 = vld [vmem:[%s2402_s1 + $0x60] sm:$0xff]  }
  0x1d   : > { %1733 = vmatmul.mubr.msk.bf16.vlgmr.msra.gmra.mrb[0].mxu0 %vm323_vm1, %v299_v32  ;;  %v307_v44 = vsel %vm287_vm2, %v302_v36, %v306_v37  ;;  %v2127_v10 = vcombine.low %v1007_v60, %v1008_v61  ;;  %v600_v14 = vsel %vm597_vm3, %v598_v63, %v599_v0  ;;  %v1600_v15 = vcombine.low %v2117_v2, %v576_v3  ;;  %v2176_v32 = vld [vmem:[%s2004_s10 + $0x14] sm:$0x3] }
  0x1e   : > { %1761 = vmatpush3.bf16.msra.mxu0 %v1904_v26  ;;  %1736 = vmatprep.mubr.msk.bf16.mxu0 %vm1928_vm0, %v1927_v1  ;;  %v1655_v12 = vcombine.low %v1139_v8, %v2121_v6  ;;  %v1149_v13 = vrot.slane %v2123_v7, 3  ;;  %v478_v11 = vrot.slane %v1588_v9, 1  ;;  %v479_v20 = vrot.slane %v2023_v18, 1  ;;  %v1908_v26 = vld [vmem:[%s2402_s1 + $0x40] sm:$0xff]   ;;  %1410 = vst.msk [vmem:[%s2323_s14 + $0x10] sm:$0xf] %vm1405_vm9, %v1929_v5 }
  0x1f   : > { %1753 = vmatmul.mubr.msk.bf16.gmra.mrb[4].mxu1 %vm323_vm1, %v2023_v18  ;;  %1762 = vmatprep.subr.bf16.mxu0 %v1927_v1  ;;  %v1151_v17 = vrot.slane %v2127_v10, 3  ;;  %v601_v24 = vrot.slane %v1600_v15, 3  ;;  %v1911_v18 = vld [vmem:[%s2402_s1 + $0x58] sm:$0xff]   ;;  %v481_v28 = vrot.slane %v2026_v21, 1  ;;  %v697_v21 = vshrl.u32 %v2090_v50, 16 }
  0x20   : > { %1756 = vmatprep.mubr.msk.bf16.mxu1 %vm1928_vm0, %v1927_v1  ;;  %v1148_v19 = vrot.slane %v1655_v12, 3  ;;  %v480_v25 = vsel %vm477_vm4, %v478_v11, %v479_v20  ;;  %v700_v36 = vshll.u32 %v2090_v50, 16  ;;  %v705_v37 = vshrl.u32 %v2094_v51, 16  ;;  %v1914_v50 = vld [vmem:[%s2402_s1 + $0x70] sm:$0xff]   ;;  %v894_v9 = vld [vmem:[%s2004_s10 + $0x4] sm:$0xc] }
  0x21   : > { %v2144_v22 = vsel %vm597_vm3, %v1149_v13, %v1151_v17  ;;  %v602_v27 = vsel %vm597_vm3, %v599_v0, %v601_v24  ;;  %v482_v30 = vsel %vm477_vm4, %v479_v20, %v481_v28  ;;  %v686_v39 = vmax.bf16 %v1929_v5, %v2176_v32  ;;  %v1913_v0 = vld [vmem:[%s2402_s1 + $0x68] sm:$0xff]   ;;  %1411 = vst.msk [vmem:[%s2323_s14 + $0x14] sm:$0xf] %vm1405_vm9, %v1929_v5 }
  0x22   : > { %1763 = vmatpush3.bf16.msra.mxu0 %v1905_v38  ;;  %v2148_v23 = vsel %vm597_vm3, %v1148_v19, %v1149_v13  ;;  %v708_v38 = vshll.u32 %v2094_v51, 16  ;;  %v699_v40 = vrot.slane %v697_v21, 3  ;;  %v707_v45 = vrot.slane %v705_v37, 3  ;;  %v997_v51 = vld [vmem:[%s2004_s10 + $0x4] sm:$0xc] }
  0x23   : > { %1792 = vmatprep.subr.bf16.mxu0 %v1927_v1  ;;  %v1610_v47 = vcombine.low %v2117_v2, %v686_v39  ;;  %v1620_v49 = vcombine.low %v2071_v41, %v2075_v42  ;;  %v1915_v41 = vld [vmem:[%s2402_s1 + $0x78] sm:$0xff]   ;;  %v1003_v56 = vmax.bf16 %v1929_v5, %v997_v51  ;;  %v2214_v61 = vcombine.low %v2079_v43, %v2117_v2 }
  0x24   : > { %v1039_v3 = vshrl.u32 %v2123_v7, 16  ;;  %v1622_v8 = vcombine.low %v686_v39, %v686_v39  ;;  %v1048_v11 = vshrl.u32 %v2127_v10, 16  ;;  %v1051_v20 = vshll.u32 %v2127_v10, 16  ;;  %v1337_v10 = vld [vmem:[%s2406_s5 + $0x8] sm:$0xff]  ;;  %1413 = vst.msk [vmem:[%s2323_s14 + $0x18] sm:$0x1] %vm1412_vm10, %v1929_v5 }
  0x25   : > { %1737 = vmatmul.mubr.msk.bf16.gmra.mrb[4].mxu0 %vm323_vm1, %v307_v44  ;;  %v702_v44 = vrot.slane %v700_v36, 4  ;;  %v714_v54 = vshrl.u32 %v1610_v47, 16  ;;  %v717_v55 = vshll.u32 %v1610_v47, 16  ;;  %v1643_v62 = vcombine.low %v1003_v56, %v2121_v6  ;;  %v1916_v36 = vld [vmem:[%s2402_s1 + $0x80] sm:$0xff]  }
  0x26   : > { %1740 = vmatprep.mubr.msk.bf16.mxu0 %vm1928_vm0, %v1927_v1  ;;  %vm1498_vm2 = vcmask 254976   ;;  %vm1499_vm3 = vsmask.f32 1280 }
  0x27   : > { %1757 = vmatmul.mubr.msk.bf16.gmra.mrb[8].mxu1 %vm323_vm1, %v1578_v46  ;;  %v710_v46 = vrot.slane %v708_v38, 4  ;;  %v703_v52 = vor.u32 %v702_v44, %v699_v40  ;;  %v716_v59 = vrot.slane %v714_v54, 3  ;;  %v719_v60 = vrot.slane %v717_v55, 4  ;;  %v1917_v40 = vld [vmem:[%s2402_s1 + $0x88] sm:$0xff]   ;;  %v1340_v54 = vld [vmem:[%s2406_s5 + $0x20] sm:$0xf]  ;;  %vm1500_vm4 = vmand %vm1498_vm2, %vm1499_vm3 }
  0x28   : > { %1780 = vmatprep.mubr.msk.bf16.mxu1 %vm1928_vm0, %v1927_v1  ;;  %v1031_v43 = vshrl.u32 %v1643_v62, 16  ;;  %v1034_v2 = vshll.u32 %v1643_v62, 16 }
  0x29   : > { %v711_v53 = vor.u32 %v710_v46, %v707_v45  ;;  %v720_v63 = vor.u32 %v719_v60, %v716_v59  ;;  %v1918_v45 = vld [vmem:[%s2404_s3] sm:$0xff]  }
  0x2a   : > { %v1033_v12 = vrot.slane %v1031_v43, 2  ;;  %v1036_v13 = vrot.slane %v1034_v2, 3 }
  0x2b   : > { %v712_v57 = vsel %vm695_vm5, %v703_v52, %v711_v53  ;;  %v721_v6 = vsel %vm695_vm5, %v711_v53, %v720_v63 }
  0x2d   : > { %1741 = vmatmul.mubr.msk.bf16.gmra.mrb[8].mxu0 %vm323_vm1, %v310_v4  ;;  %v1042_v4 = vshll.u32 %v2123_v7, 16  ;;  %v1037_v7 = vor.u32 %v1036_v13, %v1033_v12 }
  0x2e   : > { %1764 = vmatprep.mubr.msk.bf16.mxu0 %vm1928_vm0, %v1927_v1 }
  0x2f   : > { %1781 = vmatmul.mubr.msk.bf16.vlgmr.msra.gmra.mrb[12].mxu1 %vm323_vm1, %v600_v14  ;;  %v1041_v14 = vrot.slane %v1039_v3, 2  ;;  %v1044_v15 = vrot.slane %v1042_v4, 3 }
  0x30   : > { %1784 = vmatprep.mubr.msk.bf16.mxu1 %vm1928_vm0, %v1927_v1  ;;  %1809 = vmatpush3.bf16.msra.mxu1 %v1910_v16  ;;  %v896_v16 = vmax.bf16 %v1929_v5, %v894_v9 }
  0x31   : > { %1810 = vmatprep.subr.bf16.mxu1 %v1927_v1  ;;  %v1045_v19 = vor.u32 %v1044_v15, %v1041_v14 }
  0x34   : > { %1811 = vmatpush3.bf16.msra.mxu1 %v1911_v18  ;;  %v895_v18 = vld [vmem:[%s2004_s10 + $0x14] sm:$0xf] }
  0x35   : > { %1765 = vmatmul.mubr.msk.bf16.vlgmr.msra.gmra.mrb[12].mxu0 %vm323_vm1, %v480_v25  ;;  %1840 = vmatprep.subr.bf16.mxu1 %v1927_v1  ;;  %v1046_v25 = vsel %vm1029_vm6, %v1037_v7, %v1045_v19 }
  0x36   : > { %1793 = vmatpush3.bf16.msra.mxu0 %v1908_v26  ;;  %1768 = vmatprep.mubr.msk.bf16.mxu0 %vm1928_vm0, %v1927_v1  ;;  %v1050_v26 = vrot.slane %v1048_v11, 2 }
  0x37   : > { %1785 = vmatmul.mubr.msk.bf16.gmra.mrb[16].mxu1 %vm323_vm1, %v602_v27  ;;  %1794 = vmatprep.subr.bf16.mxu0 %v1927_v1  ;;  %v1053_v27 = vrot.slane %v1051_v20, 3 }
  0x38   : > { %1788 = vmatprep.mubr.msk.bf16.mxu1 %vm1928_vm0, %v1927_v1 }
  0x3a   : > { %1795 = vmatpush3.bf16.msra.mxu0 %v1909_v29 }
  0x3b   : > { %1824 = vmatprep.subr.bf16.mxu0 %v1927_v1 }
  0x3d   : > { %1769 = vmatmul.mubr.msk.bf16.gmra.mrb[16].mxu0 %vm323_vm1, %v482_v30  ;;  %v897_v30 = vmax.bf16 %v1929_v5, %v895_v18 }
  0x3e   : > { %1772 = vmatprep.mubr.msk.bf16.mxu0 %vm1928_vm0, %v1927_v1 }
  0x3f   : > { %1789 = vmatmul.mubr.msk.bf16.gmra.mrb[20].mxu1 %vm323_vm1, %v601_v24  ;;  %v1632_v24 = vcombine.low %v896_v16, %v2075_v42  ;;  %v1054_v42 = vor.u32 %v1053_v27, %v1050_v26  ;;  %v1633_v37 = vcombine.low %v897_v30, %v897_v30 }
  0x40   : > { %1812 = vmatprep.mubr.msk.bf16.mxu1 %vm1928_vm0, %v1927_v1 }
  0x41   : > { %v910_v29 = vrot.slane %v1632_v24, 2  ;;  %v1055_v38 = vsel %vm1029_vm6, %v1045_v19, %v1054_v42  ;;  %v913_v39 = vrot.slane %v1633_v37, 2 }
  0x45   : > { %1773 = vmatmul.mubr.msk.bf16.gmra.mrb[20].mxu0 %vm323_vm1, %v481_v28  ;;  %v911_v28 = vrot.slane %v2214_v61, 2 }
  0x46   : > { %1796 = vmatprep.mubr.msk.bf16.mxu0 %vm1928_vm0, %v1927_v1 }
  0x47   : > { %1813 = vmatmul.mubr.msk.bf16.vlgmr.msra.gmra.mrb[24].mxu1 %vm323_vm1, %v1620_v49  ;;  %v912_v21 = vsel %vm909_vm7, %v910_v29, %v911_v28  ;;  %v914_v44 = vsel %vm909_vm7, %v911_v28, %v913_v39  ;;  %v1336_v49 = vld [vmem:[%s2406_s5] sm:$0xff] }
  0x48   : > { %1816 = vmatprep.mubr.msk.bf16.mxu1 %vm1928_vm0, %v1927_v1  ;;  %1841 = vmatpush3.bf16.msra.mxu1 %v1914_v50 }
  0x49   : > { %1842 = vmatprep.subr.bf16.mxu1 %v1927_v1  ;;  %1343 = vperm.xlu0 %1898, %v1336_v49  }
  0x4c   : > { %1843 = vmatpush3.bf16.msra.mxu1 %v1915_v41 }
  0x4d   : > { %1797 = vmatmul.mubr.msk.bf16.vlgmr.msra.gmra.mrb[24].mxu0 %vm323_vm1, %v712_v57  ;;  %1872 = vmatprep.subr.bf16.mxu1 %v1927_v1 }
  0x4e   : > { %1825 = vmatpush3.bf16.msra.mxu0 %v1912_v58  ;;  %1800 = vmatprep.mubr.msk.bf16.mxu0 %vm1928_vm0, %v1927_v1 }
  0x4f   : > { %1817 = vmatmul.mubr.msk.bf16.gmra.mrb[28].mxu1 %vm323_vm1, %v2214_v61  ;;  %1826 = vmatprep.subr.bf16.mxu0 %v1927_v1 }
  0x50   : > { %1820 = vmatprep.mubr.msk.bf16.mxu1 %vm1928_vm0, %v1927_v1  ;;  %1348 = vperm.xlu0 %1898, %v1337_v10  }
  0x52   : > { %1827 = vmatpush3.bf16.msra.mxu0 %v1913_v0 }
  0x53   : > { %1856 = vmatprep.subr.bf16.mxu0 %v1927_v1 }
  0x54   : > { %1363 = vperm.xlu0 %1898, %v1340_v54  }
  0x55   : > { %1801 = vmatmul.mubr.msk.bf16.gmra.mrb[28].mxu0 %vm323_vm1, %v721_v6 }
  0x56   : > { %1804 = vmatprep.mubr.msk.bf16.mxu0 %vm1928_vm0, %v1927_v1 }
  0x57   : > { %1821 = vmatmul.mubr.msk.bf16.gmra.mrb[32].mxu1 %vm323_vm1, %v1622_v8 }
  0x58   : > { %1844 = vmatprep.mubr.msk.bf16.mxu1 %vm1928_vm0, %v1927_v1 }
  0x5d   : > { %1805 = vmatmul.mubr.msk.bf16.gmra.mrb[32].mxu0 %vm323_vm1, %v720_v63 }
  0x5e   : > { %1828 = vmatprep.mubr.msk.bf16.mxu0 %vm1928_vm0, %v1927_v1 }
  0x5f   : > { %1845 = vmatmul.mubr.msk.bf16.vlgmr.msra.gmra.mrb[36].mxu1 %vm323_vm1, %v1046_v25 }
  0x60   : > { %1848 = vmatprep.mubr.msk.bf16.mxu1 %vm1928_vm0, %v1927_v1  ;;  %1873 = vmatpush3.bf16.msra.mxu1 %v1918_v45 }
  0x65   : > { %1829 = vmatmul.mubr.msk.bf16.vlgmr.msra.gmra.mrb[36].mxu0 %vm323_vm1, %v912_v21 }
  0x66   : > { %1857 = vmatpush3.bf16.msra.mxu0 %v1916_v36  ;;  %1832 = vmatprep.mubr.msk.bf16.mxu0 %vm1928_vm0, %v1927_v1 }
  0x67   : > { %1849 = vmatmul.mubr.msk.bf16.gmra.mrb[40].mxu1 %vm323_vm1, %v1055_v38  ;;  %1858 = vmatprep.subr.bf16.mxu0 %v1927_v1 }
  0x68   : > { %1852 = vmatprep.mubr.msk.bf16.mxu1 %vm1928_vm0, %v1927_v1 }
  0x6a   : > { %1859 = vmatpush3.bf16.msra.mxu0 %v1917_v40 }
  0x6d   : > { %1833 = vmatmul.mubr.msk.bf16.gmra.mrb[40].mxu0 %vm323_vm1, %v914_v44 }
  0x6e   : > { %1836 = vmatprep.mubr.msk.bf16.mxu0 %vm1928_vm0, %v1927_v1 }
  0x6f   : > { %1853 = vmatmul.mubr.msk.bf16.gmra.mrb[44].mxu1 %vm323_vm1, %v1054_v42 }
  0x70   : > { %1874 = vmatprep.mubr.msk.bf16.mxu1 %vm1928_vm0, %v1927_v1 }
  0x75   : > { %1837 = vmatmul.mubr.msk.bf16.gmra.mrb[44].mxu0 %vm323_vm1, %v913_v39 }
  0x76   : > { %1860 = vmatprep.mubr.msk.bf16.mxu0 %vm1928_vm0, %v1927_v1 }
  0x7d   : > { %1861 = vmatmul.mubr.msk.bf16.vlgmr.msra.gmra.mrb[48].mxu0 %vm323_vm1, %v2148_v23 }
  0x7e   : > { %1864 = vmatprep.mubr.msk.bf16.mxu0 %vm1928_vm0, %v1927_v1 }
  0x85   : > { %1865 = vmatmul.mubr.msk.bf16.gmra.mrb[52].mxu0 %vm323_vm1, %v2144_v22  ;;  %v1338_v22 = vld [vmem:[%s2406_s5 + $0x10] sm:$0xff] }
  0x86   : > { %1868 = vmatprep.mubr.msk.bf16.mxu0 %vm1928_vm0, %v1927_v1  ;;  %1353 = vperm.xlu1 %1899, %v1338_v22  }
  0x8d   : > { %1869 = vmatmul.mubr.msk.bf16.gmra.mrb[56].mxu0 %vm323_vm1, %v1151_v17  ;;  %v1339_v17 = vld [vmem:[%s2406_s5 + $0x18] sm:$0xff] }
  0x8e   : > { %1358 = vperm.xlu1 %1899, %v1339_v17  }
  0xe9   : > { %v445_v46 = vpop.f32.mrb[0].mxu1 }
  0xea   : > { %v1750_v23 = vpop.f32.mrb[1].mxu1 }
  0xeb   : > { %v448_v47 = vpop.f32.mrb[2].mxu1 }
  0xec   : > { %v1751_v50 = vpop.f32.mrb[3].mxu1 }
  0xf0   : > { %v367_v51 = vpop.f32.mrb[0].mxu0 }
  0xf1   : > { %v446_v52 = vadd.f32 %v445_v46, %v367_v51  ;;  %v1734_v53 = vpop.f32.mrb[1].mxu0 }
  0xf2   : > { %v370_v55 = vpop.f32.mrb[2].mxu0  ;;  %v453_v41 = vpop.f32.mrb[4].mxu1 }
  0xf3   : > { %v449_v56 = vadd.f32 %v448_v47, %v370_v55  ;;  %v1735_v57 = vpop.f32.mrb[3].mxu0  ;;  %v1754_v58 = vpop.f32.mrb[5].mxu1 }
  0xf4   : > { %v456_v59 = vpop.f32.mrb[6].mxu1 }
  0xf5   : > { %v1755_v60 = vpop.f32.mrb[7].mxu1 }
  0xf8   : > { %v375_v61 = vpop.f32.mrb[4].mxu0 }
  0xf9   : > { %v454_v62 = vadd.f32 %v453_v41, %v375_v61  ;;  %v1738_v63 = vpop.f32.mrb[5].mxu0 }
  0xfa   : > { %v378_v0 = vpop.f32.mrb[6].mxu0  ;;  %v461_v43 = vpop.f32.mrb[8].mxu1 }
  0xfb   : > { %v457_v2 = vadd.f32 %v456_v59, %v378_v0  ;;  %v1739_v3 = vpop.f32.mrb[7].mxu0  ;;  %v1758_v4 = vpop.f32.mrb[9].mxu1 }
  0xfc   : > { %v464_v6 = vpop.f32.mrb[10].mxu1 }
  0xfd   : > { %v1759_v8 = vpop.f32.mrb[11].mxu1 }
 0x100   : > { %v383_v9 = vpop.f32.mrb[8].mxu0 }
 0x101   : > { %v462_v12 = vadd.f32 %v461_v43, %v383_v9  ;;  %v1742_v13 = vpop.f32.mrb[9].mxu0 }
 0x102   : > { %v386_v14 = vpop.f32.mrb[10].mxu0  ;;  %v658_v15 = vpop.f32.mrb[12].mxu1 }
 0x103   : > { %v1743_v16 = vpop.f32.mrb[11].mxu0  ;;  %v1782_v7 = vpop.f32.mrb[13].mxu1 }
 0x104   : > { %v661_v19 = vpop.f32.mrb[14].mxu1 }
 0x105   : > { %v1783_v11 = vpop.f32.mrb[15].mxu1 }
 0x108   : > { %v538_v20 = vpop.f32.mrb[12].mxu0 }
 0x109   : > { %v560_v24 = vadd.f32 %v538_v20, %v446_v52  ;;  %v1766_v18 = vpop.f32.mrb[13].mxu0 }
 0x10a   : > { %v541_v25 = vpop.f32.mrb[14].mxu0  ;;  %v666_v26 = vpop.f32.mrb[16].mxu1 }
 0x10b   : > { %v561_v27 = vadd.f32 %v541_v25, %v449_v56  ;;  %v680_v28 = vadd.f32 %v658_v15, %v560_v24  ;;  %v1767_v29 = vpop.f32.mrb[15].mxu0  ;;  %v1786_v30 = vpop.f32.mrb[17].mxu1 }
 0x10c   : > { %v669_v42 = vpop.f32.mrb[18].mxu1 }
 0x10d   : > { %v681_v21 = vadd.f32 %v661_v19, %v561_v27  ;;  %v1787_v36 = vpop.f32.mrb[19].mxu1 }
 0x110   : > { %v546_v37 = vpop.f32.mrb[16].mxu0 }
 0x111   : > { %v562_v38 = vadd.f32 %v546_v37, %v454_v62  ;;  %v1770_v39 = vpop.f32.mrb[17].mxu0 }
 0x112   : > { %v549_v40 = vpop.f32.mrb[18].mxu0  ;;  %v674_v44 = vpop.f32.mrb[20].mxu1 }
 0x113   : > { %v563_v45 = vadd.f32 %v549_v40, %v457_v2  ;;  %v682_v46 = vadd.f32 %v666_v26, %v562_v38  ;;  %v1771_v23 = vpop.f32.mrb[19].mxu0  ;;  %v1790_v47 = vpop.f32.mrb[21].mxu1 }
 0x114   : > { %v677_v49 = vpop.f32.mrb[22].mxu1 }
 0x115   : > { %v683_v22 = vadd.f32 %v669_v42, %v563_v45  ;;  %v1791_v50 = vpop.f32.mrb[23].mxu1 }
 0x118   : > { %v554_v10 = vpop.f32.mrb[20].mxu0 }
 0x119   : > { %v564_v17 = vadd.f32 %v554_v10, %v462_v12  ;;  %v1774_v51 = vpop.f32.mrb[21].mxu0 }
 0x11a   : > { %v557_v52 = vpop.f32.mrb[22].mxu0  ;;  %v867_v53 = vpop.f32.mrb[24].mxu1 }
 0x11b   : > { %v684_v54 = vadd.f32 %v674_v44, %v564_v17  ;;  %v1775_v55 = vpop.f32.mrb[23].mxu0  ;;  %v1814_v41 = vpop.f32.mrb[25].mxu1 }
 0x11c   : > { %v870_v56 = vpop.f32.mrb[26].mxu1 }
 0x11d   : > { %v1815_v57 = vpop.f32.mrb[27].mxu1 }
 0x120   : > { %v777_v58 = vpop.f32.mrb[24].mxu0 }
 0x121   : > { %v799_v59 = vadd.f32 %v777_v58, %v680_v28  ;;  %v1798_v60 = vpop.f32.mrb[25].mxu0 }
 0x122   : > { %v780_v61 = vpop.f32.mrb[26].mxu0  ;;  %v875_v62 = vpop.f32.mrb[28].mxu1 }
 0x123   : > { %v800_v63 = vadd.f32 %v780_v61, %v681_v21  ;;  %v889_v0 = vadd.f32 %v867_v53, %v799_v59  ;;  %v1799_v43 = vpop.f32.mrb[27].mxu0  ;;  %v1818_v2 = vpop.f32.mrb[29].mxu1 }
 0x124   : > { %v878_v3 = vpop.f32.mrb[30].mxu1 }
 0x125   : > { %v890_v4 = vadd.f32 %v870_v56, %v800_v63  ;;  %v1819_v6 = vpop.f32.mrb[31].mxu1 }
 0x128   : > { %v785_v8 = vpop.f32.mrb[28].mxu0 }
 0x129   : > { %v801_v9 = vadd.f32 %v785_v8, %v682_v46  ;;  %v1802_v12 = vpop.f32.mrb[29].mxu0 }
 0x12a   : > { %v788_v13 = vpop.f32.mrb[30].mxu0  ;;  %v883_v14 = vpop.f32.mrb[32].mxu1 }
 0x12b   : > { %v802_v15 = vadd.f32 %v788_v13, %v683_v22  ;;  %v891_v16 = vadd.f32 %v875_v62, %v801_v9  ;;  %v1803_v7 = vpop.f32.mrb[31].mxu0  ;;  %v1822_v19 = vpop.f32.mrb[33].mxu1 }
 0x12c   : > { %v886_v11 = vpop.f32.mrb[34].mxu1 }
 0x12d   : > { %v892_v20 = vadd.f32 %v878_v3, %v802_v15  ;;  %v1823_v24 = vpop.f32.mrb[35].mxu1  ;;  %v1661_v3 = vld [vmem:[%s2403_s2] ss:$0 sm:$0xff] }
 0x130   : > { %v793_v18 = vpop.f32.mrb[32].mxu0 }
 0x131   : > { %v803_v25 = vadd.f32 %v793_v18, %v684_v54  ;;  %v1806_v26 = vpop.f32.mrb[33].mxu0 }
 0x132   : > { %v796_v27 = vpop.f32.mrb[34].mxu0  ;;  %v1111_v28 = vpop.f32.mrb[36].mxu1 }
 0x133   : > { %v893_v29 = vadd.f32 %v883_v14, %v803_v25  ;;  %v1807_v30 = vpop.f32.mrb[35].mxu0  ;;  %v1846_v42 = vpop.f32.mrb[37].mxu1 }
 0x134   : > { %v1114_v21 = vpop.f32.mrb[38].mxu1 }
 0x135   : > { %v1847_v36 = vpop.f32.mrb[39].mxu1 }
 0x138   : > { %v970_v37 = vpop.f32.mrb[36].mxu0 }
 0x139   : > { %v992_v38 = vadd.f32 %v970_v37, %v889_v0  ;;  %v1830_v39 = vpop.f32.mrb[37].mxu0 }
 0x13a   : > { %v973_v40 = vpop.f32.mrb[38].mxu0  ;;  %v1119_v44 = vpop.f32.mrb[40].mxu1 }
 0x13b   : > { %v993_v45 = vadd.f32 %v973_v40, %v890_v4  ;;  %v1133_v46 = vadd.f32 %v1111_v28, %v992_v38  ;;  %v1831_v23 = vpop.f32.mrb[39].mxu0  ;;  %v1850_v47 = vpop.f32.mrb[41].mxu1 }
 0x13c   : > { %v1122_v49 = vpop.f32.mrb[42].mxu1  ;;  %v1373_v23 = vunpack.c.l.bf16 %v2051_v34  ;;  %v2351_v47 = vld [vmem:[%s2405_s4] ss:$0 sm:$0xff] }
 0x13d   : > { %v1134_v22 = vadd.f32 %v1114_v21, %v993_v45  ;;  %v1851_v50 = vpop.f32.mrb[43].mxu1  ;;  %v1372_v45 = vunpack.c.l.bf16 %v2046_v33 }
 0x140   : > { %v978_v10 = vpop.f32.mrb[40].mxu0 }
 0x141   : > { %v994_v17 = vadd.f32 %v978_v10, %v891_v16  ;;  %v1834_v51 = vpop.f32.mrb[41].mxu0  ;;  %v1387_v10 = vrot.slane %v1373_v23, 7 }
 0x142   : > { %v981_v52 = vpop.f32.mrb[42].mxu0  ;;  %v1127_v53 = vpop.f32.mrb[44].mxu1 }
 0x143   : > { %v995_v54 = vadd.f32 %v981_v52, %v892_v20  ;;  %v1135_v55 = vadd.f32 %v1119_v44, %v994_v17  ;;  %v1835_v41 = vpop.f32.mrb[43].mxu0  ;;  %v1854_v56 = vpop.f32.mrb[45].mxu1  ;;  %v1374_v52 = vunpack.c.l.bf16 %v2054_v35 }
 0x144   : > { %v1130_v57 = vpop.f32.mrb[46].mxu1  ;;  %v1375_v41 = vunpack.c.l.bf16 %v2086_v48 }
 0x145   : > { %v1136_v58 = vadd.f32 %v1122_v49, %v995_v54  ;;  %v1855_v59 = vpop.f32.mrb[47].mxu1 }
 0x146   : > { %v1389_v59 = vrot.slane %v1374_v52, 7 }
 0x148   : > { %v986_v60 = vpop.f32.mrb[44].mxu0  ;;  %v1390_v48 = vsel %vm1383_vm11, %v1387_v10, %v1389_v59 }
 0x149   : > { %v996_v61 = vadd.f32 %v986_v60, %v893_v29  ;;  %v1838_v62 = vpop.f32.mrb[45].mxu0 }
 0x14a   : > { %v989_v63 = vpop.f32.mrb[46].mxu0 }
 0x14b   : > { %v1137_v0 = vadd.f32 %v1127_v53, %v996_v61  ;;  %v1839_v43 = vpop.f32.mrb[47].mxu0  ;;  %v1391_v63 = vrot.slane %v1375_v41, 7 }
 0x14c   : > { %v1491_v43 = vld [vmem:[%s2323_s14] sm:$0x8] }
 0x150   : > { %v1208_v2 = vpop.f32.mrb[48].mxu0 }
 0x151   : > { %v1230_v4 = vadd.f32 %v1208_v2, %v1133_v46  ;;  %v1862_v6 = vpop.f32.mrb[49].mxu0  ;;  %v1344_v46 = vpop.permute.xlu0 %1343 }
 0x152   : > { %v1211_v8 = vpop.f32.mrb[50].mxu0 }
 0x153   : > { %v1242_v9 = vadd.f32 %v1661_v3, %v1230_v4  ;;  %v1231_v12 = vadd.f32 %v1211_v8, %v1134_v22  ;;  %v1863_v13 = vpop.f32.mrb[51].mxu0  ;;  %v1385_v22 = vrot.slane %v1372_v45, 7 }
 0x155   : > { %v1243_v14 = vadd.f32 %v1661_v3, %v1231_v12  ;;  %v1247_v15 = vmax.f32 %v1242_v9, 0.0  ;;  %v1349_v33 = vpop.permute.xlu0 %1348  ;;  %v1376_v9 = vunpack.c.l.bf16 %v2176_v32 }
 0x157   : > { %v1248_v16 = vmax.f32 %v1243_v14, 0.0 }
 0x158   : > { %v1216_v7 = vpop.f32.mrb[52].mxu0 }
 0x159   : > { %v1252_v19 = vpack.c.bf16 %v1248_v16, %v1247_v15  ;;  %v1232_v11 = vadd.f32 %v1216_v7, %v1135_v55  ;;  %v1866_v20 = vpop.f32.mrb[53].mxu0  ;;  %v1388_v55 = vsel %vm1383_vm11, %v1385_v22, %v1387_v10  ;;  %v1364_v45 = vpop.permute.xlu0 %1363 }
 0x15a   : > { %v1219_v24 = vpop.f32.mrb[54].mxu0  ;;  %v1392_v20 = vsel %vm1383_vm11, %v1389_v59, %v1391_v63 }
 0x15b   : > { %v1244_v18 = vadd.f32 %v1661_v3, %v1232_v11  ;;  %v1233_v25 = vadd.f32 %v1219_v24, %v1136_v58  ;;  %v1867_v26 = vpop.f32.mrb[55].mxu0  ;;  %1875 = vmatmul.mubr.msk.bf16.vlgmr.msra.gmra.mrb[48].mxu1 %vm1270_vm8, %v1252_v19  ;;  %v1354_v58 = vpop.permute.xlu1 %1353 }
 0x15c   : > { %1878 = vmatprep.mubr.msk.bf16.mxu1 %vm1928_vm0, %v1927_v1 }
 0x15d   : > { %v1245_v27 = vadd.f32 %v1661_v3, %v1233_v25  ;;  %v1249_v28 = vmax.f32 %v1244_v18, 0.0 }
 0x15f   : > { %v1250_v29 = vmax.f32 %v1245_v27, 0.0  ;;  %v1359_v7 = vpop.permute.xlu1 %1358 }
 0x160   : > { %v1224_v30 = vpop.f32.mrb[56].mxu0 }
 0x161   : > { %v1253_v42 = vpack.c.bf16 %v1250_v29, %v1249_v28  ;;  %v1234_v21 = vadd.f32 %v1224_v30, %v1137_v0  ;;  %v1870_v36 = vpop.f32.mrb[57].mxu0  ;;  %v1393_v29 = vrot.slane %v1376_v9, 7 }
 0x162   : > { %v1227_v37 = vpop.f32.mrb[58].mxu0 }
 0x163   : > { %v1246_v38 = vadd.f32 %v1661_v3, %v1234_v21  ;;  %v1871_v39 = vpop.f32.mrb[59].mxu0  ;;  %1879 = vmatmul.mubr.msk.bf16.gmra.mrb[52].mxu1 %vm1270_vm8, %v1253_v42  ;;  %v1394_v23 = vsel %vm1383_vm11, %v1391_v63, %v1393_v29 }
 0x164   : > { %1882 = vmatprep.mubr.msk.bf16.mxu1 %vm1928_vm0, %v1927_v1  ;;  %v1371_v1 = vunpack.c.l.bf16 %v2042_v31  ;;  %vm1431_vm0 = vsmask.f32 7440 }
 0x165   : > { %v1251_v40 = vmax.f32 %v1246_v38, 0.0  ;;  %vm2374_vm1 = vmor %vm1430_vm15, %vm1431_vm0 }
 0x166   : > { %v1384_v49 = vrot.slane %v1371_v1, 7 }
 0x167   : > { %v1254_v44 = vpack.c.bf16 %v1251_v40, %v1251_v40 }
 0x168   : > { %v1386_v31 = vsel %vm1383_vm11, %v1384_v49, %v1385_v22 }
 0x16b   : > { %1883 = vmatmul.mubr.msk.bf16.gmra.mrb[56].mxu1 %vm1270_vm8, %v1254_v44 }
 0x22e   : > { %v1314_v50 = vpop.f32.mrb[48].mxu1 }
 0x22f   : > { %v1315_v17 = vadd.f32 %v2351_v47, %v1314_v50  ;;  %v1876_v5 = vpop.f32.mrb[49].mxu1 }
 0x230   : > { %v1317_v51 = vpop.f32.mrb[50].mxu1 }
 0x231   : > { %v1366_v34 = vmul.f32 %v1344_v46, %v1315_v17  ;;  %v1318_v53 = vadd.f32 %v2351_v47, %v1317_v51  ;;  %v1877_v54 = vpop.f32.mrb[51].mxu1 }
 0x233   : > { %v1400_v56 = vadd.f32 %v1386_v31, %v1366_v34  ;;  %v1367_v57 = vmul.f32 %v1349_v33, %v1318_v53 }
 0x235   : > { %v1674_v60 = vpack.c.bf16 %v1400_v56, %v1400_v56  ;;  %v1401_v61 = vadd.f32 %v1388_v55, %v1367_v57 }
 0x236   : > { %v1322_v62 = vpop.f32.mrb[52].mxu1 }
 0x237   : > { %v1434_v35 = vshll.u32 %v1674_v60, 16  ;;  %v1437_v0 = vshrl.u32 %v1674_v60, 16  ;;  %v1675_v2 = vpack.c.bf16 %v1401_v61, %v1401_v61  ;;  %v1323_v3 = vadd.f32 %v2351_v47, %v1322_v62  ;;  %v1880_v4 = vpop.f32.mrb[53].mxu1 }
 0x238   : > { %v1325_v8 = vpop.f32.mrb[54].mxu1 }
 0x239   : > { %v1436_v12 = vrot.slane %v1434_v35, 5  ;;  %v1439_v13 = vrot.slane %v1437_v0, 4  ;;  %v1443_v14 = vshll.u32 %v1675_v2, 16  ;;  %v1447_v15 = vshrl.u32 %v1675_v2, 16  ;;  %v1881_v16 = vpop.f32.mrb[55].mxu1 }
 0x23a   : > { %v1368_v19 = vmul.f32 %v1354_v58, %v1323_v3  ;;  %v1326_v11 = vadd.f32 %v2351_v47, %v1325_v8  ;;  %v1501_v35 = vld [vmem:[%s2323_s14 + $0x14] sm:$0x3] }
 0x23b   : > { %v1440_v24 = vor.u32 %v1439_v13, %v1436_v12  ;;  %v1492_v18 = vsel %vm2361_vm14, %v1436_v12, %v1491_v43  ;;  %v1445_v25 = vrot.slane %v1443_v14, 5  ;;  %v1449_v26 = vrot.slane %v1447_v15, 4 }
 0x23c   : > { %1493 = vst [vmem:[%s2323_s14] sm:$0x8] %v1492_v18  ;;  %v1402_v27 = vadd.f32 %v1390_v48, %v1368_v19  ;;  %v1369_v28 = vmul.f32 %v1359_v7, %v1326_v11 }
 0x23d   : > { %v1441_v30 = vrot.slane %v1440_v24, 4  ;;  %v1450_v42 = vor.u32 %v1449_v26, %v1445_v25 }
 0x23e   : > { %v1676_v21 = vpack.c.bf16 %v1402_v27, %v1402_v27  ;;  %v1403_v36 = vadd.f32 %v1392_v20, %v1369_v28  ;;  %v1330_v37 = vpop.f32.mrb[56].mxu1 }
 0x23f   : > { %v1446_v38 = vsel %vm2374_vm1, %v1441_v30, %v1445_v25  ;;  %v1331_v39 = vadd.f32 %v2351_v47, %v1330_v37  ;;  %v1884_v40 = vpop.f32.mrb[57].mxu1  ;;  %v1451_v22 = vrot.slane %v1450_v42, 4 }
 0x240   : > { %1494 = vst.msk [vmem:[%s2323_s14 + $0x4] sm:$0xf] %vm1405_vm9, %v1446_v38  ;;  %v1453_v44 = vshll.u32 %v1676_v21, 16  ;;  %v1457_v1 = vshrl.u32 %v1676_v21, 16  ;;  %v1677_v46 = vpack.c.bf16 %v1403_v36, %v1403_v36  ;;  %v1333_v49 = vpop.f32.mrb[58].mxu1 }
 0x241   : > { %v1370_v50 = vmul.f32 %v1364_v45, %v1331_v39  ;;  %v1885_v10 = vpop.f32.mrb[59].mxu1 }
 0x242   : > { %v1455_v17 = vrot.slane %v1453_v44, 5  ;;  %v1459_v5 = vrot.slane %v1457_v1, 4  ;;  %v1463_v31 = vshll.u32 %v1677_v46, 16  ;;  %v1467_v51 = vshrl.u32 %v1677_v46, 16 }
 0x243   : > { %v1404_v47 = vadd.f32 %v1394_v23, %v1370_v50 }
 0x244   : > { %v1456_v33 = vsel %vm2374_vm1, %v1451_v22, %v1455_v17  ;;  %v1460_v52 = vor.u32 %v1459_v5, %v1455_v17  ;;  %v1465_v34 = vrot.slane %v1463_v31, 5  ;;  %v1469_v53 = vrot.slane %v1467_v51, 4 }
 0x245   : > { %1495 = vst.msk [vmem:[%s2323_s14 + $0x8] sm:$0xf] %vm1405_vm9, %v1456_v33  ;;  %v1678_v54 = vpack.c.bf16 %v1404_v47, %v1404_v47 }
 0x246   : > { %v1461_v55 = vrot.slane %v1460_v52, 4  ;;  %v1470_v41 = vor.u32 %v1469_v53, %v1465_v34 }
 0x247   : > { %v1473_v56 = vshll.u32 %v1678_v54, 16  ;;  %v1477_v57 = vshrl.u32 %v1678_v54, 16 }
 0x248   : > { %v1466_v58 = vsel %vm2374_vm1, %v1461_v55, %v1465_v34  ;;  %v1471_v59 = vrot.slane %v1470_v41, 4 }
 0x249   : > { %1496 = vst.msk [vmem:[%s2323_s14 + $0xc] sm:$0xf] %vm1405_vm9, %v1466_v58  ;;  %v1475_v60 = vrot.slane %v1473_v56, 5  ;;  %v1479_v61 = vrot.slane %v1477_v57, 4 }
 0x24b   : > { %v1476_v62 = vsel %vm2374_vm1, %v1471_v59, %v1475_v60  ;;  %v1480_v63 = vor.u32 %v1479_v61, %v1475_v60 }
 0x24c   : > { %1497 = vst.msk [vmem:[%s2323_s14 + $0x10] sm:$0xf] %vm1405_vm9, %v1476_v62 }
 0x24d   : > { %v1481_v0 = vrot.slane %v1480_v63, 4 }
 0x24f   : > { %v1502_v43 = vsel %vm1500_vm4, %v1481_v0, %v1501_v35 }
 0x250   : > { %1503 = vst [vmem:[%s2323_s14 + $0x14] sm:$0x3] %v1502_v43 }
 0x251 PF: > { %s16_s21 = sadd.s32 1, %s1925_s21  }
 0x252   : > { %p13_p4 = scmp.ge.s32.totalorder %s16_s21, 4  }
 0x254   :  { %15 = sbr.rel (!%p13_p4) target bundleno = 1 (0x1), region = 82 }

// kernel: vqvae_forward.16
= control target key start
LH: loop header
LB: loop body
LE: loop exit
PB: predicated region body
PF: predicated region fallthrough
CT: control target
= control target key end

     0   :  { %s596_s12 = smov 0   ;;  %s598_s13 = smov 0   ;;  %s659_s0 = inlined_call_operand.vmem [shape: bf16[32,128], index: 0, kind: input, shape index: {}]   ;;  %s660_s1 = inlined_call_operand.vmem [shape: bf16[128,128], index: 1, kind: input, shape index: {}]   ;;  %s661_s2 = inlined_call_operand.vmem [shape: f32[1,128], index: 2, kind: input, shape index: {}]   ;;  %s662_s3 = inlined_call_operand.vmem [shape: bf16[32,128], index: 3, kind: output, shape index: {}]  }
   0x1   :  { %s600_s14 = smov 0  }
   0x2 LB: > { %s25_s15 = sadd.s32 1, %s567_s13  ;;  %p459_p0 = scmp.ge.s32.totalorder %s571_s14, 1  ;;  %s571_s14 = sphi %s600_s14, %s13_s14   ;;  %s567_s13 = sphi %s598_s13, %s664_s13   ;;  %s563_s12 = sphi %s596_s12, %s663_s12  }
   0x3   : > { %p27_p1 = scmp.ge.s32.totalorder %s25_s15, 2  ;;  %p166_p2 = scmp.lt.s32.totalorder %s571_s14, 3 }
   0x5   : > { %s666_s15 = smov (%p27_p1, %s25_s15), 0  ;;  %p167_p3 = pnand %p459_p0, %p166_p2 }
   0x6   : > { %v541_v0 = vld [vmem:[%s660_s1] sm:$0xff] (!%p167_p3)   ;;  %v573_v1 = vmov (!%p167_p3), 0.0   ;;  %v542_v2 = vld [vmem:[%s660_s1 + $0x8] sm:$0xff] (!%p167_p3)   ;;  %vm574_vm0 = vmmov (!%p167_p3), 0   ;;  %s460_s20 = sshll.u32 (!%p167_p3), %s563_s12, 1  ;;  %v543_v3 = vld [vmem:[%s660_s1 + $0x10] sm:$0xff] (!%p167_p3)  }
   0x7   : > { %170 = sbr.rel (%p167_p3) target bundleno = 258 (0x102), region = 32  ;;  %494 = vmatprep.subr.bf16.mxu0 (!%p167_p3), %v573_v1  ;;  %510 = vmatprep.mubr.msk.bf16.mxu0 (!%p167_p3), %vm574_vm0, %v573_v1  ;;  %p199_p4 = scmp.lt.s32.totalorder (!%p167_p3), %s460_s20, 3  ;;  %v544_v4 = vld [vmem:[%s660_s1 + $0x18] sm:$0xff] (!%p167_p3)   ;;  %v545_v5 = vld [vmem:[%s660_s1 + $0x20] sm:$0xff] (!%p167_p3)   ;;  %v546_v6 = vld [vmem:[%s660_s1 + $0x28] sm:$0xff] (!%p167_p3)   ;;  %v575_v10 = vmov (!%p167_p3), 0  }
   0x8   : > { %495 = vmatpush3.bf16.msra.mxu0 (!%p167_p3), %v541_v0  ;;  %v547_v7 = vld [vmem:[%s660_s1 + $0x30] sm:$0xff] (!%p167_p3)   ;;  %v548_v13 = vld [vmem:[%s660_s1 + $0x38] sm:$0xff] (!%p167_p3)   ;;  %v473_v16 = vld [vmem:[%s661_s2] ss:$0 sm:$0xff] (!%p167_p3) }
   0x9   : > { %496 = vmatprep.subr.bf16.mxu0 (!%p167_p3), %v573_v1 }
   0xc   : > { %497 = vmatpush3.bf16.msra.mxu0 (!%p167_p3), %v542_v2 }
   0xd   : > { %498 = vmatprep.subr.bf16.mxu0 (!%p167_p3), %v573_v1 }
   0xe   : > { %s668_s20 = smov (!%p199_p4, %s460_s20), 3 }
   0xf   : > { %s461_s27 = sshll.u32 %s668_s20, 2 }
  0x10   : > { %499 = vmatpush3.bf16.msra.mxu0 %v543_v3  ;;  %s205_s5 = scalar_lea.vmem %s659_s0, %s461_s27  ;;  %s217_s17 = scalar_lea.vmem %s662_s3, %s461_s27 }
  0x11   : > { %500 = vmatprep.subr.bf16.mxu0 %v573_v1  ;;  %v226_v8 = vld [vmem:[%s205_s5] sm:$0xf]  ;;  %v227_v9 = vld [vmem:[%s205_s5 + $0x4] sm:$0xf] }
  0x12   : > { %v228_v11 = vmax.bf16 %v575_v10, %v226_v8  ;;  %v229_v12 = vmax.bf16 %v575_v10, %v227_v9 }
  0x14   : > { %501 = vmatpush3.bf16.msra.mxu0 %v544_v4  ;;  %v464_v14 = vcombine.low %v228_v11, %v229_v12 }
  0x15   : > { %502 = vmatprep.subr.bf16.mxu0 %v573_v1 }
  0x18   : > { %503 = vmatpush3.bf16.msra.mxu0 %v545_v5 }
  0x19   : > { %504 = vmatprep.subr.bf16.mxu0 %v573_v1 }
  0x1c   : > { %505 = vmatpush3.bf16.msra.mxu0 %v546_v6 }
  0x1d   : > { %506 = vmatprep.subr.bf16.mxu0 %v573_v1 }
  0x20   : > { %507 = vmatpush3.bf16.msra.mxu0 %v547_v7 }
  0x21   : > { %508 = vmatprep.subr.bf16.mxu0 %v573_v1 }
  0x24   : > { %509 = vmatpush3.bf16.msra.mxu0 %v548_v13 }
  0x27   : > { %511 = vmatmul.mubr.bf16.vlgmr.msra.gmra.mrb[0].mxu0 %v464_v14 }
  0xfa   : > { %v336_v15 = vpop.f32.mrb[0].mxu0 }
  0xfb   : > { %v512_v17 = vpop.f32.mrb[1].mxu0  ;;  %v359_v19 = vadd.f32 %v473_v16, %v336_v15 }
  0xfc   : > { %v339_v18 = vpop.f32.mrb[2].mxu0 }
  0xfd   : > { %v360_v20 = vadd.f32 %v473_v16, %v339_v18  ;;  %v513_v21 = vpop.f32.mrb[3].mxu0 }
  0xff   : > { %v483_v22 = vpack.c.bf16 %v360_v20, %v359_v19 }
 0x101   : > { %484 = vst [vmem:[%s217_s17] sm:$0xff] %v483_v22  }
 0x102 PF: > { %s13_s14 = sadd.s32 1, %s571_s14   ;;  %s663_s12 = smov %s567_s13 }
 0x103   : > { %p10_p5 = scmp.ge.s32.totalorder %s13_s14, 4   ;;  %s664_s13 = smov %s666_s15 }
 0x105   :  { %12 = sbr.rel (!%p10_p5) target bundleno = 2 (0x2), region = 73 }

// kernel: vqvae_forward.17
= control target key start
LH: loop header
LB: loop body
LE: loop exit
PB: predicated region body
PF: predicated region fallthrough
CT: control target
= control target key end

     0   :  { %s638_s12 = smov 0   ;;  %s722_s0 = inlined_call_operand.vmem [shape: bf16[32,128], index: 0, kind: input, shape index: {}]   ;;  %s723_s1 = inlined_call_operand.vmem [shape: f32[128,128], index: 1, kind: input, shape index: {}]   ;;  %s724_s2 = inlined_call_operand.vmem [shape: f32[1,128], index: 2, kind: input, shape index: {}]   ;;  %s725_s3 = inlined_call_operand.vmem [shape: bf16[32,128], index: 3, kind: output, shape index: {}]  }
   0x1 LB: > { %s454_s13 = sadd.s32 4294967295, %s613_s12   ;;  %p458_p0 = scmp.ge.s32.totalorder %s613_s12, 1  ;;  %s613_s12 = sphi %s638_s12, %s13_s12  }
   0x2   : > { %p138_p1 = scmp.lt.s32.totalorder %s613_s12, 3 }
   0x4   : > { %p139_p2 = pnand %p458_p0, %p138_p1 }
   0x5   : > { %v177_v0 = vld [vmem:[%s723_s1] sm:$0xff] (!%p139_p2)  ;;  %v178_v1 = vld [vmem:[%s723_s1 + $0x8] sm:$0xff] (!%p139_p2)  ;;  %v179_v2 = vld [vmem:[%s723_s1 + $0x10] sm:$0xff] (!%p139_p2)  ;;  %s459_s20 = sshll.u32 (!%p139_p2), %s454_s13, 1  ;;  %v615_v3 = vmov (!%p139_p2), 0.0   ;;  %vm616_vm0 = vmmov (!%p139_p2), 0   ;;  %v269_v43 = vlaneseq (!%p139_p2) }
   0x6   : > { %142 = sbr.rel (%p139_p2) target bundleno = 948 (0x3b4), region = 32  ;;  %507 = vmatprep.subr.bf16.mxu0 (!%p139_p2), %v615_v3  ;;  %v201_v4 = vpack.c.bf16 (!%p139_p2), %v178_v1, %v177_v0  ;;  %v180_v5 = vld [vmem:[%s723_s1 + $0x18] sm:$0xff] (!%p139_p2)  ;;  %523 = vmatprep.mubr.msk.bf16.mxu0 (!%p139_p2), %vm616_vm0, %v615_v3  ;;  %p163_p3 = scmp.lt.s32.totalorder (!%p139_p2), %s459_s20, 3  ;;  %v181_v7 = vld [vmem:[%s723_s1 + $0x20] sm:$0xff] (!%p139_p2)  ;;  %v182_v8 = vld [vmem:[%s723_s1 + $0x28] sm:$0xff] (!%p139_p2) }
   0x7   : > { %v202_v6 = vpack.c.bf16 (!%p139_p2), %v180_v5, %v179_v2  ;;  %v203_v9 = vpack.c.bf16 (!%p139_p2), %v182_v8, %v181_v7  ;;  %v183_v13 = vld [vmem:[%s723_s1 + $0x30] sm:$0xff] (!%p139_p2)  ;;  %v184_v14 = vld [vmem:[%s723_s1 + $0x38] sm:$0xff] (!%p139_p2)  ;;  %v185_v18 = vld [vmem:[%s723_s1 + $0x40] sm:$0xff] (!%p139_p2)  ;;  %v270_v44 = vand.u32 (!%p139_p2), 127, %v269_v43 }
   0x8   : > { %508 = vmatpush3.bf16.xpose.msra.mxu0 (!%p139_p2), %v201_v4  ;;  %563 = vmatprep.subr.bf16.mxu1 (!%p139_p2), %v201_v4  ;;  %v204_v16 = vpack.c.bf16 (!%p139_p2), %v184_v14, %v183_v13  ;;  %v186_v19 = vld [vmem:[%s723_s1 + $0x48] sm:$0xff] (!%p139_p2)  ;;  %v187_v21 = vld [vmem:[%s723_s1 + $0x50] sm:$0xff] (!%p139_p2)  ;;  %v188_v22 = vld [vmem:[%s723_s1 + $0x58] sm:$0xff] (!%p139_p2) }
   0x9   : > { %509 = vmatprep.subr.bf16.mxu0 (!%p139_p2), %v615_v3  ;;  %565 = vmatpush3.bf16.msra.mxu1 (!%p139_p2), %v201_v4  ;;  %v205_v20 = vpack.c.bf16 (!%p139_p2), %v186_v19, %v185_v18  ;;  %v206_v23 = vpack.c.bf16 (!%p139_p2), %v188_v22, %v187_v21  ;;  %v189_v24 = vld [vmem:[%s723_s1 + $0x60] sm:$0xff] (!%p139_p2)  ;;  %v190_v25 = vld [vmem:[%s723_s1 + $0x68] sm:$0xff] (!%p139_p2)  ;;  %v191_v27 = vld [vmem:[%s723_s1 + $0x70] sm:$0xff] (!%p139_p2) }
   0xa   : > { %567 = vmatprep.subr.bf16.mxu1 (!%p139_p2), %v202_v6  ;;  %v207_v26 = vpack.c.bf16 (!%p139_p2), %v190_v25, %v189_v24  ;;  %v192_v28 = vld [vmem:[%s723_s1 + $0x78] sm:$0xff] (!%p139_p2)  ;;  %v464_v36 = vld [vmem:[%s724_s2] ss:$0 sm:$0xff] (!%p139_p2) }
   0xb   : > { %v208_v29 = vpack.c.bf16 (!%p139_p2), %v192_v28, %v191_v27 }
   0xd   : > { %s727_s20 = smov (!%p163_p3, %s459_s20), 3  ;;  %569 = vmatpush3.bf16.msra.mxu1 %v202_v6 }
   0xe   : > { %s460_s27 = sshll.u32 %s727_s20, 2  ;;  %571 = vmatprep.subr.bf16.mxu1 %v203_v9 }
   0xf   : > { %s166_s30 = scalar_lea.vmem %s722_s0, %s460_s27  ;;  %s172_s4 = scalar_lea.vmem %s725_s3, %s460_s27 }
  0x10   : > { %v175_v10 = vld [vmem:[%s166_s30] sm:$0xff]   ;;  %510 = vmatpush3.bf16.xpose.msra.mxu0 %v202_v6  ;;  %v617_v6 = vmov 1.0  }
  0x11   : > { %v193_v11 = vunpack.c.l.bf16 %v175_v10  ;;  %v194_v12 = vunpack.c.h.bf16 %v175_v10  ;;  %511 = vmatprep.subr.bf16.mxu0 %v615_v3  ;;  %573 = vmatpush3.bf16.msra.mxu1 %v203_v9 }
  0x12   : > { %575 = vmatprep.subr.bf16.mxu1 %v204_v16 }
  0x13   : > { %v195_v15 = vmul.f32 %v193_v11, %v193_v11  ;;  %v196_v17 = vmul.f32 %v194_v12, %v194_v12 }
  0x15   : > { %197 = vadd.xlane.f32.xlu0 %v195_v15  ;;  %577 = vmatpush3.bf16.msra.mxu1 %v204_v16 }
  0x16   : > { %579 = vmatprep.subr.bf16.mxu1 %v205_v20 }
  0x18   : > { %512 = vmatpush3.bf16.xpose.msra.mxu0 %v203_v9 }
  0x19   : > { %199 = vadd.xlane.f32.xlu0 %v196_v17  ;;  %513 = vmatprep.subr.bf16.mxu0 %v615_v3 }
  0x1a   : > { %581 = vmatpush3.bf16.msra.mxu1 %v205_v20 }
  0x1b   : > { %583 = vmatprep.subr.bf16.mxu1 %v206_v23 }
  0x1e   : > { %585 = vmatpush3.bf16.msra.mxu1 %v206_v23 }
  0x1f   : > { %587 = vmatprep.subr.bf16.mxu1 %v207_v26 }
  0x20   : > { %514 = vmatpush3.bf16.xpose.msra.mxu0 %v204_v16 }
  0x21   : > { %515 = vmatprep.subr.bf16.mxu0 %v615_v3 }
  0x22   : > { %589 = vmatpush3.bf16.msra.mxu1 %v207_v26 }
  0x23   : > { %591 = vmatprep.subr.bf16.mxu1 %v208_v29 }
  0x26   : > { %593 = vmatpush3.bf16.msra.mxu1 %v208_v29 }
  0x28   : > { %516 = vmatpush3.bf16.xpose.msra.mxu0 %v205_v20 }
  0x29   : > { %517 = vmatprep.subr.bf16.mxu0 %v615_v3 }
  0x30   : > { %518 = vmatpush3.bf16.xpose.msra.mxu0 %v206_v23 }
  0x31   : > { %519 = vmatprep.subr.bf16.mxu0 %v615_v3 }
  0x38   : > { %520 = vmatpush3.bf16.xpose.msra.mxu0 %v207_v26 }
  0x39   : > { %521 = vmatprep.subr.bf16.mxu0 %v615_v3 }
  0x40   : > { %522 = vmatpush3.bf16.xpose.msra.mxu0 %v208_v29 }
  0x47   : > { %524 = vmatmul.mubr.bf16.vlgmr.msra.gmra.mrb[0].mxu0 %v175_v10 }
  0xa2   : > { %v198_v30 = vpop.xlane.xlu0 %197 }
  0xa6   : > { %v200_v35 = vpop.xlane.xlu0 %199 }
 0x11a   : > { %v249_v31 = vpop.f32.mrb[0].mxu0 }
 0x11b   : > { %v256_v32 = vmul.f32 2.0, %v249_v31  ;;  %v525_v33 = vpop.f32.mrb[1].mxu0 }
 0x11c   : > { %v252_v34 = vpop.f32.mrb[2].mxu0 }
 0x11d   : > { %v258_v37 = vsub.f32 %v198_v30, %v256_v32  ;;  %v257_v38 = vmul.f32 2.0, %v252_v34  ;;  %v526_v39 = vpop.f32.mrb[3].mxu0 }
 0x11f   : > { %v259_v40 = vsub.f32 %v200_v35, %v257_v38  ;;  %v267_v41 = vadd.f32 %v464_v36, %v258_v37 }
 0x121   : > { %271 = vmin.xlane.f32.xlu1 %v267_v41  ;;  %v268_v42 = vadd.f32 %v464_v36, %v259_v40 }
 0x125   : > { %273 = vmin.xlane.f32.xlu1 %v268_v42 }
 0x1ae   : > { %v272_v45 = vpop.xlane.xlu1 %271 }
 0x1af   : > { %vm275_vm1 = vcmp.le.f32.partialorder %v267_v41, %v272_v45 }
 0x1b0   : > { %v277_v46 = vsel %vm275_vm1, %v270_v44, 128 }
 0x1b1   : > { %v280_v47 = vshra.s32 %v277_v46, 16  ;;  %v279_v53 = vand.u32 65535, %v277_v46 }
 0x1b2   : > { %v274_v48 = vpop.xlane.xlu1 %273 }
 0x1b3   : > { %vm276_vm2 = vcmp.le.f32.partialorder %v268_v42, %v274_v48  ;;  %v282_v49 = vcvt.s32.f32 %v280_v47  ;;  %v281_v56 = vcvt.s32.f32 %v279_v53 }
 0x1b4   : > { %v278_v50 = vsel %vm276_vm2, %v270_v44, 128 }
 0x1b5   : > { %283 = vmin.xlane.f32.xlu0 %v282_v49  ;;  %v294_v51 = vshra.s32 %v278_v50, 16  ;;  %v293_v54 = vand.u32 65535, %v278_v50 }
 0x1b7   : > { %v296_v52 = vcvt.s32.f32 %v294_v51  ;;  %v295_v59 = vcvt.s32.f32 %v293_v54 }
 0x1b9   : > { %297 = vmin.xlane.f32.xlu1 %v296_v52 }
 0x242   : > { %v284_v55 = vpop.xlane.xlu0 %283 }
 0x243   : > { %vm285_vm3 = vcmp.eq.f32.partialorder %v282_v49, %v284_v55  ;;  %v290_v61 = vcvt.f32.s32 %v284_v55 }
 0x244   : > { %v286_v57 = vsel %vm285_vm3, %v281_v56, inf }
 0x245   : > { %287 = vmin.xlane.f32.xlu0 %v286_v57  ;;  %v291_v63 = vshll.u32 %v290_v61, 16 }
 0x246   : > { %v298_v58 = vpop.xlane.xlu1 %297 }
 0x247   : > { %vm299_vm4 = vcmp.eq.f32.partialorder %v296_v52, %v298_v58  ;;  %v304_v0 = vcvt.f32.s32 %v298_v58 }
 0x248   : > { %v300_v60 = vsel %vm299_vm4, %v295_v59, inf }
 0x249   : > { %301 = vmin.xlane.f32.xlu1 %v300_v60  ;;  %v305_v4 = vshll.u32 %v304_v0, 16 }
 0x2d2   : > { %v288_v62 = vpop.xlane.xlu0 %287 }
 0x2d3   : > { %v289_v1 = vcvt.f32.s32 %v288_v62 }
 0x2d5   : > { %v292_v2 = vadd.s32 %v291_v63, %v289_v1 }
 0x2d6   : > { %v302_v3 = vpop.xlane.xlu1 %301 }
 0x2d7   : > { %v303_v5 = vcvt.f32.s32 %v302_v3  ;;  %vm307_vm5 = vcmp.eq.s32.totalorder %v270_v44, %v292_v2 }
 0x2d8   : > { %559 = vmatprep.mubr.msk.f32.mxu1 %vm307_vm5, %v617_v6 }
 0x2d9   : > { %v306_v7 = vadd.s32 %v305_v4, %v303_v5 }
 0x2db   : > { %vm308_vm6 = vcmp.eq.s32.totalorder %v270_v44, %v306_v7 }
 0x2dc   : > { %560 = vmatmul.mubr.msk.f32.vlgmr.msra.gmra.mrb[0].mxu1 %vm308_vm6, %v617_v6 }
 0x3af   : > { %v561_v8 = vpop.f32.mrb[0].mxu1 }
 0x3b0   : > { %v379_v9 = vpop.f32.mrb[1].mxu1 }
 0x3b1   : > { %v478_v10 = vpack.c.bf16 %v561_v8, %v379_v9 }
 0x3b3   : > { %479 = vst [vmem:[%s172_s4] sm:$0xff] %v478_v10  }
 0x3b4 PF: > { %s13_s12 = sadd.s32 1, %s613_s12  }
 0x3b5   : > { %p10_p4 = scmp.ge.s32.totalorder %s13_s12, 4  }
 0x3b7   :  { %12 = sbr.rel (!%p10_p4) target bundleno = 1 (0x1), region = 62 }

// kernel: vqvae_forward.18
= control target key start
LH: loop header
LB: loop body
LE: loop exit
PB: predicated region body
PF: predicated region fallthrough
CT: control target
= control target key end

     0   :  { %s593_s12 = smov 0   ;;  %s595_s13 = smov 0   ;;  %s656_s0 = inlined_call_operand.vmem [shape: bf16[32,128], index: 0, kind: input, shape index: {}]   ;;  %s657_s1 = inlined_call_operand.vmem [shape: bf16[128,128], index: 1, kind: input, shape index: {}]   ;;  %s658_s2 = inlined_call_operand.vmem [shape: f32[1,128], index: 2, kind: input, shape index: {}]   ;;  %s659_s3 = inlined_call_operand.vmem [shape: bf16[32,128], index: 3, kind: output, shape index: {}]  }
   0x1   :  { %s597_s14 = smov 0  }
   0x2 LB: > { %s25_s15 = sadd.s32 1, %s565_s13  ;;  %p457_p0 = scmp.ge.s32.totalorder %s569_s14, 1  ;;  %s569_s14 = sphi %s597_s14, %s13_s14   ;;  %s565_s13 = sphi %s595_s13, %s661_s13   ;;  %s561_s12 = sphi %s593_s12, %s660_s12  }
   0x3   : > { %p27_p1 = scmp.ge.s32.totalorder %s25_s15, 2  ;;  %p166_p2 = scmp.lt.s32.totalorder %s569_s14, 3 }
   0x5   : > { %s663_s15 = smov (%p27_p1, %s25_s15), 0  ;;  %p167_p3 = pnand %p457_p0, %p166_p2 }
   0x6   : > { %v538_v0 = vld [vmem:[%s657_s1] sm:$0xff] (!%p167_p3)   ;;  %v571_v1 = vmov (!%p167_p3), 0.0   ;;  %v539_v2 = vld [vmem:[%s657_s1 + $0x8] sm:$0xff] (!%p167_p3)   ;;  %vm572_vm0 = vmmov (!%p167_p3), 0   ;;  %s458_s20 = sshll.u32 (!%p167_p3), %s561_s12, 1  ;;  %v540_v3 = vld [vmem:[%s657_s1 + $0x10] sm:$0xff] (!%p167_p3)  }
   0x7   : > { %170 = sbr.rel (%p167_p3) target bundleno = 258 (0x102), region = 32  ;;  %492 = vmatprep.subr.bf16.mxu0 (!%p167_p3), %v571_v1  ;;  %508 = vmatprep.mubr.msk.bf16.mxu0 (!%p167_p3), %vm572_vm0, %v571_v1  ;;  %p199_p4 = scmp.lt.s32.totalorder (!%p167_p3), %s458_s20, 3  ;;  %v541_v4 = vld [vmem:[%s657_s1 + $0x18] sm:$0xff] (!%p167_p3)   ;;  %v542_v5 = vld [vmem:[%s657_s1 + $0x20] sm:$0xff] (!%p167_p3)   ;;  %v543_v6 = vld [vmem:[%s657_s1 + $0x28] sm:$0xff] (!%p167_p3)  }
   0x8   : > { %493 = vmatpush3.bf16.msra.mxu0 (!%p167_p3), %v538_v0  ;;  %v544_v7 = vld [vmem:[%s657_s1 + $0x30] sm:$0xff] (!%p167_p3)   ;;  %v545_v8 = vld [vmem:[%s657_s1 + $0x38] sm:$0xff] (!%p167_p3)   ;;  %v471_v11 = vld [vmem:[%s658_s2] ss:$0 sm:$0xff] (!%p167_p3) }
   0x9   : > { %494 = vmatprep.subr.bf16.mxu0 (!%p167_p3), %v571_v1 }
   0xc   : > { %495 = vmatpush3.bf16.msra.mxu0 (!%p167_p3), %v539_v2 }
   0xd   : > { %496 = vmatprep.subr.bf16.mxu0 (!%p167_p3), %v571_v1 }
   0xe   : > { %s665_s20 = smov (!%p199_p4, %s458_s20), 3 }
   0xf   : > { %s459_s23 = sshll.u32 %s665_s20, 2 }
  0x10   : > { %s205_s26 = scalar_lea.vmem %s656_s0, %s459_s23  ;;  %497 = vmatpush3.bf16.msra.mxu0 %v540_v3  ;;  %s217_s17 = scalar_lea.vmem %s659_s3, %s459_s23 }
  0x11   : > { %498 = vmatprep.subr.bf16.mxu0 %v571_v1  ;;  %v546_v9 = vld [vmem:[%s205_s26] sm:$0xff]  }
  0x14   : > { %499 = vmatpush3.bf16.msra.mxu0 %v541_v4 }
  0x15   : > { %500 = vmatprep.subr.bf16.mxu0 %v571_v1 }
  0x18   : > { %501 = vmatpush3.bf16.msra.mxu0 %v542_v5 }
  0x19   : > { %502 = vmatprep.subr.bf16.mxu0 %v571_v1 }
  0x1c   : > { %503 = vmatpush3.bf16.msra.mxu0 %v543_v6 }
  0x1d   : > { %504 = vmatprep.subr.bf16.mxu0 %v571_v1 }
  0x20   : > { %505 = vmatpush3.bf16.msra.mxu0 %v544_v7 }
  0x21   : > { %506 = vmatprep.subr.bf16.mxu0 %v571_v1 }
  0x24   : > { %507 = vmatpush3.bf16.msra.mxu0 %v545_v8 }
  0x27   : > { %509 = vmatmul.mubr.bf16.vlgmr.msra.gmra.mrb[0].mxu0 %v546_v9 }
  0xfa   : > { %v334_v10 = vpop.f32.mrb[0].mxu0 }
  0xfb   : > { %v510_v12 = vpop.f32.mrb[1].mxu0  ;;  %v357_v14 = vadd.f32 %v471_v11, %v334_v10 }
  0xfc   : > { %v337_v13 = vpop.f32.mrb[2].mxu0 }
  0xfd   : > { %v358_v15 = vadd.f32 %v471_v11, %v337_v13  ;;  %v511_v16 = vpop.f32.mrb[3].mxu0 }
  0xff   : > { %v481_v17 = vpack.c.bf16 %v358_v15, %v357_v14 }
 0x101   : > { %482 = vst [vmem:[%s217_s17] sm:$0xff] %v481_v17  }
 0x102 PF: > { %s13_s14 = sadd.s32 1, %s569_s14   ;;  %s660_s12 = smov %s565_s13 }
 0x103   : > { %p10_p5 = scmp.ge.s32.totalorder %s13_s14, 4   ;;  %s661_s13 = smov %s663_s15 }
 0x105   :  { %12 = sbr.rel (!%p10_p5) target bundleno = 2 (0x2), region = 73 }

// kernel: vqvae_forward.21
= control target key start
LH: loop header
LB: loop body
LE: loop exit
PB: predicated region body
PF: predicated region fallthrough
CT: control target
= control target key end

     0   :  { %s644_s12 = smov 0   ;;  %s646_s13 = smov 0   ;;  %s711_s0 = inlined_call_operand.vmem [shape: bf16[64,128], index: 0, kind: input, shape index: {}]   ;;  %s712_s1 = inlined_call_operand.vmem [shape: bf16[128,128], index: 1, kind: input, shape index: {}]   ;;  %s713_s2 = inlined_call_operand.vmem [shape: f32[1,128], index: 2, kind: input, shape index: {}]   ;;  %s714_s3 = inlined_call_operand.vmem [shape: bf16[64,128], index: 3, kind: output, shape index: {}]  }
   0x1   :  { %s648_s14 = smov 0  }
   0x2 LB: > { %s25_s15 = sadd.s32 1, %s617_s13  ;;  %p499_p0 = scmp.ge.s32.totalorder %s621_s14, 1  ;;  %s621_s14 = sphi %s648_s14, %s13_s14   ;;  %s617_s13 = sphi %s646_s13, %s716_s13   ;;  %s613_s12 = sphi %s644_s12, %s715_s12  }
   0x3   : > { %p27_p1 = scmp.ge.s32.totalorder %s25_s15, 2  ;;  %p166_p2 = scmp.lt.s32.totalorder %s621_s14, 3 }
   0x5   : > { %s718_s15 = smov (%p27_p1, %s25_s15), 0  ;;  %p167_p3 = pnand %p499_p0, %p166_p2 }
   0x6   : > { %v591_v0 = vld [vmem:[%s712_s1] sm:$0xff] (!%p167_p3)   ;;  %s500_s18 = sshll.u32 (!%p167_p3), %s613_s12, 2  ;;  %v592_v1 = vld [vmem:[%s712_s1 + $0x8] sm:$0xff] (!%p167_p3)   ;;  %v593_v2 = vld [vmem:[%s712_s1 + $0x10] sm:$0xff] (!%p167_p3)   ;;  %v623_v6 = vmov (!%p167_p3), 0  }
   0x7   : > { %170 = sbr.rel (%p167_p3) target bundleno = 259 (0x103), region = 32  ;;  %p199_p4 = scmp.lt.s32.totalorder (!%p167_p3), %s500_s18, 7  ;;  %546 = vmatprep.subr.bf16.mxu0 (!%p167_p3), %v591_v0  ;;  %v594_v3 = vld [vmem:[%s712_s1 + $0x18] sm:$0xff] (!%p167_p3)   ;;  %v595_v10 = vld [vmem:[%s712_s1 + $0x20] sm:$0xff] (!%p167_p3)   ;;  %v596_v11 = vld [vmem:[%s712_s1 + $0x28] sm:$0xff] (!%p167_p3)  }
   0x8   : > { %547 = vmatpush3.bf16.msra.mxu0 (!%p167_p3), %v591_v0  ;;  %v597_v12 = vld [vmem:[%s712_s1 + $0x30] sm:$0xff] (!%p167_p3)   ;;  %v598_v15 = vld [vmem:[%s712_s1 + $0x38] sm:$0xff] (!%p167_p3)   ;;  %v514_v20 = vld [vmem:[%s713_s2] ss:$0 sm:$0xff] (!%p167_p3) }
   0x9   : > { %548 = vmatprep.subr.bf16.mxu0 (!%p167_p3), %v592_v1 }
   0xc   : > { %549 = vmatpush3.bf16.msra.mxu0 (!%p167_p3), %v592_v1 }
   0xd   : > { %550 = vmatprep.subr.bf16.mxu0 (!%p167_p3), %v593_v2 }
   0xe   : > { %s720_s18 = smov (!%p199_p4, %s500_s18), 7 }
   0xf   : > { %s501_s23 = sshll.u32 %s720_s18, 2 }
  0x10   : > { %s205_s26 = scalar_lea.vmem %s711_s0, %s501_s23  ;;  %551 = vmatpush3.bf16.msra.mxu0 %v593_v2  ;;  %s217_s17 = scalar_lea.vmem %s714_s3, %s501_s23 }
  0x11   : > { %v228_v4 = vld [vmem:[%s205_s26] sm:$0xf]  ;;  %v229_v5 = vld [vmem:[%s205_s26 + $0x4] sm:$0xf]  ;;  %552 = vmatprep.subr.bf16.mxu0 %v594_v3  ;;  %v230_v13 = vld [vmem:[%s205_s26 + $0x8] sm:$0xf] }
  0x12   : > { %v232_v7 = vmax.bf16 %v623_v6, %v228_v4  ;;  %v233_v8 = vmax.bf16 %v623_v6, %v229_v5  ;;  %v231_v14 = vld [vmem:[%s205_s26 + $0xc] sm:$0xf]  ;;  %v234_v16 = vmax.bf16 %v623_v6, %v230_v13 }
  0x13   : > { %v235_v17 = vmax.bf16 %v623_v6, %v231_v14 }
  0x14   : > { %v504_v9 = vcombine.low %v232_v7, %v233_v8  ;;  %553 = vmatpush3.bf16.msra.mxu0 %v594_v3 }
  0x15   : > { %554 = vmatprep.subr.bf16.mxu0 %v595_v10  ;;  %v505_v18 = vcombine.low %v234_v16, %v235_v17 }
  0x16   : > { %562 = vmatprep.mubr.bf16.mxu0 %v504_v9 }
  0x18   : > { %555 = vmatpush3.bf16.msra.mxu0 %v595_v10 }
  0x19   : > { %556 = vmatprep.subr.bf16.mxu0 %v596_v11 }
  0x1c   : > { %557 = vmatpush3.bf16.msra.mxu0 %v596_v11 }
  0x1d   : > { %558 = vmatprep.subr.bf16.mxu0 %v597_v12 }
  0x20   : > { %559 = vmatpush3.bf16.msra.mxu0 %v597_v12 }
  0x21   : > { %560 = vmatprep.subr.bf16.mxu0 %v598_v15 }
  0x24   : > { %561 = vmatpush3.bf16.msra.mxu0 %v598_v15 }
  0x27   : > { %563 = vmatmul.mubr.bf16.vlgmr.msra.gmra.mrb[0].mxu0 %v505_v18 }
  0xfa   : > { %v564_v19 = vpop.f32.mrb[0].mxu0 }
  0xfb   : > { %v350_v21 = vpop.f32.mrb[1].mxu0  ;;  %v389_v23 = vadd.f32 %v564_v19, %v514_v20 }
  0xfc   : > { %v565_v22 = vpop.f32.mrb[2].mxu0  ;;  %v387_v26 = vadd.f32 %v514_v20, %v350_v21 }
  0xfd   : > { %v390_v24 = vadd.f32 %v565_v22, %v514_v20  ;;  %v353_v25 = vpop.f32.mrb[3].mxu0 }
  0xfe   : > { %v388_v27 = vadd.f32 %v514_v20, %v353_v25 }
  0xff   : > { %v533_v28 = vpack.c.bf16 %v390_v24, %v389_v23 }
 0x100   : > { %v528_v29 = vpack.c.bf16 %v388_v27, %v387_v26 }
 0x101   : > { %535 = vst [vmem:[%s217_s17 + $0x8] sm:$0xff] %v533_v28  }
 0x102   : > { %529 = vst [vmem:[%s217_s17] sm:$0xff] %v528_v29  }
 0x103 PF: > { %s13_s14 = sadd.s32 1, %s621_s14   ;;  %s715_s12 = smov %s617_s13 }
 0x104   : > { %p10_p5 = scmp.ge.s32.totalorder %s13_s14, 4   ;;  %s716_s13 = smov %s718_s15 }
 0x106   :  { %12 = sbr.rel (!%p10_p5) target bundleno = 2 (0x2), region = 73 }

// kernel: vqvae_forward.22
= control target key start
LH: loop header
LB: loop body
LE: loop exit
PB: predicated region body
PF: predicated region fallthrough
CT: control target
= control target key end

     0   :  { %s755_s12 = smov 0   ;;  %s757_s13 = smov 0   ;;  %s845_s0 = inlined_call_operand.vmem [shape: bf16[176,128], index: 0, kind: input, shape index: {}]   ;;  %s846_s1 = inlined_call_operand.vmem [shape: bf16[128,128], index: 1, kind: input, shape index: {}]   ;;  %s847_s2 = inlined_call_operand.vmem [shape: f32[1,128], index: 2, kind: input, shape index: {}]   ;;  %s848_s3 = inlined_call_operand.vmem [shape: f32[176,128], index: 3, kind: output, shape index: {}]  }
   0x1   :  { %s759_s14 = smov 0  }
   0x2 LB: > { %s25_s15 = sadd.s32 1, %s728_s13  ;;  %p599_p0 = scmp.ge.s32.totalorder %s732_s14, 1  ;;  %s732_s14 = sphi %s759_s14, %s13_s14   ;;  %s728_s13 = sphi %s757_s13, %s850_s13   ;;  %s724_s12 = sphi %s755_s12, %s849_s12  }
   0x3   : > { %p27_p1 = scmp.ge.s32.totalorder %s25_s15, 2  ;;  %p166_p2 = scmp.lt.s32.totalorder %s732_s14, 3 }
   0x5   : > { %s852_s15 = smov (%p27_p1, %s25_s15), 0  ;;  %p167_p3 = pnand %p599_p0, %p166_p2 }
   0x6   : > { %v702_v0 = vld [vmem:[%s846_s1] sm:$0xff] (!%p167_p3)   ;;  %s198_s18 = smul.u32 (!%p167_p3), 11, %s724_s12  ;;  %v703_v1 = vld [vmem:[%s846_s1 + $0x8] sm:$0xff] (!%p167_p3)   ;;  %v704_v2 = vld [vmem:[%s846_s1 + $0x10] sm:$0xff] (!%p167_p3)   ;;  %v734_v6 = vmov (!%p167_p3), 0  }
   0x7   : > { %170 = sbr.rel (%p167_p3) target bundleno = 265 (0x109), region = 32  ;;  %661 = vmatprep.subr.bf16.mxu1 (!%p167_p3), %v702_v0  ;;  %633 = vmatprep.subr.bf16.mxu0 (!%p167_p3), %v702_v0  ;;  %v705_v3 = vld [vmem:[%s846_s1 + $0x18] sm:$0xff] (!%p167_p3)   ;;  %v706_v14 = vld [vmem:[%s846_s1 + $0x20] sm:$0xff] (!%p167_p3)   ;;  %v707_v16 = vld [vmem:[%s846_s1 + $0x28] sm:$0xff] (!%p167_p3)  }
   0x8   : > { %p199_p4 = scmp.lt.s32.totalorder (!%p167_p3), %s198_s18, 21  ;;  %669 = vmatpush3.bf16.msra.mxu1 (!%p167_p3), %v702_v0  ;;  %634 = vmatpush3.bf16.msra.mxu0 (!%p167_p3), %v702_v0  ;;  %v708_v17 = vld [vmem:[%s846_s1 + $0x30] sm:$0xff] (!%p167_p3)   ;;  %v709_v22 = vld [vmem:[%s846_s1 + $0x38] sm:$0xff] (!%p167_p3)   ;;  %v616_v37 = vld [vmem:[%s847_s2] ss:$0 sm:$0xff] (!%p167_p3) }
   0x9   : > { %662 = vmatprep.subr.bf16.mxu1 (!%p167_p3), %v703_v1  ;;  %635 = vmatprep.subr.bf16.mxu0 (!%p167_p3), %v703_v1 }
   0xc   : > { %670 = vmatpush3.bf16.msra.mxu1 (!%p167_p3), %v703_v1  ;;  %636 = vmatpush3.bf16.msra.mxu0 (!%p167_p3), %v703_v1 }
   0xd   : > { %663 = vmatprep.subr.bf16.mxu1 (!%p167_p3), %v704_v2  ;;  %637 = vmatprep.subr.bf16.mxu0 (!%p167_p3), %v704_v2 }
   0xe   : > { %s854_s18 = smov (!%p199_p4, %s198_s18), 21 }
   0xf   : > { %s600_s23 = sshll.u32 %s854_s18, 2  ;;  %s601_s10 = sshll.u32 %s854_s18, 3 }
  0x10   : > { %s788_s26 = scalar_lea.vmem %s845_s0, %s600_s23  ;;  %671 = vmatpush3.bf16.msra.mxu1 %v704_v2  ;;  %638 = vmatpush3.bf16.msra.mxu0 %v704_v2  ;;  %s823_s19 = scalar_lea.vmem %s848_s3, %s601_s10 }
  0x11   : > { %v239_v4 = vld [vmem:[%s788_s26 + $0x10] sm:$0xf]  ;;  %v240_v5 = vld [vmem:[%s788_s26 + $0x14] sm:$0xf]  ;;  %v235_v9 = vld [vmem:[%s788_s26] sm:$0xf]  ;;  %664 = vmatprep.subr.bf16.mxu1 %v705_v3  ;;  %639 = vmatprep.subr.bf16.mxu0 %v705_v3 }
  0x12   : > { %v250_v7 = vmax.bf16 %v734_v6, %v239_v4  ;;  %v251_v8 = vmax.bf16 %v734_v6, %v240_v5  ;;  %v236_v10 = vld [vmem:[%s788_s26 + $0x4] sm:$0xf]  ;;  %v246_v11 = vmax.bf16 %v734_v6, %v235_v9  ;;  %v241_v18 = vld [vmem:[%s788_s26 + $0x18] sm:$0xf]  ;;  %v242_v19 = vld [vmem:[%s788_s26 + $0x1c] sm:$0xf] }
  0x13   : > { %v247_v12 = vmax.bf16 %v734_v6, %v236_v10  ;;  %v237_v20 = vld [vmem:[%s788_s26 + $0x8] sm:$0xf]  ;;  %v238_v21 = vld [vmem:[%s788_s26 + $0xc] sm:$0xf]  ;;  %v243_v23 = vld [vmem:[%s788_s26 + $0x20] sm:$0xf]  ;;  %v252_v25 = vmax.bf16 %v734_v6, %v241_v18  ;;  %v253_v26 = vmax.bf16 %v734_v6, %v242_v19 }
  0x14   : > { %v604_v13 = vcombine.low %v250_v7, %v251_v8  ;;  %672 = vmatpush3.bf16.msra.mxu1 %v705_v3  ;;  %640 = vmatpush3.bf16.msra.mxu0 %v705_v3  ;;  %v244_v24 = vld [vmem:[%s788_s26 + $0x24] sm:$0xf]  ;;  %v248_v27 = vmax.bf16 %v734_v6, %v237_v20  ;;  %v249_v28 = vmax.bf16 %v734_v6, %v238_v21  ;;  %v245_v34 = vld [vmem:[%s788_s26 + $0x28] sm:$0xf] }
  0x15   : > { %v602_v15 = vcombine.low %v246_v11, %v247_v12  ;;  %665 = vmatprep.subr.bf16.mxu1 %v706_v14  ;;  %641 = vmatprep.subr.bf16.mxu0 %v706_v14  ;;  %v254_v29 = vmax.bf16 %v734_v6, %v243_v23  ;;  %v255_v30 = vmax.bf16 %v734_v6, %v244_v24 }
  0x16   : > { %653 = vmatprep.mubr.bf16.mxu1 %v604_v13  ;;  %v605_v31 = vcombine.low %v252_v25, %v253_v26  ;;  %v603_v32 = vcombine.low %v248_v27, %v249_v28  ;;  %v256_v35 = vmax.bf16 %v734_v6, %v245_v34 }
  0x17   : > { %649 = vmatprep.mubr.bf16.mxu0 %v602_v15  ;;  %v606_v33 = vcombine.low %v254_v29, %v255_v30 }
  0x18   : > { %673 = vmatpush3.bf16.msra.mxu1 %v706_v14  ;;  %642 = vmatpush3.bf16.msra.mxu0 %v706_v14  ;;  %v607_v36 = vcombine.low %v256_v35, %v256_v35 }
  0x19   : > { %666 = vmatprep.subr.bf16.mxu1 %v707_v16  ;;  %643 = vmatprep.subr.bf16.mxu0 %v707_v16 }
  0x1c   : > { %674 = vmatpush3.bf16.msra.mxu1 %v707_v16  ;;  %644 = vmatpush3.bf16.msra.mxu0 %v707_v16 }
  0x1d   : > { %667 = vmatprep.subr.bf16.mxu1 %v708_v17  ;;  %645 = vmatprep.subr.bf16.mxu0 %v708_v17 }
  0x20   : > { %675 = vmatpush3.bf16.msra.mxu1 %v708_v17  ;;  %646 = vmatpush3.bf16.msra.mxu0 %v708_v17 }
  0x21   : > { %668 = vmatprep.subr.bf16.mxu1 %v709_v22  ;;  %647 = vmatprep.subr.bf16.mxu0 %v709_v22 }
  0x24   : > { %676 = vmatpush3.bf16.msra.mxu1 %v709_v22  ;;  %648 = vmatpush3.bf16.msra.mxu0 %v709_v22 }
  0x27   : > { %654 = vmatmul.mubr.bf16.vlgmr.msra.gmra.mrb[0].mxu1 %v605_v31  ;;  %650 = vmatmul.mubr.bf16.vlgmr.msra.gmra.mrb[0].mxu0 %v603_v32 }
  0x28   : > { %657 = vmatprep.mubr.bf16.mxu1 %v606_v33 }
  0x2f   : > { %658 = vmatmul.mubr.bf16.gmra.mrb[4].mxu1 %v607_v36 }
  0xfa   : > { %v655_v38 = vpop.f32.mrb[0].mxu1  ;;  %v651_v39 = vpop.f32.mrb[0].mxu0 }
  0xfb   : > { %v495_v40 = vadd.f32 %v655_v38, %v616_v37  ;;  %v416_v41 = vpop.f32.mrb[1].mxu1  ;;  %v491_v42 = vadd.f32 %v651_v39, %v616_v37  ;;  %v400_v43 = vpop.f32.mrb[1].mxu0 }
  0xfc   : > { %v493_v44 = vadd.f32 %v616_v37, %v416_v41  ;;  %v656_v45 = vpop.f32.mrb[2].mxu1  ;;  %v489_v46 = vadd.f32 %v616_v37, %v400_v43  ;;  %v652_v47 = vpop.f32.mrb[2].mxu0 }
  0xfd   : > { %506 = vst [vmem:[%s823_s19 + $0x30] sm:$0xff] %v495_v40  ;;  %v496_v48 = vadd.f32 %v656_v45, %v616_v37  ;;  %v419_v49 = vpop.f32.mrb[3].mxu1  ;;  %502 = vst [vmem:[%s823_s19 + $0x10] sm:$0xff] %v491_v42  ;;  %v492_v50 = vadd.f32 %v652_v47, %v616_v37  ;;  %v403_v51 = vpop.f32.mrb[3].mxu0 }
  0xfe   : > { %504 = vst [vmem:[%s823_s19 + $0x20] sm:$0xff] %v493_v44  ;;  %v494_v52 = vadd.f32 %v616_v37, %v419_v49  ;;  %500 = vst [vmem:[%s823_s19] sm:$0xff] %v489_v46  ;;  %v490_v53 = vadd.f32 %v616_v37, %v403_v51 }
  0xff   : > { %507 = vst [vmem:[%s823_s19 + $0x38] sm:$0xff] %v496_v48  ;;  %503 = vst [vmem:[%s823_s19 + $0x18] sm:$0xff] %v492_v50 }
 0x100   : > { %505 = vst [vmem:[%s823_s19 + $0x28] sm:$0xff] %v494_v52  ;;  %501 = vst [vmem:[%s823_s19 + $0x8] sm:$0xff] %v490_v53 }
 0x102   : > { %v659_v54 = vpop.f32.mrb[4].mxu1 }
 0x103   : > { %v499_v55 = vadd.f32 %v659_v54, %v616_v37  ;;  %v432_v56 = vpop.f32.mrb[5].mxu1 }
 0x104   : > { %v497_v57 = vadd.f32 %v616_v37, %v432_v56  ;;  %v660_v58 = vpop.f32.mrb[6].mxu1 }
 0x105   : > { %510 = vst [vmem:[%s823_s19 + $0x50] sm:$0xff] %v499_v55  ;;  %v435_v59 = vpop.f32.mrb[7].mxu1 }
 0x106   : > { %508 = vst [vmem:[%s823_s19 + $0x40] sm:$0xff] %v497_v57  ;;  %v498_v60 = vadd.f32 %v616_v37, %v435_v59 }
 0x108   : > { %509 = vst [vmem:[%s823_s19 + $0x48] sm:$0xff] %v498_v60 }
 0x109 PF: > { %s13_s14 = sadd.s32 1, %s732_s14   ;;  %s849_s12 = smov %s728_s13 }
 0x10a   : > { %p10_p5 = scmp.ge.s32.totalorder %s13_s14, 4   ;;  %s850_s13 = smov %s852_s15 }
 0x10c   :  { %12 = sbr.rel (!%p10_p5) target bundleno = 2 (0x2), region = 73 }

// kernel: vqvae_forward.23
= control target key start
LH: loop header
LB: loop body
LE: loop exit
PB: predicated region body
PF: predicated region fallthrough
CT: control target
= control target key end

     0   :  { %s109_s0 = inlined_call_operand.vmem [shape: f32[16,128], index: 0, kind: input, shape index: {}]   ;;  %s110_s1 = inlined_call_operand.vmem [shape: f32[16,128], index: 1, kind: input, shape index: {}]   ;;  %s111_s2 = inlined_call_operand.hbm [shape: f32[1,1], index: 2, kind: output, shape index: {}]  }
   0x1   :  { %v18_v0 = vld [vmem:[%s109_s0] sm:$0xff]  ;;  %v19_v1 = vld [vmem:[%s109_s0 + $0x8] sm:$0xff] }
   0x2   :  { %v20_v2 = vld [vmem:[%s110_s1] sm:$0xff]  ;;  %v21_v3 = vld [vmem:[%s110_s1 + $0x8] sm:$0xff] }
   0x3   :  { %v22_v4 = vsub.f32 %v18_v0, %v20_v2 }
   0x4   :  { %7 = vsyncpa [#allocation3], 0  ;;  %v23_v5 = vsub.f32 %v19_v1, %v21_v3  ;;  %s57_s1 = scalar_lea.hbm %s111_s2, 16 }
   0x5   :  { %v25_v6 = vmul.f32 %v22_v4, %v22_v4  ;;  %p58_p0 = scmp.ne.s32.totalorder %s111_s2, %s57_s1  ;;  %p61_p1 = scmp.lt.u32.totalorder %s57_s1, %s111_s2 }
   0x6   :  { %v26_v7 = vmul.f32 %v23_v5, %v23_v5 }
   0x7   :  { %p63_p2 = pnand %p61_p1, %p58_p0 }
   0x8   :  { %v27_v8 = vadd.f32 %v26_v7, %v25_v6 }
   0xa   :  { %28 = vadd.xlane.f32.xlu0 %v27_v8 }
  0x97   :  { %v29_v9 = vpop.xlane.xlu0 %28 }
  0x98   :  { %v30_v10 = vrot.slane %v29_v9, 4 }
  0x9a   :  { %v31_v11 = vadd.f32 %v30_v10, %v29_v9 }
  0x9c   :  { %v32_v12 = vrot.slane %v31_v11, 2 }
  0x9e   :  { %v33_v13 = vadd.f32 %v32_v12, %v31_v11 }
  0xa0   :  { %v34_v14 = vrot.slane %v33_v13, 1 }
  0xa2   :  { %v35_v15 = vadd.f32 %v34_v14, %v33_v13 }
  0xa4   :  { %53 = vpush %v35_v15 }
  0xd5   :  { %s54_s0 = spop %53 }
  0xd6   :  { %39 = sst [smem:[#allocation2]] %s54_s0 }
  0xd7   :  { %66 = shalt.err (!%p63_p2)
}
  0xd8   :  { %s69_s23 = smov [#allocation2]  }
  0xd9   :  { %47 = dma.smem_to_hbm %s69_s23, 16, %s111_s2, [#allocation3]  }
  0xda   :  { %67 = dma.done.wait [#allocation3], 16  }
  0xdb   :  { %68 = vsyncadd [#allocation3], 4294967280 }
  0xdc   :  { %51 = sfence }
  0xdd   :  { %52 = vsyncpa [#allocation3], 1 }

</bundles_post_ra>
